<compile_context>
chip_gen: v7x
topology: tpu7x:2x2x1
jax: 0.10.0
libtpu: 0.0.40
codegen_flags: <defaults>
</compile_context>

<pallas_src>
import math
import jax
import jax.numpy as jnp
import numpy as np
from jax.experimental import pallas as pl
from jax.experimental.pallas import tpu as pltpu

EPS = 1e-5
SQRT_2_OVER_PI = math.sqrt(2.0 / math.pi)

_BLOCK_KEYS = ("ln1g", "ln1b", "tw1", "tb1", "tw2", "tb2",
               "ln2g", "ln2b", "cw1", "cb1", "cw2", "cb2")


# ------------------------------------------------------------------ helpers --
def _gelu(x):
    # BERT tanh-approx GELU (matches the module's custom GELU exactly).
    return 0.5 * x * (1.0 + jnp.tanh(SQRT_2_OVER_PI * (x + 0.044715 * x * x * x)))


def _layernorm(x, g, b):
    # One-pass LN stats: both reductions are independent (shorter dep chain).
    mu = jnp.mean(x, axis=-1, keepdims=True)
    m2 = jnp.mean(x * x, axis=-1, keepdims=True)
    var = m2 - mu * mu
    return (x - mu) * jax.lax.rsqrt(var + EPS) * g + b


def _mixer_block_2d(x2d, B, P, D, blk):
    """One MLP-Mixer block on a (B*P, D) activation.

    Token mixing (Conv1d k=1 over patches) is a single matmul pair on the
    (P, B*D) layout; channel mixing (Linear over D) acts on all B*P rows.
    """
    (ln1g, ln1b, tw1, tb1, tw2, tb2, ln2g, ln2b, cw1, cb1, cw2, cb2) = blk

    # --- token mixing (PreNormResidual, chan_first FeedForward) ---
    xn = _layernorm(x2d, ln1g, ln1b)                                        # (B*P, D)
    # (B*P, D) -> (P, B*D): per-batch blocks side-by-side along the lane axis.
    xt = jnp.concatenate([xn[b * P:(b + 1) * P, :] for b in range(B)], axis=1)
    h = _gelu(jnp.dot(tw1, xt, preferred_element_type=jnp.float32) + tb1)   # (Pef, B*D)
    y = jnp.dot(tw2, h, preferred_element_type=jnp.float32) + tb2           # (P,  B*D)
    # (P, B*D) -> (B*P, D)
    tok = jnp.concatenate([y[:, b * D:(b + 1) * D] for b in range(B)], axis=0)
    x2d = x2d + tok

    # --- channel mixing (PreNormResidual, Linear FeedForward) ---
    xn2 = _layernorm(x2d, ln2g, ln2b)
    h2 = _gelu(jnp.dot(xn2, cw1, preferred_element_type=jnp.float32) + cb1)
    return x2d + jnp.dot(h2, cw2, preferred_element_type=jnp.float32) + cb2


def _ln_mean_rows(x2d, gamma, beta, B, P):
    """LayerNorm over D then mean over the P patches of each batch -> (B, D)."""
    xn = _layernorm(x2d, gamma, beta)
    rows = [jnp.mean(xn[b * P:(b + 1) * P, :], axis=0, keepdims=True)
            for b in range(B)]
    return jnp.concatenate(rows, axis=0)


# ------------------------------------------------------------------- kernel --
def _make_fused_kernel(B, Pc, P, depth, n_shared, nr, dim):
    def kernel(*refs):
        o_ref = refs[-1]
        it = iter(refs[:-1])
        xc_ref = next(it); xr_ref = next(it)
        cew, ceb = next(it), next(it)
        cblk = [next(it) for _ in range(12)]
        cln0g, cln0b = next(it), next(it)
        rew, reb = next(it), next(it)
        rblk = [next(it) for _ in range(12)]
        fblk = [next(it) for _ in range(12)]
        flng, flnb = next(it), next(it)
        hw, hb = next(it), next(it)

        # ---- classification branch (clf_net): embed -> depth blocks -> LN0 -> mean ----
        xc = jnp.dot(xc_ref[...], cew[...],
                     preferred_element_type=jnp.float32) + ceb[...]          # (B*Pc, dim)
        for l in range(depth):
            xc = _mixer_block_2d(xc, B, Pc, dim, tuple(t[l] for t in cblk))
        clf_fea = _ln_mean_rows(xc, cln0g[...], cln0b[...], B, Pc)           # (B, dim)

        # ---- regression trunk (reg_net): embed -> shared blocks ----
        xr = jnp.dot(xr_ref[...], rew[...],
                     preferred_element_type=jnp.float32) + reb[...]          # (B*P, dim)
        for l in range(n_shared):
            xr = _mixer_block_2d(xr, B, P, dim, tuple(t[l] for t in rblk))

        # ---- fea1 / fea2 branches -> LN -> mean ----
        feas = []
        for br in range(2):
            f = xr
            for l in range(nr):
                f = _mixer_block_2d(f, B, P, dim, tuple(t[br, l] for t in fblk))
            feas.append(_ln_mean_rows(f, flng[br], flnb[br], B, P))          # (B, dim)

        # ---- fuse + head (pool == 1, eval-mode dropout = identity) ----
        fused = jnp.concatenate([feas[0], feas[1], clf_fea], axis=-1)        # (B, 3*dim)
        logits = jnp.dot(fused, hw[...],
                         preferred_element_type=jnp.float32) + hb[...]       # (B, C)
        o_ref[...] = jax.nn.sigmoid(logits)
    return kernel


# ------------------------------------------------------------------ wrapper --
def _full_spec(a):
    nd = a.ndim
    return pl.BlockSpec(a.shape, lambda i, _nd=nd: (0,) * _nd)


def fuse_mixer_pallas(x1_2d, x2_2d, params, B, Pc, P):
    cb, rb, fb = params["clf_blocks"], params["reg_blocks"], params["fea_blocks"]
    depth = cb["tw1"].shape[0]
    n_shared = rb["tw1"].shape[0]
    nr = fb["tw1"].shape[1]
    dim = params["clf_embed_w"].shape[1]
    num_classes = params["head_w"].shape[1]

    args = (x1_2d, x2_2d,
            params["clf_embed_w"], params["clf_embed_b"],
            *(cb[k] for k in _BLOCK_KEYS),
            params["clf_ln0g"], params["clf_ln0b"],
            params["reg_embed_w"], params["reg_embed_b"],
            *(rb[k] for k in _BLOCK_KEYS),
            *(fb[k] for k in _BLOCK_KEYS),
            params["reg_lng"], params["reg_lnb"],
            params["head_w"], params["head_b"])

    return pl.pallas_call(
        _make_fused_kernel(B, Pc, P, depth, n_shared, nr, dim),
        out_shape=jax.ShapeDtypeStruct((B, num_classes), jnp.float32),
        grid=(1,),
        in_specs=[_full_spec(a) for a in args],
        out_specs=pl.BlockSpec((B, num_classes), lambda i: (0, 0)),
        compiler_params=pltpu.CompilerParams(
            dimension_semantics=("arbitrary",),
            vmem_limit_bytes=32 * 1024 * 1024),   # explicit (safe on v5e/v6e/v7x)
    )(*args)


# ------------------------------------------------------------------- params --
def _init_block_stack(key, lead, P, D, ef):
    Pef, Def = P * ef, D * ef
    ks = jax.random.split(key, 8)
    L = tuple(lead)
    nrm = lambda kk, shp, s: (s * jax.random.normal(kk, shp)).astype(jnp.float32)
    return dict(
        ln1g=jnp.ones(L + (1, D), jnp.float32), ln1b=jnp.zeros(L + (1, D), jnp.float32),
        tw1=nrm(ks[0], L + (Pef, P), 0.05), tb1=nrm(ks[1], L + (Pef, 1), 0.01),
        tw2=nrm(ks[2], L + (P, Pef), 0.05), tb2=nrm(ks[3], L + (P, 1), 0.01),
        ln2g=jnp.ones(L + (1, D), jnp.float32), ln2b=jnp.zeros(L + (1, D), jnp.float32),
        cw1=nrm(ks[4], L + (D, Def), 0.05), cb1=nrm(ks[5], L + (1, Def), 0.01),
        cw2=nrm(ks[6], L + (Def, D), 0.05), cb2=nrm(ks[7], L + (1, D), 0.01),
    )


def init_fuse_mixer_params(key, num_patches, D_in, dim, depth, num_classes,
                           expansion_factor=4, num_regmixer=1, clf_num_patches=None):
    Pc = num_patches if clf_num_patches is None else clf_num_patches
    assert depth - num_regmixer >= 1, "need at least one shared reg block"
    ks = iter(jax.random.split(key, 16))
    nrm = lambda kk, shp, s: (s * jax.random.normal(kk, shp)).astype(jnp.float32)
    return {
        # clf_net (Mixer3D)
        "clf_embed_w": nrm(next(ks), (D_in, dim), 0.05),
        "clf_embed_b": nrm(next(ks), (1, dim), 0.01),
        "clf_blocks": _init_block_stack(next(ks), (depth,), Pc, dim, expansion_factor),
        "clf_ln0g": jnp.ones((1, dim), jnp.float32),
        "clf_ln0b": jnp.zeros((1, dim), jnp.float32),
        # reg_net (RegMixer3D): shared trunk + fea1/fea2 stacks (stacked on axis 0)
        "reg_embed_w": nrm(next(ks), (D_in, dim), 0.05),
        "reg_embed_b": nrm(next(ks), (1, dim), 0.01),
        "reg_blocks": _init_block_stack(next(ks), (depth - num_regmixer,),
                                        num_patches, dim, expansion_factor),
        "fea_blocks": _init_block_stack(next(ks), (2, num_regmixer),
                                        num_patches, dim, expansion_factor),
        "reg_lng": jnp.ones((2, 1, dim), jnp.float32),
        "reg_lnb": jnp.zeros((2, 1, dim), jnp.float32),
        # clfmlp head (fc_size = 3*dim, pool=1)
        "head_w": nrm(next(ks), (3 * dim, num_classes), 0.05),
        "head_b": nrm(next(ks), (1, num_classes), 0.01),
    }


# ------------------------------------------------------------------ forward --
def fuse_mixer_forward(x, params, clfpat_index=None):
    """FuseMixer.forward (eval mode: dropout = identity, pool = 1, num_classes == 1)."""
    B, P = x.shape[0], x.shape[1]
    xf = x.reshape(B, P, -1).astype(jnp.float32)              # (B, P, D_in)
    D_in = xf.shape[-1]

    # clfpat_index is a static module attribute; skip the gather when it is arange.
    idx = np.arange(P) if clfpat_index is None else np.asarray(clfpat_index)
    if idx.shape[0] == P and np.array_equal(idx, np.arange(P)):
        x1 = xf
    else:
        x1 = xf[:, idx, :]                                    # static trace-time gather
    Pc = x1.shape[1]

    out = fuse_mixer_pallas(x1.reshape(B * Pc, D_in),
                            xf.reshape(B * P, D_in),
                            params, B, Pc, P)                 # (B, num_classes)
    return [out]


# -------------------------------------------------------- pure-JAX reference --
def _ref_layernorm(x, g, b):
    mu = jnp.mean(x, axis=-1, keepdims=True)
    var = jnp.mean((x - mu) ** 2, axis=-1, keepdims=True)
    return (x - mu) * jax.lax.rsqrt(var + EPS) * g + b


def _ref_mixer_block(x, w):
    xn = _ref_layernorm(x, w["ln1g"], w["ln1b"])
    h = _gelu(jnp.einsum("op,bpd->bod", w["tw1"], xn) + w["tb1"][None])
    x = x + jnp.einsum("po,bod->bpd", w["tw2"], h) + w["tb2"][None]
    xn2 = _ref_layernorm(x, w["ln2g"], w["ln2b"])
    h2 = _gelu(xn2 @ w["cw1"] + w["cb1"])
    return x + h2 @ w["cw2"] + w["cb2"]


def _ref_forward(x, params, clfpat_index):
    B, P = x.shape[0], x.shape[1]
    xf = x.reshape(B, P, -1).astype(jnp.float32)
    idx = np.asarray(clfpat_index)
    x1 = xf[:, idx, :]
    h1 = x1 @ params["clf_embed_w"] + params["clf_embed_b"]
    cb = params["clf_blocks"]
    for l in range(cb["tw1"].shape[0]):
        h1 = _ref_mixer_block(h1, {k: v[l] for k, v in cb.items()})
    clf_fea = _ref_layernorm(h1, params["clf_ln0g"], params["clf_ln0b"]).mean(axis=1)

    h2 = xf @ params["reg_embed_w"] + params["reg_embed_b"]
    rb = params["reg_blocks"]
    for l in range(rb["tw1"].shape[0]):
        h2 = _ref_mixer_block(h2, {k: v[l] for k, v in rb.items()})
    fb = params["fea_blocks"]
    nr = fb["tw1"].shape[1]
    feas = []
    for br in range(2):
        f = h2
        for l in range(nr):
            f = _ref_mixer_block(f, {k: v[br, l] for k, v in fb.items()})
        feas.append(_ref_layernorm(f, params["reg_lng"][br],
                                   params["reg_lnb"][br]).mean(axis=1))
    fused = jnp.concatenate([feas[0], feas[1], clf_fea], axis=-1)
    return [jax.nn.sigmoid(fused @ params["head_w"] + params["head_b"])]


# --------------------------------------------------------------------- main --
if __name__ == "__main__":
    # Module hyper-params (small, consistent with the forward):
    B, num_patches, channels = 2, 8, 4
    patch_size = (2, 2, 2)                      # D_in = channels * prod(patch_size) = 32
    dim, depth, num_classes, ef, num_regmixer = 32, 2, 1, 4, 1

    key = jax.random.PRNGKey(0)
    kx, kp = jax.random.split(key)
    x = jax.random.normal(kx, (B, num_patches, channels) + patch_size, dtype=jnp.float32)
    D_in = channels * int(np.prod(patch_size))
    params = init_fuse_mixer_params(kp, num_patches, D_in, dim, depth, num_classes,
                                    ef, num_regmixer)
    clfpat_index = np.arange(num_patches)       # module default: arange(num_patches)

    out = fuse_mixer_forward(x, params, clfpat_index)
    out = [jax.block_until_ready(o) for o in out]

    ref = _ref_forward(x, params, clfpat_index)
    # Tight tolerance (all-f32); small slack for one-pass LN stats + MXU sum order.
    np.testing.assert_allclose(np.asarray(out[0]), np.asarray(ref[0]),
                               rtol=1e-4, atol=1e-6)
    assert out[0].shape == (B, num_classes)
    print("KERNEL_OK")
</pallas_src>

<mosaic_0001>
module attributes {stable_mosaic.version = 11 : i64} {
  func.func @kernel(%arg0: i32, %arg1: memref<16x32xf32, #tpu.memory_space<vmem>>, %arg2: memref<16x32xf32, #tpu.memory_space<vmem>>, %arg3: memref<32x32xf32, #tpu.memory_space<vmem>>, %arg4: memref<1x32xf32, #tpu.memory_space<vmem>>, %arg5: memref<2x1x32xf32, #tpu.memory_space<vmem>>, %arg6: memref<2x1x32xf32, #tpu.memory_space<vmem>>, %arg7: memref<2x32x8xf32, #tpu.memory_space<vmem>>, %arg8: memref<2x32x1xf32, #tpu.memory_space<vmem>>, %arg9: memref<2x8x32xf32, #tpu.memory_space<vmem>>, %arg10: memref<2x8x1xf32, #tpu.memory_space<vmem>>, %arg11: memref<2x1x32xf32, #tpu.memory_space<vmem>>, %arg12: memref<2x1x32xf32, #tpu.memory_space<vmem>>, %arg13: memref<2x32x128xf32, #tpu.memory_space<vmem>>, %arg14: memref<2x1x128xf32, #tpu.memory_space<vmem>>, %arg15: memref<2x128x32xf32, #tpu.memory_space<vmem>>, %arg16: memref<2x1x32xf32, #tpu.memory_space<vmem>>, %arg17: memref<1x32xf32, #tpu.memory_space<vmem>>, %arg18: memref<1x32xf32, #tpu.memory_space<vmem>>, %arg19: memref<32x32xf32, #tpu.memory_space<vmem>>, %arg20: memref<1x32xf32, #tpu.memory_space<vmem>>, %arg21: memref<1x1x32xf32, #tpu.memory_space<vmem>>, %arg22: memref<1x1x32xf32, #tpu.memory_space<vmem>>, %arg23: memref<1x32x8xf32, #tpu.memory_space<vmem>>, %arg24: memref<1x32x1xf32, #tpu.memory_space<vmem>>, %arg25: memref<1x8x32xf32, #tpu.memory_space<vmem>>, %arg26: memref<1x8x1xf32, #tpu.memory_space<vmem>>, %arg27: memref<1x1x32xf32, #tpu.memory_space<vmem>>, %arg28: memref<1x1x32xf32, #tpu.memory_space<vmem>>, %arg29: memref<1x32x128xf32, #tpu.memory_space<vmem>>, %arg30: memref<1x1x128xf32, #tpu.memory_space<vmem>>, %arg31: memref<1x128x32xf32, #tpu.memory_space<vmem>>, %arg32: memref<1x1x32xf32, #tpu.memory_space<vmem>>, %arg33: memref<2x1x1x32xf32, #tpu.memory_space<vmem>>, %arg34: memref<2x1x1x32xf32, #tpu.memory_space<vmem>>, %arg35: memref<2x1x32x8xf32, #tpu.memory_space<vmem>>, %arg36: memref<2x1x32x1xf32, #tpu.memory_space<vmem>>, %arg37: memref<2x1x8x32xf32, #tpu.memory_space<vmem>>, %arg38: memref<2x1x8x1xf32, #tpu.memory_space<vmem>>, %arg39: memref<2x1x1x32xf32, #tpu.memory_space<vmem>>, %arg40: memref<2x1x1x32xf32, #tpu.memory_space<vmem>>, %arg41: memref<2x1x32x128xf32, #tpu.memory_space<vmem>>, %arg42: memref<2x1x1x128xf32, #tpu.memory_space<vmem>>, %arg43: memref<2x1x128x32xf32, #tpu.memory_space<vmem>>, %arg44: memref<2x1x1x32xf32, #tpu.memory_space<vmem>>, %arg45: memref<2x1x32xf32, #tpu.memory_space<vmem>>, %arg46: memref<2x1x32xf32, #tpu.memory_space<vmem>>, %arg47: memref<96x1xf32, #tpu.memory_space<vmem>>, %arg48: memref<1x1xf32, #tpu.memory_space<vmem>>, %arg49: memref<2x1xf32, #tpu.memory_space<vmem>>) attributes {dimension_semantics = [#tpu.dimension_semantics<arbitrary>], iteration_bounds = array<i64: 1>, scalar_prefetch = 0 : i64, scratch_operands = 0 : i64, tpu.core_type = #tpu.core_type<tc>, window_params = [{pipeline_mode = #tpu.pipeline_mode<synchronous>, transform_indices = @transform_0, window_bounds = array<i64: 16, 32>}, {pipeline_mode = #tpu.pipeline_mode<synchronous>, transform_indices = @transform_1, window_bounds = array<i64: 16, 32>}, {pipeline_mode = #tpu.pipeline_mode<synchronous>, transform_indices = @transform_2, window_bounds = array<i64: 32, 32>}, {pipeline_mode = #tpu.pipeline_mode<synchronous>, transform_indices = @transform_3, window_bounds = array<i64: 1, 32>}, {pipeline_mode = #tpu.pipeline_mode<synchronous>, transform_indices = @transform_4, window_bounds = array<i64: 2, 1, 32>}, {pipeline_mode = #tpu.pipeline_mode<synchronous>, transform_indices = @transform_5, window_bounds = array<i64: 2, 1, 32>}, {pipeline_mode = #tpu.pipeline_mode<synchronous>, transform_indices = @transform_6, window_bounds = array<i64: 2, 32, 8>}, {pipeline_mode = #tpu.pipeline_mode<synchronous>, transform_indices = @transform_7, window_bounds = array<i64: 2, 32, 1>}, {pipeline_mode = #tpu.pipeline_mode<synchronous>, transform_indices = @transform_8, window_bounds = array<i64: 2, 8, 32>}, {pipeline_mode = #tpu.pipeline_mode<synchronous>, transform_indices = @transform_9, window_bounds = array<i64: 2, 8, 1>}, {pipeline_mode = #tpu.pipeline_mode<synchronous>, transform_indices = @transform_10, window_bounds = array<i64: 2, 1, 32>}, {pipeline_mode = #tpu.pipeline_mode<synchronous>, transform_indices = @transform_11, window_bounds = array<i64: 2, 1, 32>}, {pipeline_mode = #tpu.pipeline_mode<synchronous>, transform_indices = @transform_12, window_bounds = array<i64: 2, 32, 128>}, {pipeline_mode = #tpu.pipeline_mode<synchronous>, transform_indices = @transform_13, window_bounds = array<i64: 2, 1, 128>}, {pipeline_mode = #tpu.pipeline_mode<synchronous>, transform_indices = @transform_14, window_bounds = array<i64: 2, 128, 32>}, {pipeline_mode = #tpu.pipeline_mode<synchronous>, transform_indices = @transform_15, window_bounds = array<i64: 2, 1, 32>}, {pipeline_mode = #tpu.pipeline_mode<synchronous>, transform_indices = @transform_16, window_bounds = array<i64: 1, 32>}, {pipeline_mode = #tpu.pipeline_mode<synchronous>, transform_indices = @transform_17, window_bounds = array<i64: 1, 32>}, {pipeline_mode = #tpu.pipeline_mode<synchronous>, transform_indices = @transform_18, window_bounds = array<i64: 32, 32>}, {pipeline_mode = #tpu.pipeline_mode<synchronous>, transform_indices = @transform_19, window_bounds = array<i64: 1, 32>}, {pipeline_mode = #tpu.pipeline_mode<synchronous>, transform_indices = @transform_20, window_bounds = array<i64: 1, 1, 32>}, {pipeline_mode = #tpu.pipeline_mode<synchronous>, transform_indices = @transform_21, window_bounds = array<i64: 1, 1, 32>}, {pipeline_mode = #tpu.pipeline_mode<synchronous>, transform_indices = @transform_22, window_bounds = array<i64: 1, 32, 8>}, {pipeline_mode = #tpu.pipeline_mode<synchronous>, transform_indices = @transform_23, window_bounds = array<i64: 1, 32, 1>}, {pipeline_mode = #tpu.pipeline_mode<synchronous>, transform_indices = @transform_24, window_bounds = array<i64: 1, 8, 32>}, {pipeline_mode = #tpu.pipeline_mode<synchronous>, transform_indices = @transform_25, window_bounds = array<i64: 1, 8, 1>}, {pipeline_mode = #tpu.pipeline_mode<synchronous>, transform_indices = @transform_26, window_bounds = array<i64: 1, 1, 32>}, {pipeline_mode = #tpu.pipeline_mode<synchronous>, transform_indices = @transform_27, window_bounds = array<i64: 1, 1, 32>}, {pipeline_mode = #tpu.pipeline_mode<synchronous>, transform_indices = @transform_28, window_bounds = array<i64: 1, 32, 128>}, {pipeline_mode = #tpu.pipeline_mode<synchronous>, transform_indices = @transform_29, window_bounds = array<i64: 1, 1, 128>}, {pipeline_mode = #tpu.pipeline_mode<synchronous>, transform_indices = @transform_30, window_bounds = array<i64: 1, 128, 32>}, {pipeline_mode = #tpu.pipeline_mode<synchronous>, transform_indices = @transform_31, window_bounds = array<i64: 1, 1, 32>}, {pipeline_mode = #tpu.pipeline_mode<synchronous>, transform_indices = @transform_32, window_bounds = array<i64: 2, 1, 1, 32>}, {pipeline_mode = #tpu.pipeline_mode<synchronous>, transform_indices = @transform_33, window_bounds = array<i64: 2, 1, 1, 32>}, {pipeline_mode = #tpu.pipeline_mode<synchronous>, transform_indices = @transform_34, window_bounds = array<i64: 2, 1, 32, 8>}, {pipeline_mode = #tpu.pipeline_mode<synchronous>, transform_indices = @transform_35, window_bounds = array<i64: 2, 1, 32, 1>}, {pipeline_mode = #tpu.pipeline_mode<synchronous>, transform_indices = @transform_36, window_bounds = array<i64: 2, 1, 8, 32>}, {pipeline_mode = #tpu.pipeline_mode<synchronous>, transform_indices = @transform_37, window_bounds = array<i64: 2, 1, 8, 1>}, {pipeline_mode = #tpu.pipeline_mode<synchronous>, transform_indices = @transform_38, window_bounds = array<i64: 2, 1, 1, 32>}, {pipeline_mode = #tpu.pipeline_mode<synchronous>, transform_indices = @transform_39, window_bounds = array<i64: 2, 1, 1, 32>}, {pipeline_mode = #tpu.pipeline_mode<synchronous>, transform_indices = @transform_40, window_bounds = array<i64: 2, 1, 32, 128>}, {pipeline_mode = #tpu.pipeline_mode<synchronous>, transform_indices = @transform_41, window_bounds = array<i64: 2, 1, 1, 128>}, {pipeline_mode = #tpu.pipeline_mode<synchronous>, transform_indices = @transform_42, window_bounds = array<i64: 2, 1, 128, 32>}, {pipeline_mode = #tpu.pipeline_mode<synchronous>, transform_indices = @transform_43, window_bounds = array<i64: 2, 1, 1, 32>}, {pipeline_mode = #tpu.pipeline_mode<synchronous>, transform_indices = @transform_44, window_bounds = array<i64: 2, 1, 32>}, {pipeline_mode = #tpu.pipeline_mode<synchronous>, transform_indices = @transform_45, window_bounds = array<i64: 2, 1, 32>}, {pipeline_mode = #tpu.pipeline_mode<synchronous>, transform_indices = @transform_46, window_bounds = array<i64: 96, 1>}, {pipeline_mode = #tpu.pipeline_mode<synchronous>, transform_indices = @transform_47, window_bounds = array<i64: 1, 1>}, {pipeline_mode = #tpu.pipeline_mode<synchronous>, transform_indices = @transform_48, window_bounds = array<i64: 2, 1>}]} {
    %c0 = arith.constant 0 : index
    %c0_0 = arith.constant 0 : index
    %0 = vector.load %arg1[%c0, %c0_0] : memref<16x32xf32, #tpu.memory_space<vmem>>, vector<16x32xf32>
    %c0_1 = arith.constant 0 : index
    %c0_2 = arith.constant 0 : index
    %1 = vector.load %arg3[%c0_1, %c0_2] : memref<32x32xf32, #tpu.memory_space<vmem>>, vector<32x32xf32>
    %cst = arith.constant dense<0.000000e+00> : vector<16x32xf32>
    %2 = tpu.matmul %0, %1, %cst {dimension_numbers = #tpu.dot_dimension_numbers<[1], [0], [0], [1], [0, 0, 1, 1], [], []>} : vector<16x32xf32>, vector<32x32xf32>, vector<16x32xf32> -> vector<16x32xf32>
    %c0_3 = arith.constant 0 : index
    %c0_4 = arith.constant 0 : index
    %3 = vector.load %arg4[%c0_3, %c0_4] : memref<1x32xf32, #tpu.memory_space<vmem>>, vector<1x32xf32>
    %4 = vector.broadcast %3 : vector<1x32xf32> to vector<16x32xf32>
    %5 = arith.addf %2, %4 : vector<16x32xf32>
    %c0_5 = arith.constant 0 : index
    %c0_6 = arith.constant 0 : index
    %c0_7 = arith.constant 0 : index
    %6 = vector.load %arg5[%c0_5, %c0_6, %c0_7] : memref<2x1x32xf32, #tpu.memory_space<vmem>>, vector<1x1x32xf32>
    %7 = vector.shape_cast %6 : vector<1x1x32xf32> to vector<1x32xf32>
    %c0_8 = arith.constant 0 : index
    %c0_9 = arith.constant 0 : index
    %c0_10 = arith.constant 0 : index
    %8 = vector.load %arg6[%c0_8, %c0_9, %c0_10] : memref<2x1x32xf32, #tpu.memory_space<vmem>>, vector<1x1x32xf32>
    %9 = vector.shape_cast %8 : vector<1x1x32xf32> to vector<1x32xf32>
    %c0_11 = arith.constant 0 : index
    %c0_12 = arith.constant 0 : index
    %c0_13 = arith.constant 0 : index
    %10 = vector.load %arg7[%c0_11, %c0_12, %c0_13] : memref<2x32x8xf32, #tpu.memory_space<vmem>>, vector<1x32x8xf32>
    %11 = vector.shape_cast %10 : vector<1x32x8xf32> to vector<32x8xf32>
    %c0_14 = arith.constant 0 : index
    %c0_15 = arith.constant 0 : index
    %c0_16 = arith.constant 0 : index
    %12 = vector.load %arg8[%c0_14, %c0_15, %c0_16] : memref<2x32x1xf32, #tpu.memory_space<vmem>>, vector<1x32x1xf32>
    %13 = vector.shape_cast %12 : vector<1x32x1xf32> to vector<32x1xf32>
    %c0_17 = arith.constant 0 : index
    %c0_18 = arith.constant 0 : index
    %c0_19 = arith.constant 0 : index
    %14 = vector.load %arg9[%c0_17, %c0_18, %c0_19] : memref<2x8x32xf32, #tpu.memory_space<vmem>>, vector<1x8x32xf32>
    %15 = vector.shape_cast %14 : vector<1x8x32xf32> to vector<8x32xf32>
    %c0_20 = arith.constant 0 : index
    %c0_21 = arith.constant 0 : index
    %c0_22 = arith.constant 0 : index
    %16 = vector.load %arg10[%c0_20, %c0_21, %c0_22] : memref<2x8x1xf32, #tpu.memory_space<vmem>>, vector<1x8x1xf32>
    %17 = vector.shape_cast %16 : vector<1x8x1xf32> to vector<8x1xf32>
    %c0_23 = arith.constant 0 : index
    %c0_24 = arith.constant 0 : index
    %c0_25 = arith.constant 0 : index
    %18 = vector.load %arg11[%c0_23, %c0_24, %c0_25] : memref<2x1x32xf32, #tpu.memory_space<vmem>>, vector<1x1x32xf32>
    %19 = vector.shape_cast %18 : vector<1x1x32xf32> to vector<1x32xf32>
    %c0_26 = arith.constant 0 : index
    %c0_27 = arith.constant 0 : index
    %c0_28 = arith.constant 0 : index
    %20 = vector.load %arg12[%c0_26, %c0_27, %c0_28] : memref<2x1x32xf32, #tpu.memory_space<vmem>>, vector<1x1x32xf32>
    %21 = vector.shape_cast %20 : vector<1x1x32xf32> to vector<1x32xf32>
    %c0_29 = arith.constant 0 : index
    %c0_30 = arith.constant 0 : index
    %c0_31 = arith.constant 0 : index
    %22 = vector.load %arg13[%c0_29, %c0_30, %c0_31] : memref<2x32x128xf32, #tpu.memory_space<vmem>>, vector<1x32x128xf32>
    %23 = vector.shape_cast %22 : vector<1x32x128xf32> to vector<32x128xf32>
    %c0_32 = arith.constant 0 : index
    %c0_33 = arith.constant 0 : index
    %c0_34 = arith.constant 0 : index
    %24 = vector.load %arg14[%c0_32, %c0_33, %c0_34] : memref<2x1x128xf32, #tpu.memory_space<vmem>>, vector<1x1x128xf32>
    %25 = vector.shape_cast %24 : vector<1x1x128xf32> to vector<1x128xf32>
    %c0_35 = arith.constant 0 : index
    %c0_36 = arith.constant 0 : index
    %c0_37 = arith.constant 0 : index
    %26 = vector.load %arg15[%c0_35, %c0_36, %c0_37] : memref<2x128x32xf32, #tpu.memory_space<vmem>>, vector<1x128x32xf32>
    %27 = vector.shape_cast %26 : vector<1x128x32xf32> to vector<128x32xf32>
    %c0_38 = arith.constant 0 : index
    %c0_39 = arith.constant 0 : index
    %c0_40 = arith.constant 0 : index
    %28 = vector.load %arg16[%c0_38, %c0_39, %c0_40] : memref<2x1x32xf32, #tpu.memory_space<vmem>>, vector<1x1x32xf32>
    %29 = vector.shape_cast %28 : vector<1x1x32xf32> to vector<1x32xf32>
    %cst_41 = arith.constant dense<0.000000e+00> : vector<16xf32>
    %30 = vector.multi_reduction <add>, %5, %cst_41 [1] : vector<16x32xf32> to vector<16xf32>
    %31 = vector.shape_cast %30 : vector<16xf32> to vector<16x1xf32>
    %cst_42 = arith.constant 3.200000e+01 : f32
    %32 = vector.broadcast %cst_42 : f32 to vector<16x1xf32>
    %33 = arith.divf %31, %32 : vector<16x1xf32>
    %34 = arith.mulf %5, %5 : vector<16x32xf32>
    %cst_43 = arith.constant dense<0.000000e+00> : vector<16xf32>
    %35 = vector.multi_reduction <add>, %34, %cst_43 [1] : vector<16x32xf32> to vector<16xf32>
    %36 = vector.shape_cast %35 : vector<16xf32> to vector<16x1xf32>
    %cst_44 = arith.constant 3.200000e+01 : f32
    %37 = vector.broadcast %cst_44 : f32 to vector<16x1xf32>
    %38 = arith.divf %36, %37 : vector<16x1xf32>
    %39 = arith.mulf %33, %33 : vector<16x1xf32>
    %40 = arith.subf %38, %39 : vector<16x1xf32>
    %41 = vector.broadcast %33 : vector<16x1xf32> to vector<16x32xf32>
    %42 = arith.subf %5, %41 : vector<16x32xf32>
    %cst_45 = arith.constant 9.99999974E-6 : f32
    %43 = vector.broadcast %cst_45 : f32 to vector<16x1xf32>
    %44 = arith.addf %40, %43 : vector<16x1xf32>
    %45 = math.rsqrt %44 : vector<16x1xf32>
    %46 = vector.broadcast %45 : vector<16x1xf32> to vector<16x32xf32>
    %47 = arith.mulf %42, %46 : vector<16x32xf32>
    %48 = vector.broadcast %7 : vector<1x32xf32> to vector<16x32xf32>
    %49 = arith.mulf %47, %48 : vector<16x32xf32>
    %50 = vector.broadcast %9 : vector<1x32xf32> to vector<16x32xf32>
    %51 = arith.addf %49, %50 : vector<16x32xf32>
    %52 = vector.extract_strided_slice %51 {offsets = [0, 0], sizes = [8, 32], strides = [1, 1]} : vector<16x32xf32> to vector<8x32xf32>
    %53 = vector.extract_strided_slice %51 {offsets = [8, 0], sizes = [8, 32], strides = [1, 1]} : vector<16x32xf32> to vector<8x32xf32>
    %54 = tpu.concatenate %52, %53 in 1 : vector<8x32xf32>, vector<8x32xf32> -> vector<8x64xf32>
    %cst_46 = arith.constant dense<0.000000e+00> : vector<32x64xf32>
    %55 = tpu.matmul %11, %54, %cst_46 {dimension_numbers = #tpu.dot_dimension_numbers<[1], [0], [0], [1], [0, 0, 1, 1], [], []>} : vector<32x8xf32>, vector<8x64xf32>, vector<32x64xf32> -> vector<32x64xf32>
    %56 = vector.broadcast %13 : vector<32x1xf32> to vector<32x64xf32>
    %57 = arith.addf %55, %56 : vector<32x64xf32>
    %cst_47 = arith.constant 5.000000e-01 : f32
    %58 = vector.broadcast %cst_47 : f32 to vector<32x64xf32>
    %59 = arith.mulf %58, %57 : vector<32x64xf32>
    %cst_48 = arith.constant 4.471500e-02 : f32
    %60 = vector.broadcast %cst_48 : f32 to vector<32x64xf32>
    %61 = arith.mulf %60, %57 : vector<32x64xf32>
    %62 = arith.mulf %61, %57 : vector<32x64xf32>
    %63 = arith.mulf %62, %57 : vector<32x64xf32>
    %64 = arith.addf %57, %63 : vector<32x64xf32>
    %cst_49 = arith.constant 0.797884583 : f32
    %65 = vector.broadcast %cst_49 : f32 to vector<32x64xf32>
    %66 = arith.mulf %65, %64 : vector<32x64xf32>
    %67 = math.tanh %66 : vector<32x64xf32>
    %cst_50 = arith.constant 1.000000e+00 : f32
    %68 = vector.broadcast %cst_50 : f32 to vector<32x64xf32>
    %69 = arith.addf %68, %67 : vector<32x64xf32>
    %70 = arith.mulf %59, %69 : vector<32x64xf32>
    %cst_51 = arith.constant dense<0.000000e+00> : vector<8x64xf32>
    %71 = tpu.matmul %15, %70, %cst_51 {dimension_numbers = #tpu.dot_dimension_numbers<[1], [0], [0], [1], [0, 0, 1, 1], [], []>} : vector<8x32xf32>, vector<32x64xf32>, vector<8x64xf32> -> vector<8x64xf32>
    %72 = vector.broadcast %17 : vector<8x1xf32> to vector<8x64xf32>
    %73 = arith.addf %71, %72 : vector<8x64xf32>
    %74 = vector.extract_strided_slice %73 {offsets = [0, 0], sizes = [8, 32], strides = [1, 1]} : vector<8x64xf32> to vector<8x32xf32>
    %75 = vector.extract_strided_slice %73 {offsets = [0, 32], sizes = [8, 32], strides = [1, 1]} : vector<8x64xf32> to vector<8x32xf32>
    %76 = tpu.concatenate %74, %75 in 0 : vector<8x32xf32>, vector<8x32xf32> -> vector<16x32xf32>
    %77 = arith.addf %5, %76 : vector<16x32xf32>
    %cst_52 = arith.constant dense<0.000000e+00> : vector<16xf32>
    %78 = vector.multi_reduction <add>, %77, %cst_52 [1] : vector<16x32xf32> to vector<16xf32>
    %79 = vector.shape_cast %78 : vector<16xf32> to vector<16x1xf32>
    %cst_53 = arith.constant 3.200000e+01 : f32
    %80 = vector.broadcast %cst_53 : f32 to vector<16x1xf32>
    %81 = arith.divf %79, %80 : vector<16x1xf32>
    %82 = arith.mulf %77, %77 : vector<16x32xf32>
    %cst_54 = arith.constant dense<0.000000e+00> : vector<16xf32>
    %83 = vector.multi_reduction <add>, %82, %cst_54 [1] : vector<16x32xf32> to vector<16xf32>
    %84 = vector.shape_cast %83 : vector<16xf32> to vector<16x1xf32>
    %cst_55 = arith.constant 3.200000e+01 : f32
    %85 = vector.broadcast %cst_55 : f32 to vector<16x1xf32>
    %86 = arith.divf %84, %85 : vector<16x1xf32>
    %87 = arith.mulf %81, %81 : vector<16x1xf32>
    %88 = arith.subf %86, %87 : vector<16x1xf32>
    %89 = vector.broadcast %81 : vector<16x1xf32> to vector<16x32xf32>
    %90 = arith.subf %77, %89 : vector<16x32xf32>
    %cst_56 = arith.constant 9.99999974E-6 : f32
    %91 = vector.broadcast %cst_56 : f32 to vector<16x1xf32>
    %92 = arith.addf %88, %91 : vector<16x1xf32>
    %93 = math.rsqrt %92 : vector<16x1xf32>
    %94 = vector.broadcast %93 : vector<16x1xf32> to vector<16x32xf32>
    %95 = arith.mulf %90, %94 : vector<16x32xf32>
    %96 = vector.broadcast %19 : vector<1x32xf32> to vector<16x32xf32>
    %97 = arith.mulf %95, %96 : vector<16x32xf32>
    %98 = vector.broadcast %21 : vector<1x32xf32> to vector<16x32xf32>
    %99 = arith.addf %97, %98 : vector<16x32xf32>
    %cst_57 = arith.constant dense<0.000000e+00> : vector<16x128xf32>
    %100 = tpu.matmul %99, %23, %cst_57 {dimension_numbers = #tpu.dot_dimension_numbers<[1], [0], [0], [1], [0, 0, 1, 1], [], []>} : vector<16x32xf32>, vector<32x128xf32>, vector<16x128xf32> -> vector<16x128xf32>
    %101 = vector.broadcast %25 : vector<1x128xf32> to vector<16x128xf32>
    %102 = arith.addf %100, %101 : vector<16x128xf32>
    %cst_58 = arith.constant 5.000000e-01 : f32
    %103 = vector.broadcast %cst_58 : f32 to vector<16x128xf32>
    %104 = arith.mulf %103, %102 : vector<16x128xf32>
    %cst_59 = arith.constant 4.471500e-02 : f32
    %105 = vector.broadcast %cst_59 : f32 to vector<16x128xf32>
    %106 = arith.mulf %105, %102 : vector<16x128xf32>
    %107 = arith.mulf %106, %102 : vector<16x128xf32>
    %108 = arith.mulf %107, %102 : vector<16x128xf32>
    %109 = arith.addf %102, %108 : vector<16x128xf32>
    %cst_60 = arith.constant 0.797884583 : f32
    %110 = vector.broadcast %cst_60 : f32 to vector<16x128xf32>
    %111 = arith.mulf %110, %109 : vector<16x128xf32>
    %112 = math.tanh %111 : vector<16x128xf32>
    %cst_61 = arith.constant 1.000000e+00 : f32
    %113 = vector.broadcast %cst_61 : f32 to vector<16x128xf32>
    %114 = arith.addf %113, %112 : vector<16x128xf32>
    %115 = arith.mulf %104, %114 : vector<16x128xf32>
    %cst_62 = arith.constant dense<0.000000e+00> : vector<16x32xf32>
    %116 = tpu.matmul %115, %27, %cst_62 {dimension_numbers = #tpu.dot_dimension_numbers<[1], [0], [0], [1], [0, 0, 1, 1], [], []>} : vector<16x128xf32>, vector<128x32xf32>, vector<16x32xf32> -> vector<16x32xf32>
    %117 = arith.addf %77, %116 : vector<16x32xf32>
    %118 = vector.broadcast %29 : vector<1x32xf32> to vector<16x32xf32>
    %119 = arith.addf %117, %118 : vector<16x32xf32>
    %c1 = arith.constant 1 : index
    %c0_63 = arith.constant 0 : index
    %c0_64 = arith.constant 0 : index
    %120 = vector.load %arg5[%c1, %c0_63, %c0_64] : memref<2x1x32xf32, #tpu.memory_space<vmem>>, vector<1x1x32xf32>
    %121 = vector.shape_cast %120 : vector<1x1x32xf32> to vector<1x32xf32>
    %c1_65 = arith.constant 1 : index
    %c0_66 = arith.constant 0 : index
    %c0_67 = arith.constant 0 : index
    %122 = vector.load %arg6[%c1_65, %c0_66, %c0_67] : memref<2x1x32xf32, #tpu.memory_space<vmem>>, vector<1x1x32xf32>
    %123 = vector.shape_cast %122 : vector<1x1x32xf32> to vector<1x32xf32>
    %c1_68 = arith.constant 1 : index
    %c0_69 = arith.constant 0 : index
    %c0_70 = arith.constant 0 : index
    %124 = vector.load %arg7[%c1_68, %c0_69, %c0_70] : memref<2x32x8xf32, #tpu.memory_space<vmem>>, vector<1x32x8xf32>
    %125 = vector.shape_cast %124 : vector<1x32x8xf32> to vector<32x8xf32>
    %c1_71 = arith.constant 1 : index
    %c0_72 = arith.constant 0 : index
    %c0_73 = arith.constant 0 : index
    %126 = vector.load %arg8[%c1_71, %c0_72, %c0_73] : memref<2x32x1xf32, #tpu.memory_space<vmem>>, vector<1x32x1xf32>
    %127 = vector.shape_cast %126 : vector<1x32x1xf32> to vector<32x1xf32>
    %c1_74 = arith.constant 1 : index
    %c0_75 = arith.constant 0 : index
    %c0_76 = arith.constant 0 : index
    %128 = vector.load %arg9[%c1_74, %c0_75, %c0_76] : memref<2x8x32xf32, #tpu.memory_space<vmem>>, vector<1x8x32xf32>
    %129 = vector.shape_cast %128 : vector<1x8x32xf32> to vector<8x32xf32>
    %c1_77 = arith.constant 1 : index
    %c0_78 = arith.constant 0 : index
    %c0_79 = arith.constant 0 : index
    %130 = vector.load %arg10[%c1_77, %c0_78, %c0_79] : memref<2x8x1xf32, #tpu.memory_space<vmem>>, vector<1x8x1xf32>
    %131 = vector.shape_cast %130 : vector<1x8x1xf32> to vector<8x1xf32>
    %c1_80 = arith.constant 1 : index
    %c0_81 = arith.constant 0 : index
    %c0_82 = arith.constant 0 : index
    %132 = vector.load %arg11[%c1_80, %c0_81, %c0_82] : memref<2x1x32xf32, #tpu.memory_space<vmem>>, vector<1x1x32xf32>
    %133 = vector.shape_cast %132 : vector<1x1x32xf32> to vector<1x32xf32>
    %c1_83 = arith.constant 1 : index
    %c0_84 = arith.constant 0 : index
    %c0_85 = arith.constant 0 : index
    %134 = vector.load %arg12[%c1_83, %c0_84, %c0_85] : memref<2x1x32xf32, #tpu.memory_space<vmem>>, vector<1x1x32xf32>
    %135 = vector.shape_cast %134 : vector<1x1x32xf32> to vector<1x32xf32>
    %c1_86 = arith.constant 1 : index
    %c0_87 = arith.constant 0 : index
    %c0_88 = arith.constant 0 : index
    %136 = vector.load %arg13[%c1_86, %c0_87, %c0_88] : memref<2x32x128xf32, #tpu.memory_space<vmem>>, vector<1x32x128xf32>
    %137 = vector.shape_cast %136 : vector<1x32x128xf32> to vector<32x128xf32>
    %c1_89 = arith.constant 1 : index
    %c0_90 = arith.constant 0 : index
    %c0_91 = arith.constant 0 : index
    %138 = vector.load %arg14[%c1_89, %c0_90, %c0_91] : memref<2x1x128xf32, #tpu.memory_space<vmem>>, vector<1x1x128xf32>
    %139 = vector.shape_cast %138 : vector<1x1x128xf32> to vector<1x128xf32>
    %c1_92 = arith.constant 1 : index
    %c0_93 = arith.constant 0 : index
    %c0_94 = arith.constant 0 : index
    %140 = vector.load %arg15[%c1_92, %c0_93, %c0_94] : memref<2x128x32xf32, #tpu.memory_space<vmem>>, vector<1x128x32xf32>
    %141 = vector.shape_cast %140 : vector<1x128x32xf32> to vector<128x32xf32>
    %c1_95 = arith.constant 1 : index
    %c0_96 = arith.constant 0 : index
    %c0_97 = arith.constant 0 : index
    %142 = vector.load %arg16[%c1_95, %c0_96, %c0_97] : memref<2x1x32xf32, #tpu.memory_space<vmem>>, vector<1x1x32xf32>
    %143 = vector.shape_cast %142 : vector<1x1x32xf32> to vector<1x32xf32>
    %cst_98 = arith.constant dense<0.000000e+00> : vector<16xf32>
    %144 = vector.multi_reduction <add>, %119, %cst_98 [1] : vector<16x32xf32> to vector<16xf32>
    %145 = vector.shape_cast %144 : vector<16xf32> to vector<16x1xf32>
    %cst_99 = arith.constant 3.200000e+01 : f32
    %146 = vector.broadcast %cst_99 : f32 to vector<16x1xf32>
    %147 = arith.divf %145, %146 : vector<16x1xf32>
    %148 = arith.mulf %119, %119 : vector<16x32xf32>
    %cst_100 = arith.constant dense<0.000000e+00> : vector<16xf32>
    %149 = vector.multi_reduction <add>, %148, %cst_100 [1] : vector<16x32xf32> to vector<16xf32>
    %150 = vector.shape_cast %149 : vector<16xf32> to vector<16x1xf32>
    %cst_101 = arith.constant 3.200000e+01 : f32
    %151 = vector.broadcast %cst_101 : f32 to vector<16x1xf32>
    %152 = arith.divf %150, %151 : vector<16x1xf32>
    %153 = arith.mulf %147, %147 : vector<16x1xf32>
    %154 = arith.subf %152, %153 : vector<16x1xf32>
    %155 = vector.broadcast %147 : vector<16x1xf32> to vector<16x32xf32>
    %156 = arith.subf %119, %155 : vector<16x32xf32>
    %cst_102 = arith.constant 9.99999974E-6 : f32
    %157 = vector.broadcast %cst_102 : f32 to vector<16x1xf32>
    %158 = arith.addf %154, %157 : vector<16x1xf32>
    %159 = math.rsqrt %158 : vector<16x1xf32>
    %160 = vector.broadcast %159 : vector<16x1xf32> to vector<16x32xf32>
    %161 = arith.mulf %156, %160 : vector<16x32xf32>
    %162 = vector.broadcast %121 : vector<1x32xf32> to vector<16x32xf32>
    %163 = arith.mulf %161, %162 : vector<16x32xf32>
    %164 = vector.broadcast %123 : vector<1x32xf32> to vector<16x32xf32>
    %165 = arith.addf %163, %164 : vector<16x32xf32>
    %166 = vector.extract_strided_slice %165 {offsets = [0, 0], sizes = [8, 32], strides = [1, 1]} : vector<16x32xf32> to vector<8x32xf32>
    %167 = vector.extract_strided_slice %165 {offsets = [8, 0], sizes = [8, 32], strides = [1, 1]} : vector<16x32xf32> to vector<8x32xf32>
    %168 = tpu.concatenate %166, %167 in 1 : vector<8x32xf32>, vector<8x32xf32> -> vector<8x64xf32>
    %cst_103 = arith.constant dense<0.000000e+00> : vector<32x64xf32>
    %169 = tpu.matmul %125, %168, %cst_103 {dimension_numbers = #tpu.dot_dimension_numbers<[1], [0], [0], [1], [0, 0, 1, 1], [], []>} : vector<32x8xf32>, vector<8x64xf32>, vector<32x64xf32> -> vector<32x64xf32>
    %170 = vector.broadcast %127 : vector<32x1xf32> to vector<32x64xf32>
    %171 = arith.addf %169, %170 : vector<32x64xf32>
    %cst_104 = arith.constant 5.000000e-01 : f32
    %172 = vector.broadcast %cst_104 : f32 to vector<32x64xf32>
    %173 = arith.mulf %172, %171 : vector<32x64xf32>
    %cst_105 = arith.constant 4.471500e-02 : f32
    %174 = vector.broadcast %cst_105 : f32 to vector<32x64xf32>
    %175 = arith.mulf %174, %171 : vector<32x64xf32>
    %176 = arith.mulf %175, %171 : vector<32x64xf32>
    %177 = arith.mulf %176, %171 : vector<32x64xf32>
    %178 = arith.addf %171, %177 : vector<32x64xf32>
    %cst_106 = arith.constant 0.797884583 : f32
    %179 = vector.broadcast %cst_106 : f32 to vector<32x64xf32>
    %180 = arith.mulf %179, %178 : vector<32x64xf32>
    %181 = math.tanh %180 : vector<32x64xf32>
    %cst_107 = arith.constant 1.000000e+00 : f32
    %182 = vector.broadcast %cst_107 : f32 to vector<32x64xf32>
    %183 = arith.addf %182, %181 : vector<32x64xf32>
    %184 = arith.mulf %173, %183 : vector<32x64xf32>
    %cst_108 = arith.constant dense<0.000000e+00> : vector<8x64xf32>
    %185 = tpu.matmul %129, %184, %cst_108 {dimension_numbers = #tpu.dot_dimension_numbers<[1], [0], [0], [1], [0, 0, 1, 1], [], []>} : vector<8x32xf32>, vector<32x64xf32>, vector<8x64xf32> -> vector<8x64xf32>
    %186 = vector.broadcast %131 : vector<8x1xf32> to vector<8x64xf32>
    %187 = arith.addf %185, %186 : vector<8x64xf32>
    %188 = vector.extract_strided_slice %187 {offsets = [0, 0], sizes = [8, 32], strides = [1, 1]} : vector<8x64xf32> to vector<8x32xf32>
    %189 = vector.extract_strided_slice %187 {offsets = [0, 32], sizes = [8, 32], strides = [1, 1]} : vector<8x64xf32> to vector<8x32xf32>
    %190 = tpu.concatenate %188, %189 in 0 : vector<8x32xf32>, vector<8x32xf32> -> vector<16x32xf32>
    %191 = arith.addf %119, %190 : vector<16x32xf32>
    %cst_109 = arith.constant dense<0.000000e+00> : vector<16xf32>
    %192 = vector.multi_reduction <add>, %191, %cst_109 [1] : vector<16x32xf32> to vector<16xf32>
    %193 = vector.shape_cast %192 : vector<16xf32> to vector<16x1xf32>
    %cst_110 = arith.constant 3.200000e+01 : f32
    %194 = vector.broadcast %cst_110 : f32 to vector<16x1xf32>
    %195 = arith.divf %193, %194 : vector<16x1xf32>
    %196 = arith.mulf %191, %191 : vector<16x32xf32>
    %cst_111 = arith.constant dense<0.000000e+00> : vector<16xf32>
    %197 = vector.multi_reduction <add>, %196, %cst_111 [1] : vector<16x32xf32> to vector<16xf32>
    %198 = vector.shape_cast %197 : vector<16xf32> to vector<16x1xf32>
    %cst_112 = arith.constant 3.200000e+01 : f32
    %199 = vector.broadcast %cst_112 : f32 to vector<16x1xf32>
    %200 = arith.divf %198, %199 : vector<16x1xf32>
    %201 = arith.mulf %195, %195 : vector<16x1xf32>
    %202 = arith.subf %200, %201 : vector<16x1xf32>
    %203 = vector.broadcast %195 : vector<16x1xf32> to vector<16x32xf32>
    %204 = arith.subf %191, %203 : vector<16x32xf32>
    %cst_113 = arith.constant 9.99999974E-6 : f32
    %205 = vector.broadcast %cst_113 : f32 to vector<16x1xf32>
    %206 = arith.addf %202, %205 : vector<16x1xf32>
    %207 = math.rsqrt %206 : vector<16x1xf32>
    %208 = vector.broadcast %207 : vector<16x1xf32> to vector<16x32xf32>
    %209 = arith.mulf %204, %208 : vector<16x32xf32>
    %210 = vector.broadcast %133 : vector<1x32xf32> to vector<16x32xf32>
    %211 = arith.mulf %209, %210 : vector<16x32xf32>
    %212 = vector.broadcast %135 : vector<1x32xf32> to vector<16x32xf32>
    %213 = arith.addf %211, %212 : vector<16x32xf32>
    %cst_114 = arith.constant dense<0.000000e+00> : vector<16x128xf32>
    %214 = tpu.matmul %213, %137, %cst_114 {dimension_numbers = #tpu.dot_dimension_numbers<[1], [0], [0], [1], [0, 0, 1, 1], [], []>} : vector<16x32xf32>, vector<32x128xf32>, vector<16x128xf32> -> vector<16x128xf32>
    %215 = vector.broadcast %139 : vector<1x128xf32> to vector<16x128xf32>
    %216 = arith.addf %214, %215 : vector<16x128xf32>
    %cst_115 = arith.constant 5.000000e-01 : f32
    %217 = vector.broadcast %cst_115 : f32 to vector<16x128xf32>
    %218 = arith.mulf %217, %216 : vector<16x128xf32>
    %cst_116 = arith.constant 4.471500e-02 : f32
    %219 = vector.broadcast %cst_116 : f32 to vector<16x128xf32>
    %220 = arith.mulf %219, %216 : vector<16x128xf32>
    %221 = arith.mulf %220, %216 : vector<16x128xf32>
    %222 = arith.mulf %221, %216 : vector<16x128xf32>
    %223 = arith.addf %216, %222 : vector<16x128xf32>
    %cst_117 = arith.constant 0.797884583 : f32
    %224 = vector.broadcast %cst_117 : f32 to vector<16x128xf32>
    %225 = arith.mulf %224, %223 : vector<16x128xf32>
    %226 = math.tanh %225 : vector<16x128xf32>
    %cst_118 = arith.constant 1.000000e+00 : f32
    %227 = vector.broadcast %cst_118 : f32 to vector<16x128xf32>
    %228 = arith.addf %227, %226 : vector<16x128xf32>
    %229 = arith.mulf %218, %228 : vector<16x128xf32>
    %cst_119 = arith.constant dense<0.000000e+00> : vector<16x32xf32>
    %230 = tpu.matmul %229, %141, %cst_119 {dimension_numbers = #tpu.dot_dimension_numbers<[1], [0], [0], [1], [0, 0, 1, 1], [], []>} : vector<16x128xf32>, vector<128x32xf32>, vector<16x32xf32> -> vector<16x32xf32>
    %231 = arith.addf %191, %230 : vector<16x32xf32>
    %232 = vector.broadcast %143 : vector<1x32xf32> to vector<16x32xf32>
    %233 = arith.addf %231, %232 : vector<16x32xf32>
    %c0_120 = arith.constant 0 : index
    %c0_121 = arith.constant 0 : index
    %234 = vector.load %arg17[%c0_120, %c0_121] : memref<1x32xf32, #tpu.memory_space<vmem>>, vector<1x32xf32>
    %c0_122 = arith.constant 0 : index
    %c0_123 = arith.constant 0 : index
    %235 = vector.load %arg18[%c0_122, %c0_123] : memref<1x32xf32, #tpu.memory_space<vmem>>, vector<1x32xf32>
    %cst_124 = arith.constant dense<0.000000e+00> : vector<16xf32>
    %236 = vector.multi_reduction <add>, %233, %cst_124 [1] : vector<16x32xf32> to vector<16xf32>
    %237 = vector.shape_cast %236 : vector<16xf32> to vector<16x1xf32>
    %cst_125 = arith.constant 3.200000e+01 : f32
    %238 = vector.broadcast %cst_125 : f32 to vector<16x1xf32>
    %239 = arith.divf %237, %238 : vector<16x1xf32>
    %240 = arith.mulf %233, %233 : vector<16x32xf32>
    %cst_126 = arith.constant dense<0.000000e+00> : vector<16xf32>
    %241 = vector.multi_reduction <add>, %240, %cst_126 [1] : vector<16x32xf32> to vector<16xf32>
    %242 = vector.shape_cast %241 : vector<16xf32> to vector<16x1xf32>
    %cst_127 = arith.constant 3.200000e+01 : f32
    %243 = vector.broadcast %cst_127 : f32 to vector<16x1xf32>
    %244 = arith.divf %242, %243 : vector<16x1xf32>
    %245 = arith.mulf %239, %239 : vector<16x1xf32>
    %246 = arith.subf %244, %245 : vector<16x1xf32>
    %247 = vector.broadcast %239 : vector<16x1xf32> to vector<16x32xf32>
    %248 = arith.subf %233, %247 : vector<16x32xf32>
    %cst_128 = arith.constant 9.99999974E-6 : f32
    %249 = vector.broadcast %cst_128 : f32 to vector<16x1xf32>
    %250 = arith.addf %246, %249 : vector<16x1xf32>
    %251 = math.rsqrt %250 : vector<16x1xf32>
    %252 = vector.broadcast %251 : vector<16x1xf32> to vector<16x32xf32>
    %253 = arith.mulf %248, %252 : vector<16x32xf32>
    %254 = vector.broadcast %234 : vector<1x32xf32> to vector<16x32xf32>
    %255 = arith.mulf %253, %254 : vector<16x32xf32>
    %256 = vector.broadcast %235 : vector<1x32xf32> to vector<16x32xf32>
    %257 = arith.addf %255, %256 : vector<16x32xf32>
    %258 = vector.extract_strided_slice %257 {offsets = [0, 0], sizes = [8, 32], strides = [1, 1]} : vector<16x32xf32> to vector<8x32xf32>
    %cst_129 = arith.constant dense<0.000000e+00> : vector<32xf32>
    %259 = vector.multi_reduction <add>, %258, %cst_129 [0] : vector<8x32xf32> to vector<32xf32>
    %260 = vector.shape_cast %259 : vector<32xf32> to vector<1x32xf32>
    %cst_130 = arith.constant 8.000000e+00 : f32
    %261 = vector.broadcast %cst_130 : f32 to vector<1x32xf32>
    %262 = arith.divf %260, %261 : vector<1x32xf32>
    %263 = vector.extract_strided_slice %257 {offsets = [8, 0], sizes = [8, 32], strides = [1, 1]} : vector<16x32xf32> to vector<8x32xf32>
    %cst_131 = arith.constant dense<0.000000e+00> : vector<32xf32>
    %264 = vector.multi_reduction <add>, %263, %cst_131 [0] : vector<8x32xf32> to vector<32xf32>
    %265 = vector.shape_cast %264 : vector<32xf32> to vector<1x32xf32>
    %cst_132 = arith.constant 8.000000e+00 : f32
    %266 = vector.broadcast %cst_132 : f32 to vector<1x32xf32>
    %267 = arith.divf %265, %266 : vector<1x32xf32>
    %268 = tpu.concatenate %262, %267 in 0 : vector<1x32xf32>, vector<1x32xf32> -> vector<2x32xf32>
    %c0_133 = arith.constant 0 : index
    %c0_134 = arith.constant 0 : index
    %269 = vector.load %arg2[%c0_133, %c0_134] : memref<16x32xf32, #tpu.memory_space<vmem>>, vector<16x32xf32>
    %c0_135 = arith.constant 0 : index
    %c0_136 = arith.constant 0 : index
    %270 = vector.load %arg19[%c0_135, %c0_136] : memref<32x32xf32, #tpu.memory_space<vmem>>, vector<32x32xf32>
    %cst_137 = arith.constant dense<0.000000e+00> : vector<16x32xf32>
    %271 = tpu.matmul %269, %270, %cst_137 {dimension_numbers = #tpu.dot_dimension_numbers<[1], [0], [0], [1], [0, 0, 1, 1], [], []>} : vector<16x32xf32>, vector<32x32xf32>, vector<16x32xf32> -> vector<16x32xf32>
    %c0_138 = arith.constant 0 : index
    %c0_139 = arith.constant 0 : index
    %272 = vector.load %arg20[%c0_138, %c0_139] : memref<1x32xf32, #tpu.memory_space<vmem>>, vector<1x32xf32>
    %273 = vector.broadcast %272 : vector<1x32xf32> to vector<16x32xf32>
    %274 = arith.addf %271, %273 : vector<16x32xf32>
    %c0_140 = arith.constant 0 : index
    %c0_141 = arith.constant 0 : index
    %c0_142 = arith.constant 0 : index
    %275 = vector.load %arg21[%c0_140, %c0_141, %c0_142] : memref<1x1x32xf32, #tpu.memory_space<vmem>>, vector<1x1x32xf32>
    %276 = vector.shape_cast %275 : vector<1x1x32xf32> to vector<1x32xf32>
    %c0_143 = arith.constant 0 : index
    %c0_144 = arith.constant 0 : index
    %c0_145 = arith.constant 0 : index
    %277 = vector.load %arg22[%c0_143, %c0_144, %c0_145] : memref<1x1x32xf32, #tpu.memory_space<vmem>>, vector<1x1x32xf32>
    %278 = vector.shape_cast %277 : vector<1x1x32xf32> to vector<1x32xf32>
    %c0_146 = arith.constant 0 : index
    %c0_147 = arith.constant 0 : index
    %c0_148 = arith.constant 0 : index
    %279 = vector.load %arg23[%c0_146, %c0_147, %c0_148] : memref<1x32x8xf32, #tpu.memory_space<vmem>>, vector<1x32x8xf32>
    %280 = vector.shape_cast %279 : vector<1x32x8xf32> to vector<32x8xf32>
    %c0_149 = arith.constant 0 : index
    %c0_150 = arith.constant 0 : index
    %c0_151 = arith.constant 0 : index
    %281 = vector.load %arg24[%c0_149, %c0_150, %c0_151] : memref<1x32x1xf32, #tpu.memory_space<vmem>>, vector<1x32x1xf32>
    %282 = vector.shape_cast %281 : vector<1x32x1xf32> to vector<32x1xf32>
    %c0_152 = arith.constant 0 : index
    %c0_153 = arith.constant 0 : index
    %c0_154 = arith.constant 0 : index
    %283 = vector.load %arg25[%c0_152, %c0_153, %c0_154] : memref<1x8x32xf32, #tpu.memory_space<vmem>>, vector<1x8x32xf32>
    %284 = vector.shape_cast %283 : vector<1x8x32xf32> to vector<8x32xf32>
    %c0_155 = arith.constant 0 : index
    %c0_156 = arith.constant 0 : index
    %c0_157 = arith.constant 0 : index
    %285 = vector.load %arg26[%c0_155, %c0_156, %c0_157] : memref<1x8x1xf32, #tpu.memory_space<vmem>>, vector<1x8x1xf32>
    %286 = vector.shape_cast %285 : vector<1x8x1xf32> to vector<8x1xf32>
    %c0_158 = arith.constant 0 : index
    %c0_159 = arith.constant 0 : index
    %c0_160 = arith.constant 0 : index
    %287 = vector.load %arg27[%c0_158, %c0_159, %c0_160] : memref<1x1x32xf32, #tpu.memory_space<vmem>>, vector<1x1x32xf32>
    %288 = vector.shape_cast %287 : vector<1x1x32xf32> to vector<1x32xf32>
    %c0_161 = arith.constant 0 : index
    %c0_162 = arith.constant 0 : index
    %c0_163 = arith.constant 0 : index
    %289 = vector.load %arg28[%c0_161, %c0_162, %c0_163] : memref<1x1x32xf32, #tpu.memory_space<vmem>>, vector<1x1x32xf32>
    %290 = vector.shape_cast %289 : vector<1x1x32xf32> to vector<1x32xf32>
    %c0_164 = arith.constant 0 : index
    %c0_165 = arith.constant 0 : index
    %c0_166 = arith.constant 0 : index
    %291 = vector.load %arg29[%c0_164, %c0_165, %c0_166] : memref<1x32x128xf32, #tpu.memory_space<vmem>>, vector<1x32x128xf32>
    %292 = vector.shape_cast %291 : vector<1x32x128xf32> to vector<32x128xf32>
    %c0_167 = arith.constant 0 : index
    %c0_168 = arith.constant 0 : index
    %c0_169 = arith.constant 0 : index
    %293 = vector.load %arg30[%c0_167, %c0_168, %c0_169] : memref<1x1x128xf32, #tpu.memory_space<vmem>>, vector<1x1x128xf32>
    %294 = vector.shape_cast %293 : vector<1x1x128xf32> to vector<1x128xf32>
    %c0_170 = arith.constant 0 : index
    %c0_171 = arith.constant 0 : index
    %c0_172 = arith.constant 0 : index
    %295 = vector.load %arg31[%c0_170, %c0_171, %c0_172] : memref<1x128x32xf32, #tpu.memory_space<vmem>>, vector<1x128x32xf32>
    %296 = vector.shape_cast %295 : vector<1x128x32xf32> to vector<128x32xf32>
    %c0_173 = arith.constant 0 : index
    %c0_174 = arith.constant 0 : index
    %c0_175 = arith.constant 0 : index
    %297 = vector.load %arg32[%c0_173, %c0_174, %c0_175] : memref<1x1x32xf32, #tpu.memory_space<vmem>>, vector<1x1x32xf32>
    %298 = vector.shape_cast %297 : vector<1x1x32xf32> to vector<1x32xf32>
    %cst_176 = arith.constant dense<0.000000e+00> : vector<16xf32>
    %299 = vector.multi_reduction <add>, %274, %cst_176 [1] : vector<16x32xf32> to vector<16xf32>
    %300 = vector.shape_cast %299 : vector<16xf32> to vector<16x1xf32>
    %cst_177 = arith.constant 3.200000e+01 : f32
    %301 = vector.broadcast %cst_177 : f32 to vector<16x1xf32>
    %302 = arith.divf %300, %301 : vector<16x1xf32>
    %303 = arith.mulf %274, %274 : vector<16x32xf32>
    %cst_178 = arith.constant dense<0.000000e+00> : vector<16xf32>
    %304 = vector.multi_reduction <add>, %303, %cst_178 [1] : vector<16x32xf32> to vector<16xf32>
    %305 = vector.shape_cast %304 : vector<16xf32> to vector<16x1xf32>
    %cst_179 = arith.constant 3.200000e+01 : f32
    %306 = vector.broadcast %cst_179 : f32 to vector<16x1xf32>
    %307 = arith.divf %305, %306 : vector<16x1xf32>
    %308 = arith.mulf %302, %302 : vector<16x1xf32>
    %309 = arith.subf %307, %308 : vector<16x1xf32>
    %310 = vector.broadcast %302 : vector<16x1xf32> to vector<16x32xf32>
    %311 = arith.subf %274, %310 : vector<16x32xf32>
    %cst_180 = arith.constant 9.99999974E-6 : f32
    %312 = vector.broadcast %cst_180 : f32 to vector<16x1xf32>
    %313 = arith.addf %309, %312 : vector<16x1xf32>
    %314 = math.rsqrt %313 : vector<16x1xf32>
    %315 = vector.broadcast %314 : vector<16x1xf32> to vector<16x32xf32>
    %316 = arith.mulf %311, %315 : vector<16x32xf32>
    %317 = vector.broadcast %276 : vector<1x32xf32> to vector<16x32xf32>
    %318 = arith.mulf %316, %317 : vector<16x32xf32>
    %319 = vector.broadcast %278 : vector<1x32xf32> to vector<16x32xf32>
    %320 = arith.addf %318, %319 : vector<16x32xf32>
    %321 = vector.extract_strided_slice %320 {offsets = [0, 0], sizes = [8, 32], strides = [1, 1]} : vector<16x32xf32> to vector<8x32xf32>
    %322 = vector.extract_strided_slice %320 {offsets = [8, 0], sizes = [8, 32], strides = [1, 1]} : vector<16x32xf32> to vector<8x32xf32>
    %323 = tpu.concatenate %321, %322 in 1 : vector<8x32xf32>, vector<8x32xf32> -> vector<8x64xf32>
    %cst_181 = arith.constant dense<0.000000e+00> : vector<32x64xf32>
    %324 = tpu.matmul %280, %323, %cst_181 {dimension_numbers = #tpu.dot_dimension_numbers<[1], [0], [0], [1], [0, 0, 1, 1], [], []>} : vector<32x8xf32>, vector<8x64xf32>, vector<32x64xf32> -> vector<32x64xf32>
    %325 = vector.broadcast %282 : vector<32x1xf32> to vector<32x64xf32>
    %326 = arith.addf %324, %325 : vector<32x64xf32>
    %cst_182 = arith.constant 5.000000e-01 : f32
    %327 = vector.broadcast %cst_182 : f32 to vector<32x64xf32>
    %328 = arith.mulf %327, %326 : vector<32x64xf32>
    %cst_183 = arith.constant 4.471500e-02 : f32
    %329 = vector.broadcast %cst_183 : f32 to vector<32x64xf32>
    %330 = arith.mulf %329, %326 : vector<32x64xf32>
    %331 = arith.mulf %330, %326 : vector<32x64xf32>
    %332 = arith.mulf %331, %326 : vector<32x64xf32>
    %333 = arith.addf %326, %332 : vector<32x64xf32>
    %cst_184 = arith.constant 0.797884583 : f32
    %334 = vector.broadcast %cst_184 : f32 to vector<32x64xf32>
    %335 = arith.mulf %334, %333 : vector<32x64xf32>
    %336 = math.tanh %335 : vector<32x64xf32>
    %cst_185 = arith.constant 1.000000e+00 : f32
    %337 = vector.broadcast %cst_185 : f32 to vector<32x64xf32>
    %338 = arith.addf %337, %336 : vector<32x64xf32>
    %339 = arith.mulf %328, %338 : vector<32x64xf32>
    %cst_186 = arith.constant dense<0.000000e+00> : vector<8x64xf32>
    %340 = tpu.matmul %284, %339, %cst_186 {dimension_numbers = #tpu.dot_dimension_numbers<[1], [0], [0], [1], [0, 0, 1, 1], [], []>} : vector<8x32xf32>, vector<32x64xf32>, vector<8x64xf32> -> vector<8x64xf32>
    %341 = vector.broadcast %286 : vector<8x1xf32> to vector<8x64xf32>
    %342 = arith.addf %340, %341 : vector<8x64xf32>
    %343 = vector.extract_strided_slice %342 {offsets = [0, 0], sizes = [8, 32], strides = [1, 1]} : vector<8x64xf32> to vector<8x32xf32>
    %344 = vector.extract_strided_slice %342 {offsets = [0, 32], sizes = [8, 32], strides = [1, 1]} : vector<8x64xf32> to vector<8x32xf32>
    %345 = tpu.concatenate %343, %344 in 0 : vector<8x32xf32>, vector<8x32xf32> -> vector<16x32xf32>
    %346 = arith.addf %274, %345 : vector<16x32xf32>
    %cst_187 = arith.constant dense<0.000000e+00> : vector<16xf32>
    %347 = vector.multi_reduction <add>, %346, %cst_187 [1] : vector<16x32xf32> to vector<16xf32>
    %348 = vector.shape_cast %347 : vector<16xf32> to vector<16x1xf32>
    %cst_188 = arith.constant 3.200000e+01 : f32
    %349 = vector.broadcast %cst_188 : f32 to vector<16x1xf32>
    %350 = arith.divf %348, %349 : vector<16x1xf32>
    %351 = arith.mulf %346, %346 : vector<16x32xf32>
    %cst_189 = arith.constant dense<0.000000e+00> : vector<16xf32>
    %352 = vector.multi_reduction <add>, %351, %cst_189 [1] : vector<16x32xf32> to vector<16xf32>
    %353 = vector.shape_cast %352 : vector<16xf32> to vector<16x1xf32>
    %cst_190 = arith.constant 3.200000e+01 : f32
    %354 = vector.broadcast %cst_190 : f32 to vector<16x1xf32>
    %355 = arith.divf %353, %354 : vector<16x1xf32>
    %356 = arith.mulf %350, %350 : vector<16x1xf32>
    %357 = arith.subf %355, %356 : vector<16x1xf32>
    %358 = vector.broadcast %350 : vector<16x1xf32> to vector<16x32xf32>
    %359 = arith.subf %346, %358 : vector<16x32xf32>
    %cst_191 = arith.constant 9.99999974E-6 : f32
    %360 = vector.broadcast %cst_191 : f32 to vector<16x1xf32>
    %361 = arith.addf %357, %360 : vector<16x1xf32>
    %362 = math.rsqrt %361 : vector<16x1xf32>
    %363 = vector.broadcast %362 : vector<16x1xf32> to vector<16x32xf32>
    %364 = arith.mulf %359, %363 : vector<16x32xf32>
    %365 = vector.broadcast %288 : vector<1x32xf32> to vector<16x32xf32>
    %366 = arith.mulf %364, %365 : vector<16x32xf32>
    %367 = vector.broadcast %290 : vector<1x32xf32> to vector<16x32xf32>
    %368 = arith.addf %366, %367 : vector<16x32xf32>
    %cst_192 = arith.constant dense<0.000000e+00> : vector<16x128xf32>
    %369 = tpu.matmul %368, %292, %cst_192 {dimension_numbers = #tpu.dot_dimension_numbers<[1], [0], [0], [1], [0, 0, 1, 1], [], []>} : vector<16x32xf32>, vector<32x128xf32>, vector<16x128xf32> -> vector<16x128xf32>
    %370 = vector.broadcast %294 : vector<1x128xf32> to vector<16x128xf32>
    %371 = arith.addf %369, %370 : vector<16x128xf32>
    %cst_193 = arith.constant 5.000000e-01 : f32
    %372 = vector.broadcast %cst_193 : f32 to vector<16x128xf32>
    %373 = arith.mulf %372, %371 : vector<16x128xf32>
    %cst_194 = arith.constant 4.471500e-02 : f32
    %374 = vector.broadcast %cst_194 : f32 to vector<16x128xf32>
    %375 = arith.mulf %374, %371 : vector<16x128xf32>
    %376 = arith.mulf %375, %371 : vector<16x128xf32>
    %377 = arith.mulf %376, %371 : vector<16x128xf32>
    %378 = arith.addf %371, %377 : vector<16x128xf32>
    %cst_195 = arith.constant 0.797884583 : f32
    %379 = vector.broadcast %cst_195 : f32 to vector<16x128xf32>
    %380 = arith.mulf %379, %378 : vector<16x128xf32>
    %381 = math.tanh %380 : vector<16x128xf32>
    %cst_196 = arith.constant 1.000000e+00 : f32
    %382 = vector.broadcast %cst_196 : f32 to vector<16x128xf32>
    %383 = arith.addf %382, %381 : vector<16x128xf32>
    %384 = arith.mulf %373, %383 : vector<16x128xf32>
    %cst_197 = arith.constant dense<0.000000e+00> : vector<16x32xf32>
    %385 = tpu.matmul %384, %296, %cst_197 {dimension_numbers = #tpu.dot_dimension_numbers<[1], [0], [0], [1], [0, 0, 1, 1], [], []>} : vector<16x128xf32>, vector<128x32xf32>, vector<16x32xf32> -> vector<16x32xf32>
    %386 = arith.addf %346, %385 : vector<16x32xf32>
    %387 = vector.broadcast %298 : vector<1x32xf32> to vector<16x32xf32>
    %388 = arith.addf %386, %387 : vector<16x32xf32>
    %c0_198 = arith.constant 0 : index
    %c0_199 = arith.constant 0 : index
    %c0_200 = arith.constant 0 : index
    %c0_201 = arith.constant 0 : index
    %389 = vector.load %arg33[%c0_198, %c0_199, %c0_200, %c0_201] : memref<2x1x1x32xf32, #tpu.memory_space<vmem>>, vector<1x1x1x32xf32>
    %390 = vector.shape_cast %389 : vector<1x1x1x32xf32> to vector<1x32xf32>
    %c0_202 = arith.constant 0 : index
    %c0_203 = arith.constant 0 : index
    %c0_204 = arith.constant 0 : index
    %c0_205 = arith.constant 0 : index
    %391 = vector.load %arg34[%c0_202, %c0_203, %c0_204, %c0_205] : memref<2x1x1x32xf32, #tpu.memory_space<vmem>>, vector<1x1x1x32xf32>
    %392 = vector.shape_cast %391 : vector<1x1x1x32xf32> to vector<1x32xf32>
    %c0_206 = arith.constant 0 : index
    %c0_207 = arith.constant 0 : index
    %c0_208 = arith.constant 0 : index
    %c0_209 = arith.constant 0 : index
    %393 = vector.load %arg35[%c0_206, %c0_207, %c0_208, %c0_209] : memref<2x1x32x8xf32, #tpu.memory_space<vmem>>, vector<1x1x32x8xf32>
    %394 = vector.shape_cast %393 : vector<1x1x32x8xf32> to vector<32x8xf32>
    %c0_210 = arith.constant 0 : index
    %c0_211 = arith.constant 0 : index
    %c0_212 = arith.constant 0 : index
    %c0_213 = arith.constant 0 : index
    %395 = vector.load %arg36[%c0_210, %c0_211, %c0_212, %c0_213] : memref<2x1x32x1xf32, #tpu.memory_space<vmem>>, vector<1x1x32x1xf32>
    %396 = vector.shape_cast %395 : vector<1x1x32x1xf32> to vector<32x1xf32>
    %c0_214 = arith.constant 0 : index
    %c0_215 = arith.constant 0 : index
    %c0_216 = arith.constant 0 : index
    %c0_217 = arith.constant 0 : index
    %397 = vector.load %arg37[%c0_214, %c0_215, %c0_216, %c0_217] : memref<2x1x8x32xf32, #tpu.memory_space<vmem>>, vector<1x1x8x32xf32>
    %398 = vector.shape_cast %397 : vector<1x1x8x32xf32> to vector<8x32xf32>
    %c0_218 = arith.constant 0 : index
    %c0_219 = arith.constant 0 : index
    %c0_220 = arith.constant 0 : index
    %c0_221 = arith.constant 0 : index
    %399 = vector.load %arg38[%c0_218, %c0_219, %c0_220, %c0_221] : memref<2x1x8x1xf32, #tpu.memory_space<vmem>>, vector<1x1x8x1xf32>
    %400 = vector.shape_cast %399 : vector<1x1x8x1xf32> to vector<8x1xf32>
    %c0_222 = arith.constant 0 : index
    %c0_223 = arith.constant 0 : index
    %c0_224 = arith.constant 0 : index
    %c0_225 = arith.constant 0 : index
    %401 = vector.load %arg39[%c0_222, %c0_223, %c0_224, %c0_225] : memref<2x1x1x32xf32, #tpu.memory_space<vmem>>, vector<1x1x1x32xf32>
    %402 = vector.shape_cast %401 : vector<1x1x1x32xf32> to vector<1x32xf32>
    %c0_226 = arith.constant 0 : index
    %c0_227 = arith.constant 0 : index
    %c0_228 = arith.constant 0 : index
    %c0_229 = arith.constant 0 : index
    %403 = vector.load %arg40[%c0_226, %c0_227, %c0_228, %c0_229] : memref<2x1x1x32xf32, #tpu.memory_space<vmem>>, vector<1x1x1x32xf32>
    %404 = vector.shape_cast %403 : vector<1x1x1x32xf32> to vector<1x32xf32>
    %c0_230 = arith.constant 0 : index
    %c0_231 = arith.constant 0 : index
    %c0_232 = arith.constant 0 : index
    %c0_233 = arith.constant 0 : index
    %405 = vector.load %arg41[%c0_230, %c0_231, %c0_232, %c0_233] : memref<2x1x32x128xf32, #tpu.memory_space<vmem>>, vector<1x1x32x128xf32>
    %406 = vector.shape_cast %405 : vector<1x1x32x128xf32> to vector<32x128xf32>
    %c0_234 = arith.constant 0 : index
    %c0_235 = arith.constant 0 : index
    %c0_236 = arith.constant 0 : index
    %c0_237 = arith.constant 0 : index
    %407 = vector.load %arg42[%c0_234, %c0_235, %c0_236, %c0_237] : memref<2x1x1x128xf32, #tpu.memory_space<vmem>>, vector<1x1x1x128xf32>
    %408 = vector.shape_cast %407 : vector<1x1x1x128xf32> to vector<1x128xf32>
    %c0_238 = arith.constant 0 : index
    %c0_239 = arith.constant 0 : index
    %c0_240 = arith.constant 0 : index
    %c0_241 = arith.constant 0 : index
    %409 = vector.load %arg43[%c0_238, %c0_239, %c0_240, %c0_241] : memref<2x1x128x32xf32, #tpu.memory_space<vmem>>, vector<1x1x128x32xf32>
    %410 = vector.shape_cast %409 : vector<1x1x128x32xf32> to vector<128x32xf32>
    %c0_242 = arith.constant 0 : index
    %c0_243 = arith.constant 0 : index
    %c0_244 = arith.constant 0 : index
    %c0_245 = arith.constant 0 : index
    %411 = vector.load %arg44[%c0_242, %c0_243, %c0_244, %c0_245] : memref<2x1x1x32xf32, #tpu.memory_space<vmem>>, vector<1x1x1x32xf32>
    %412 = vector.shape_cast %411 : vector<1x1x1x32xf32> to vector<1x32xf32>
    %cst_246 = arith.constant dense<0.000000e+00> : vector<16xf32>
    %413 = vector.multi_reduction <add>, %388, %cst_246 [1] : vector<16x32xf32> to vector<16xf32>
    %414 = vector.shape_cast %413 : vector<16xf32> to vector<16x1xf32>
    %cst_247 = arith.constant 3.200000e+01 : f32
    %415 = vector.broadcast %cst_247 : f32 to vector<16x1xf32>
    %416 = arith.divf %414, %415 : vector<16x1xf32>
    %417 = arith.mulf %388, %388 : vector<16x32xf32>
    %cst_248 = arith.constant dense<0.000000e+00> : vector<16xf32>
    %418 = vector.multi_reduction <add>, %417, %cst_248 [1] : vector<16x32xf32> to vector<16xf32>
    %419 = vector.shape_cast %418 : vector<16xf32> to vector<16x1xf32>
    %cst_249 = arith.constant 3.200000e+01 : f32
    %420 = vector.broadcast %cst_249 : f32 to vector<16x1xf32>
    %421 = arith.divf %419, %420 : vector<16x1xf32>
    %422 = arith.mulf %416, %416 : vector<16x1xf32>
    %423 = arith.subf %421, %422 : vector<16x1xf32>
    %424 = vector.broadcast %416 : vector<16x1xf32> to vector<16x32xf32>
    %425 = arith.subf %388, %424 : vector<16x32xf32>
    %cst_250 = arith.constant 9.99999974E-6 : f32
    %426 = vector.broadcast %cst_250 : f32 to vector<16x1xf32>
    %427 = arith.addf %423, %426 : vector<16x1xf32>
    %428 = math.rsqrt %427 : vector<16x1xf32>
    %429 = vector.broadcast %428 : vector<16x1xf32> to vector<16x32xf32>
    %430 = arith.mulf %425, %429 : vector<16x32xf32>
    %431 = vector.broadcast %390 : vector<1x32xf32> to vector<16x32xf32>
    %432 = arith.mulf %430, %431 : vector<16x32xf32>
    %433 = vector.broadcast %392 : vector<1x32xf32> to vector<16x32xf32>
    %434 = arith.addf %432, %433 : vector<16x32xf32>
    %435 = vector.extract_strided_slice %434 {offsets = [0, 0], sizes = [8, 32], strides = [1, 1]} : vector<16x32xf32> to vector<8x32xf32>
    %436 = vector.extract_strided_slice %434 {offsets = [8, 0], sizes = [8, 32], strides = [1, 1]} : vector<16x32xf32> to vector<8x32xf32>
    %437 = tpu.concatenate %435, %436 in 1 : vector<8x32xf32>, vector<8x32xf32> -> vector<8x64xf32>
    %cst_251 = arith.constant dense<0.000000e+00> : vector<32x64xf32>
    %438 = tpu.matmul %394, %437, %cst_251 {dimension_numbers = #tpu.dot_dimension_numbers<[1], [0], [0], [1], [0, 0, 1, 1], [], []>} : vector<32x8xf32>, vector<8x64xf32>, vector<32x64xf32> -> vector<32x64xf32>
    %439 = vector.broadcast %396 : vector<32x1xf32> to vector<32x64xf32>
    %440 = arith.addf %438, %439 : vector<32x64xf32>
    %cst_252 = arith.constant 5.000000e-01 : f32
    %441 = vector.broadcast %cst_252 : f32 to vector<32x64xf32>
    %442 = arith.mulf %441, %440 : vector<32x64xf32>
    %cst_253 = arith.constant 4.471500e-02 : f32
    %443 = vector.broadcast %cst_253 : f32 to vector<32x64xf32>
    %444 = arith.mulf %443, %440 : vector<32x64xf32>
    %445 = arith.mulf %444, %440 : vector<32x64xf32>
    %446 = arith.mulf %445, %440 : vector<32x64xf32>
    %447 = arith.addf %440, %446 : vector<32x64xf32>
    %cst_254 = arith.constant 0.797884583 : f32
    %448 = vector.broadcast %cst_254 : f32 to vector<32x64xf32>
    %449 = arith.mulf %448, %447 : vector<32x64xf32>
    %450 = math.tanh %449 : vector<32x64xf32>
    %cst_255 = arith.constant 1.000000e+00 : f32
    %451 = vector.broadcast %cst_255 : f32 to vector<32x64xf32>
    %452 = arith.addf %451, %450 : vector<32x64xf32>
    %453 = arith.mulf %442, %452 : vector<32x64xf32>
    %cst_256 = arith.constant dense<0.000000e+00> : vector<8x64xf32>
    %454 = tpu.matmul %398, %453, %cst_256 {dimension_numbers = #tpu.dot_dimension_numbers<[1], [0], [0], [1], [0, 0, 1, 1], [], []>} : vector<8x32xf32>, vector<32x64xf32>, vector<8x64xf32> -> vector<8x64xf32>
    %455 = vector.broadcast %400 : vector<8x1xf32> to vector<8x64xf32>
    %456 = arith.addf %454, %455 : vector<8x64xf32>
    %457 = vector.extract_strided_slice %456 {offsets = [0, 0], sizes = [8, 32], strides = [1, 1]} : vector<8x64xf32> to vector<8x32xf32>
    %458 = vector.extract_strided_slice %456 {offsets = [0, 32], sizes = [8, 32], strides = [1, 1]} : vector<8x64xf32> to vector<8x32xf32>
    %459 = tpu.concatenate %457, %458 in 0 : vector<8x32xf32>, vector<8x32xf32> -> vector<16x32xf32>
    %460 = arith.addf %388, %459 : vector<16x32xf32>
    %cst_257 = arith.constant dense<0.000000e+00> : vector<16xf32>
    %461 = vector.multi_reduction <add>, %460, %cst_257 [1] : vector<16x32xf32> to vector<16xf32>
    %462 = vector.shape_cast %461 : vector<16xf32> to vector<16x1xf32>
    %cst_258 = arith.constant 3.200000e+01 : f32
    %463 = vector.broadcast %cst_258 : f32 to vector<16x1xf32>
    %464 = arith.divf %462, %463 : vector<16x1xf32>
    %465 = arith.mulf %460, %460 : vector<16x32xf32>
    %cst_259 = arith.constant dense<0.000000e+00> : vector<16xf32>
    %466 = vector.multi_reduction <add>, %465, %cst_259 [1] : vector<16x32xf32> to vector<16xf32>
    %467 = vector.shape_cast %466 : vector<16xf32> to vector<16x1xf32>
    %cst_260 = arith.constant 3.200000e+01 : f32
    %468 = vector.broadcast %cst_260 : f32 to vector<16x1xf32>
    %469 = arith.divf %467, %468 : vector<16x1xf32>
    %470 = arith.mulf %464, %464 : vector<16x1xf32>
    %471 = arith.subf %469, %470 : vector<16x1xf32>
    %472 = vector.broadcast %464 : vector<16x1xf32> to vector<16x32xf32>
    %473 = arith.subf %460, %472 : vector<16x32xf32>
    %cst_261 = arith.constant 9.99999974E-6 : f32
    %474 = vector.broadcast %cst_261 : f32 to vector<16x1xf32>
    %475 = arith.addf %471, %474 : vector<16x1xf32>
    %476 = math.rsqrt %475 : vector<16x1xf32>
    %477 = vector.broadcast %476 : vector<16x1xf32> to vector<16x32xf32>
    %478 = arith.mulf %473, %477 : vector<16x32xf32>
    %479 = vector.broadcast %402 : vector<1x32xf32> to vector<16x32xf32>
    %480 = arith.mulf %478, %479 : vector<16x32xf32>
    %481 = vector.broadcast %404 : vector<1x32xf32> to vector<16x32xf32>
    %482 = arith.addf %480, %481 : vector<16x32xf32>
    %cst_262 = arith.constant dense<0.000000e+00> : vector<16x128xf32>
    %483 = tpu.matmul %482, %406, %cst_262 {dimension_numbers = #tpu.dot_dimension_numbers<[1], [0], [0], [1], [0, 0, 1, 1], [], []>} : vector<16x32xf32>, vector<32x128xf32>, vector<16x128xf32> -> vector<16x128xf32>
    %484 = vector.broadcast %408 : vector<1x128xf32> to vector<16x128xf32>
    %485 = arith.addf %483, %484 : vector<16x128xf32>
    %cst_263 = arith.constant 5.000000e-01 : f32
    %486 = vector.broadcast %cst_263 : f32 to vector<16x128xf32>
    %487 = arith.mulf %486, %485 : vector<16x128xf32>
    %cst_264 = arith.constant 4.471500e-02 : f32
    %488 = vector.broadcast %cst_264 : f32 to vector<16x128xf32>
    %489 = arith.mulf %488, %485 : vector<16x128xf32>
    %490 = arith.mulf %489, %485 : vector<16x128xf32>
    %491 = arith.mulf %490, %485 : vector<16x128xf32>
    %492 = arith.addf %485, %491 : vector<16x128xf32>
    %cst_265 = arith.constant 0.797884583 : f32
    %493 = vector.broadcast %cst_265 : f32 to vector<16x128xf32>
    %494 = arith.mulf %493, %492 : vector<16x128xf32>
    %495 = math.tanh %494 : vector<16x128xf32>
    %cst_266 = arith.constant 1.000000e+00 : f32
    %496 = vector.broadcast %cst_266 : f32 to vector<16x128xf32>
    %497 = arith.addf %496, %495 : vector<16x128xf32>
    %498 = arith.mulf %487, %497 : vector<16x128xf32>
    %cst_267 = arith.constant dense<0.000000e+00> : vector<16x32xf32>
    %499 = tpu.matmul %498, %410, %cst_267 {dimension_numbers = #tpu.dot_dimension_numbers<[1], [0], [0], [1], [0, 0, 1, 1], [], []>} : vector<16x128xf32>, vector<128x32xf32>, vector<16x32xf32> -> vector<16x32xf32>
    %500 = arith.addf %460, %499 : vector<16x32xf32>
    %501 = vector.broadcast %412 : vector<1x32xf32> to vector<16x32xf32>
    %502 = arith.addf %500, %501 : vector<16x32xf32>
    %c0_268 = arith.constant 0 : index
    %c0_269 = arith.constant 0 : index
    %c0_270 = arith.constant 0 : index
    %503 = vector.load %arg45[%c0_268, %c0_269, %c0_270] : memref<2x1x32xf32, #tpu.memory_space<vmem>>, vector<1x1x32xf32>
    %504 = vector.shape_cast %503 : vector<1x1x32xf32> to vector<1x32xf32>
    %c0_271 = arith.constant 0 : index
    %c0_272 = arith.constant 0 : index
    %c0_273 = arith.constant 0 : index
    %505 = vector.load %arg46[%c0_271, %c0_272, %c0_273] : memref<2x1x32xf32, #tpu.memory_space<vmem>>, vector<1x1x32xf32>
    %506 = vector.shape_cast %505 : vector<1x1x32xf32> to vector<1x32xf32>
    %cst_274 = arith.constant dense<0.000000e+00> : vector<16xf32>
    %507 = vector.multi_reduction <add>, %502, %cst_274 [1] : vector<16x32xf32> to vector<16xf32>
    %508 = vector.shape_cast %507 : vector<16xf32> to vector<16x1xf32>
    %cst_275 = arith.constant 3.200000e+01 : f32
    %509 = vector.broadcast %cst_275 : f32 to vector<16x1xf32>
    %510 = arith.divf %508, %509 : vector<16x1xf32>
    %511 = arith.mulf %502, %502 : vector<16x32xf32>
    %cst_276 = arith.constant dense<0.000000e+00> : vector<16xf32>
    %512 = vector.multi_reduction <add>, %511, %cst_276 [1] : vector<16x32xf32> to vector<16xf32>
    %513 = vector.shape_cast %512 : vector<16xf32> to vector<16x1xf32>
    %cst_277 = arith.constant 3.200000e+01 : f32
    %514 = vector.broadcast %cst_277 : f32 to vector<16x1xf32>
    %515 = arith.divf %513, %514 : vector<16x1xf32>
    %516 = arith.mulf %510, %510 : vector<16x1xf32>
    %517 = arith.subf %515, %516 : vector<16x1xf32>
    %518 = vector.broadcast %510 : vector<16x1xf32> to vector<16x32xf32>
    %519 = arith.subf %502, %518 : vector<16x32xf32>
    %cst_278 = arith.constant 9.99999974E-6 : f32
    %520 = vector.broadcast %cst_278 : f32 to vector<16x1xf32>
    %521 = arith.addf %517, %520 : vector<16x1xf32>
    %522 = math.rsqrt %521 : vector<16x1xf32>
    %523 = vector.broadcast %522 : vector<16x1xf32> to vector<16x32xf32>
    %524 = arith.mulf %519, %523 : vector<16x32xf32>
    %525 = vector.broadcast %504 : vector<1x32xf32> to vector<16x32xf32>
    %526 = arith.mulf %524, %525 : vector<16x32xf32>
    %527 = vector.broadcast %506 : vector<1x32xf32> to vector<16x32xf32>
    %528 = arith.addf %526, %527 : vector<16x32xf32>
    %529 = vector.extract_strided_slice %528 {offsets = [0, 0], sizes = [8, 32], strides = [1, 1]} : vector<16x32xf32> to vector<8x32xf32>
    %cst_279 = arith.constant dense<0.000000e+00> : vector<32xf32>
    %530 = vector.multi_reduction <add>, %529, %cst_279 [0] : vector<8x32xf32> to vector<32xf32>
    %531 = vector.shape_cast %530 : vector<32xf32> to vector<1x32xf32>
    %cst_280 = arith.constant 8.000000e+00 : f32
    %532 = vector.broadcast %cst_280 : f32 to vector<1x32xf32>
    %533 = arith.divf %531, %532 : vector<1x32xf32>
    %534 = vector.extract_strided_slice %528 {offsets = [8, 0], sizes = [8, 32], strides = [1, 1]} : vector<16x32xf32> to vector<8x32xf32>
    %cst_281 = arith.constant dense<0.000000e+00> : vector<32xf32>
    %535 = vector.multi_reduction <add>, %534, %cst_281 [0] : vector<8x32xf32> to vector<32xf32>
    %536 = vector.shape_cast %535 : vector<32xf32> to vector<1x32xf32>
    %cst_282 = arith.constant 8.000000e+00 : f32
    %537 = vector.broadcast %cst_282 : f32 to vector<1x32xf32>
    %538 = arith.divf %536, %537 : vector<1x32xf32>
    %539 = tpu.concatenate %533, %538 in 0 : vector<1x32xf32>, vector<1x32xf32> -> vector<2x32xf32>
    %c1_283 = arith.constant 1 : index
    %c0_284 = arith.constant 0 : index
    %c0_285 = arith.constant 0 : index
    %c0_286 = arith.constant 0 : index
    %540 = vector.load %arg33[%c1_283, %c0_284, %c0_285, %c0_286] : memref<2x1x1x32xf32, #tpu.memory_space<vmem>>, vector<1x1x1x32xf32>
    %541 = vector.shape_cast %540 : vector<1x1x1x32xf32> to vector<1x32xf32>
    %c1_287 = arith.constant 1 : index
    %c0_288 = arith.constant 0 : index
    %c0_289 = arith.constant 0 : index
    %c0_290 = arith.constant 0 : index
    %542 = vector.load %arg34[%c1_287, %c0_288, %c0_289, %c0_290] : memref<2x1x1x32xf32, #tpu.memory_space<vmem>>, vector<1x1x1x32xf32>
    %543 = vector.shape_cast %542 : vector<1x1x1x32xf32> to vector<1x32xf32>
    %c1_291 = arith.constant 1 : index
    %c0_292 = arith.constant 0 : index
    %c0_293 = arith.constant 0 : index
    %c0_294 = arith.constant 0 : index
    %544 = vector.load %arg35[%c1_291, %c0_292, %c0_293, %c0_294] : memref<2x1x32x8xf32, #tpu.memory_space<vmem>>, vector<1x1x32x8xf32>
    %545 = vector.shape_cast %544 : vector<1x1x32x8xf32> to vector<32x8xf32>
    %c1_295 = arith.constant 1 : index
    %c0_296 = arith.constant 0 : index
    %c0_297 = arith.constant 0 : index
    %c0_298 = arith.constant 0 : index
    %546 = vector.load %arg36[%c1_295, %c0_296, %c0_297, %c0_298] : memref<2x1x32x1xf32, #tpu.memory_space<vmem>>, vector<1x1x32x1xf32>
    %547 = vector.shape_cast %546 : vector<1x1x32x1xf32> to vector<32x1xf32>
    %c1_299 = arith.constant 1 : index
    %c0_300 = arith.constant 0 : index
    %c0_301 = arith.constant 0 : index
    %c0_302 = arith.constant 0 : index
    %548 = vector.load %arg37[%c1_299, %c0_300, %c0_301, %c0_302] : memref<2x1x8x32xf32, #tpu.memory_space<vmem>>, vector<1x1x8x32xf32>
    %549 = vector.shape_cast %548 : vector<1x1x8x32xf32> to vector<8x32xf32>
    %c1_303 = arith.constant 1 : index
    %c0_304 = arith.constant 0 : index
    %c0_305 = arith.constant 0 : index
    %c0_306 = arith.constant 0 : index
    %550 = vector.load %arg38[%c1_303, %c0_304, %c0_305, %c0_306] : memref<2x1x8x1xf32, #tpu.memory_space<vmem>>, vector<1x1x8x1xf32>
    %551 = vector.shape_cast %550 : vector<1x1x8x1xf32> to vector<8x1xf32>
    %c1_307 = arith.constant 1 : index
    %c0_308 = arith.constant 0 : index
    %c0_309 = arith.constant 0 : index
    %c0_310 = arith.constant 0 : index
    %552 = vector.load %arg39[%c1_307, %c0_308, %c0_309, %c0_310] : memref<2x1x1x32xf32, #tpu.memory_space<vmem>>, vector<1x1x1x32xf32>
    %553 = vector.shape_cast %552 : vector<1x1x1x32xf32> to vector<1x32xf32>
    %c1_311 = arith.constant 1 : index
    %c0_312 = arith.constant 0 : index
    %c0_313 = arith.constant 0 : index
    %c0_314 = arith.constant 0 : index
    %554 = vector.load %arg40[%c1_311, %c0_312, %c0_313, %c0_314] : memref<2x1x1x32xf32, #tpu.memory_space<vmem>>, vector<1x1x1x32xf32>
    %555 = vector.shape_cast %554 : vector<1x1x1x32xf32> to vector<1x32xf32>
    %c1_315 = arith.constant 1 : index
    %c0_316 = arith.constant 0 : index
    %c0_317 = arith.constant 0 : index
    %c0_318 = arith.constant 0 : index
    %556 = vector.load %arg41[%c1_315, %c0_316, %c0_317, %c0_318] : memref<2x1x32x128xf32, #tpu.memory_space<vmem>>, vector<1x1x32x128xf32>
    %557 = vector.shape_cast %556 : vector<1x1x32x128xf32> to vector<32x128xf32>
    %c1_319 = arith.constant 1 : index
    %c0_320 = arith.constant 0 : index
    %c0_321 = arith.constant 0 : index
    %c0_322 = arith.constant 0 : index
    %558 = vector.load %arg42[%c1_319, %c0_320, %c0_321, %c0_322] : memref<2x1x1x128xf32, #tpu.memory_space<vmem>>, vector<1x1x1x128xf32>
    %559 = vector.shape_cast %558 : vector<1x1x1x128xf32> to vector<1x128xf32>
    %c1_323 = arith.constant 1 : index
    %c0_324 = arith.constant 0 : index
    %c0_325 = arith.constant 0 : index
    %c0_326 = arith.constant 0 : index
    %560 = vector.load %arg43[%c1_323, %c0_324, %c0_325, %c0_326] : memref<2x1x128x32xf32, #tpu.memory_space<vmem>>, vector<1x1x128x32xf32>
    %561 = vector.shape_cast %560 : vector<1x1x128x32xf32> to vector<128x32xf32>
    %c1_327 = arith.constant 1 : index
    %c0_328 = arith.constant 0 : index
    %c0_329 = arith.constant 0 : index
    %c0_330 = arith.constant 0 : index
    %562 = vector.load %arg44[%c1_327, %c0_328, %c0_329, %c0_330] : memref<2x1x1x32xf32, #tpu.memory_space<vmem>>, vector<1x1x1x32xf32>
    %563 = vector.shape_cast %562 : vector<1x1x1x32xf32> to vector<1x32xf32>
    %cst_331 = arith.constant dense<0.000000e+00> : vector<16xf32>
    %564 = vector.multi_reduction <add>, %388, %cst_331 [1] : vector<16x32xf32> to vector<16xf32>
    %565 = vector.shape_cast %564 : vector<16xf32> to vector<16x1xf32>
    %cst_332 = arith.constant 3.200000e+01 : f32
    %566 = vector.broadcast %cst_332 : f32 to vector<16x1xf32>
    %567 = arith.divf %565, %566 : vector<16x1xf32>
    %568 = arith.mulf %388, %388 : vector<16x32xf32>
    %cst_333 = arith.constant dense<0.000000e+00> : vector<16xf32>
    %569 = vector.multi_reduction <add>, %568, %cst_333 [1] : vector<16x32xf32> to vector<16xf32>
    %570 = vector.shape_cast %569 : vector<16xf32> to vector<16x1xf32>
    %cst_334 = arith.constant 3.200000e+01 : f32
    %571 = vector.broadcast %cst_334 : f32 to vector<16x1xf32>
    %572 = arith.divf %570, %571 : vector<16x1xf32>
    %573 = arith.mulf %567, %567 : vector<16x1xf32>
    %574 = arith.subf %572, %573 : vector<16x1xf32>
    %575 = vector.broadcast %567 : vector<16x1xf32> to vector<16x32xf32>
    %576 = arith.subf %388, %575 : vector<16x32xf32>
    %cst_335 = arith.constant 9.99999974E-6 : f32
    %577 = vector.broadcast %cst_335 : f32 to vector<16x1xf32>
    %578 = arith.addf %574, %577 : vector<16x1xf32>
    %579 = math.rsqrt %578 : vector<16x1xf32>
    %580 = vector.broadcast %579 : vector<16x1xf32> to vector<16x32xf32>
    %581 = arith.mulf %576, %580 : vector<16x32xf32>
    %582 = vector.broadcast %541 : vector<1x32xf32> to vector<16x32xf32>
    %583 = arith.mulf %581, %582 : vector<16x32xf32>
    %584 = vector.broadcast %543 : vector<1x32xf32> to vector<16x32xf32>
    %585 = arith.addf %583, %584 : vector<16x32xf32>
    %586 = vector.extract_strided_slice %585 {offsets = [0, 0], sizes = [8, 32], strides = [1, 1]} : vector<16x32xf32> to vector<8x32xf32>
    %587 = vector.extract_strided_slice %585 {offsets = [8, 0], sizes = [8, 32], strides = [1, 1]} : vector<16x32xf32> to vector<8x32xf32>
    %588 = tpu.concatenate %586, %587 in 1 : vector<8x32xf32>, vector<8x32xf32> -> vector<8x64xf32>
    %cst_336 = arith.constant dense<0.000000e+00> : vector<32x64xf32>
    %589 = tpu.matmul %545, %588, %cst_336 {dimension_numbers = #tpu.dot_dimension_numbers<[1], [0], [0], [1], [0, 0, 1, 1], [], []>} : vector<32x8xf32>, vector<8x64xf32>, vector<32x64xf32> -> vector<32x64xf32>
    %590 = vector.broadcast %547 : vector<32x1xf32> to vector<32x64xf32>
    %591 = arith.addf %589, %590 : vector<32x64xf32>
    %cst_337 = arith.constant 5.000000e-01 : f32
    %592 = vector.broadcast %cst_337 : f32 to vector<32x64xf32>
    %593 = arith.mulf %592, %591 : vector<32x64xf32>
    %cst_338 = arith.constant 4.471500e-02 : f32
    %594 = vector.broadcast %cst_338 : f32 to vector<32x64xf32>
    %595 = arith.mulf %594, %591 : vector<32x64xf32>
    %596 = arith.mulf %595, %591 : vector<32x64xf32>
    %597 = arith.mulf %596, %591 : vector<32x64xf32>
    %598 = arith.addf %591, %597 : vector<32x64xf32>
    %cst_339 = arith.constant 0.797884583 : f32
    %599 = vector.broadcast %cst_339 : f32 to vector<32x64xf32>
    %600 = arith.mulf %599, %598 : vector<32x64xf32>
    %601 = math.tanh %600 : vector<32x64xf32>
    %cst_340 = arith.constant 1.000000e+00 : f32
    %602 = vector.broadcast %cst_340 : f32 to vector<32x64xf32>
    %603 = arith.addf %602, %601 : vector<32x64xf32>
    %604 = arith.mulf %593, %603 : vector<32x64xf32>
    %cst_341 = arith.constant dense<0.000000e+00> : vector<8x64xf32>
    %605 = tpu.matmul %549, %604, %cst_341 {dimension_numbers = #tpu.dot_dimension_numbers<[1], [0], [0], [1], [0, 0, 1, 1], [], []>} : vector<8x32xf32>, vector<32x64xf32>, vector<8x64xf32> -> vector<8x64xf32>
    %606 = vector.broadcast %551 : vector<8x1xf32> to vector<8x64xf32>
    %607 = arith.addf %605, %606 : vector<8x64xf32>
    %608 = vector.extract_strided_slice %607 {offsets = [0, 0], sizes = [8, 32], strides = [1, 1]} : vector<8x64xf32> to vector<8x32xf32>
    %609 = vector.extract_strided_slice %607 {offsets = [0, 32], sizes = [8, 32], strides = [1, 1]} : vector<8x64xf32> to vector<8x32xf32>
    %610 = tpu.concatenate %608, %609 in 0 : vector<8x32xf32>, vector<8x32xf32> -> vector<16x32xf32>
    %611 = arith.addf %388, %610 : vector<16x32xf32>
    %cst_342 = arith.constant dense<0.000000e+00> : vector<16xf32>
    %612 = vector.multi_reduction <add>, %611, %cst_342 [1] : vector<16x32xf32> to vector<16xf32>
    %613 = vector.shape_cast %612 : vector<16xf32> to vector<16x1xf32>
    %cst_343 = arith.constant 3.200000e+01 : f32
    %614 = vector.broadcast %cst_343 : f32 to vector<16x1xf32>
    %615 = arith.divf %613, %614 : vector<16x1xf32>
    %616 = arith.mulf %611, %611 : vector<16x32xf32>
    %cst_344 = arith.constant dense<0.000000e+00> : vector<16xf32>
    %617 = vector.multi_reduction <add>, %616, %cst_344 [1] : vector<16x32xf32> to vector<16xf32>
    %618 = vector.shape_cast %617 : vector<16xf32> to vector<16x1xf32>
    %cst_345 = arith.constant 3.200000e+01 : f32
    %619 = vector.broadcast %cst_345 : f32 to vector<16x1xf32>
    %620 = arith.divf %618, %619 : vector<16x1xf32>
    %621 = arith.mulf %615, %615 : vector<16x1xf32>
    %622 = arith.subf %620, %621 : vector<16x1xf32>
    %623 = vector.broadcast %615 : vector<16x1xf32> to vector<16x32xf32>
    %624 = arith.subf %611, %623 : vector<16x32xf32>
    %cst_346 = arith.constant 9.99999974E-6 : f32
    %625 = vector.broadcast %cst_346 : f32 to vector<16x1xf32>
    %626 = arith.addf %622, %625 : vector<16x1xf32>
    %627 = math.rsqrt %626 : vector<16x1xf32>
    %628 = vector.broadcast %627 : vector<16x1xf32> to vector<16x32xf32>
    %629 = arith.mulf %624, %628 : vector<16x32xf32>
    %630 = vector.broadcast %553 : vector<1x32xf32> to vector<16x32xf32>
    %631 = arith.mulf %629, %630 : vector<16x32xf32>
    %632 = vector.broadcast %555 : vector<1x32xf32> to vector<16x32xf32>
    %633 = arith.addf %631, %632 : vector<16x32xf32>
    %cst_347 = arith.constant dense<0.000000e+00> : vector<16x128xf32>
    %634 = tpu.matmul %633, %557, %cst_347 {dimension_numbers = #tpu.dot_dimension_numbers<[1], [0], [0], [1], [0, 0, 1, 1], [], []>} : vector<16x32xf32>, vector<32x128xf32>, vector<16x128xf32> -> vector<16x128xf32>
    %635 = vector.broadcast %559 : vector<1x128xf32> to vector<16x128xf32>
    %636 = arith.addf %634, %635 : vector<16x128xf32>
    %cst_348 = arith.constant 5.000000e-01 : f32
    %637 = vector.broadcast %cst_348 : f32 to vector<16x128xf32>
    %638 = arith.mulf %637, %636 : vector<16x128xf32>
    %cst_349 = arith.constant 4.471500e-02 : f32
    %639 = vector.broadcast %cst_349 : f32 to vector<16x128xf32>
    %640 = arith.mulf %639, %636 : vector<16x128xf32>
    %641 = arith.mulf %640, %636 : vector<16x128xf32>
    %642 = arith.mulf %641, %636 : vector<16x128xf32>
    %643 = arith.addf %636, %642 : vector<16x128xf32>
    %cst_350 = arith.constant 0.797884583 : f32
    %644 = vector.broadcast %cst_350 : f32 to vector<16x128xf32>
    %645 = arith.mulf %644, %643 : vector<16x128xf32>
    %646 = math.tanh %645 : vector<16x128xf32>
    %cst_351 = arith.constant 1.000000e+00 : f32
    %647 = vector.broadcast %cst_351 : f32 to vector<16x128xf32>
    %648 = arith.addf %647, %646 : vector<16x128xf32>
    %649 = arith.mulf %638, %648 : vector<16x128xf32>
    %cst_352 = arith.constant dense<0.000000e+00> : vector<16x32xf32>
    %650 = tpu.matmul %649, %561, %cst_352 {dimension_numbers = #tpu.dot_dimension_numbers<[1], [0], [0], [1], [0, 0, 1, 1], [], []>} : vector<16x128xf32>, vector<128x32xf32>, vector<16x32xf32> -> vector<16x32xf32>
    %651 = arith.addf %611, %650 : vector<16x32xf32>
    %652 = vector.broadcast %563 : vector<1x32xf32> to vector<16x32xf32>
    %653 = arith.addf %651, %652 : vector<16x32xf32>
    %c1_353 = arith.constant 1 : index
    %c0_354 = arith.constant 0 : index
    %c0_355 = arith.constant 0 : index
    %654 = vector.load %arg45[%c1_353, %c0_354, %c0_355] : memref<2x1x32xf32, #tpu.memory_space<vmem>>, vector<1x1x32xf32>
    %655 = vector.shape_cast %654 : vector<1x1x32xf32> to vector<1x32xf32>
    %c1_356 = arith.constant 1 : index
    %c0_357 = arith.constant 0 : index
    %c0_358 = arith.constant 0 : index
    %656 = vector.load %arg46[%c1_356, %c0_357, %c0_358] : memref<2x1x32xf32, #tpu.memory_space<vmem>>, vector<1x1x32xf32>
    %657 = vector.shape_cast %656 : vector<1x1x32xf32> to vector<1x32xf32>
    %cst_359 = arith.constant dense<0.000000e+00> : vector<16xf32>
    %658 = vector.multi_reduction <add>, %653, %cst_359 [1] : vector<16x32xf32> to vector<16xf32>
    %659 = vector.shape_cast %658 : vector<16xf32> to vector<16x1xf32>
    %cst_360 = arith.constant 3.200000e+01 : f32
    %660 = vector.broadcast %cst_360 : f32 to vector<16x1xf32>
    %661 = arith.divf %659, %660 : vector<16x1xf32>
    %662 = arith.mulf %653, %653 : vector<16x32xf32>
    %cst_361 = arith.constant dense<0.000000e+00> : vector<16xf32>
    %663 = vector.multi_reduction <add>, %662, %cst_361 [1] : vector<16x32xf32> to vector<16xf32>
    %664 = vector.shape_cast %663 : vector<16xf32> to vector<16x1xf32>
    %cst_362 = arith.constant 3.200000e+01 : f32
    %665 = vector.broadcast %cst_362 : f32 to vector<16x1xf32>
    %666 = arith.divf %664, %665 : vector<16x1xf32>
    %667 = arith.mulf %661, %661 : vector<16x1xf32>
    %668 = arith.subf %666, %667 : vector<16x1xf32>
    %669 = vector.broadcast %661 : vector<16x1xf32> to vector<16x32xf32>
    %670 = arith.subf %653, %669 : vector<16x32xf32>
    %cst_363 = arith.constant 9.99999974E-6 : f32
    %671 = vector.broadcast %cst_363 : f32 to vector<16x1xf32>
    %672 = arith.addf %668, %671 : vector<16x1xf32>
    %673 = math.rsqrt %672 : vector<16x1xf32>
    %674 = vector.broadcast %673 : vector<16x1xf32> to vector<16x32xf32>
    %675 = arith.mulf %670, %674 : vector<16x32xf32>
    %676 = vector.broadcast %655 : vector<1x32xf32> to vector<16x32xf32>
    %677 = arith.mulf %675, %676 : vector<16x32xf32>
    %678 = vector.broadcast %657 : vector<1x32xf32> to vector<16x32xf32>
    %679 = arith.addf %677, %678 : vector<16x32xf32>
    %680 = vector.extract_strided_slice %679 {offsets = [0, 0], sizes = [8, 32], strides = [1, 1]} : vector<16x32xf32> to vector<8x32xf32>
    %cst_364 = arith.constant dense<0.000000e+00> : vector<32xf32>
    %681 = vector.multi_reduction <add>, %680, %cst_364 [0] : vector<8x32xf32> to vector<32xf32>
    %682 = vector.shape_cast %681 : vector<32xf32> to vector<1x32xf32>
    %cst_365 = arith.constant 8.000000e+00 : f32
    %683 = vector.broadcast %cst_365 : f32 to vector<1x32xf32>
    %684 = arith.divf %682, %683 : vector<1x32xf32>
    %685 = vector.extract_strided_slice %679 {offsets = [8, 0], sizes = [8, 32], strides = [1, 1]} : vector<16x32xf32> to vector<8x32xf32>
    %cst_366 = arith.constant dense<0.000000e+00> : vector<32xf32>
    %686 = vector.multi_reduction <add>, %685, %cst_366 [0] : vector<8x32xf32> to vector<32xf32>
    %687 = vector.shape_cast %686 : vector<32xf32> to vector<1x32xf32>
    %cst_367 = arith.constant 8.000000e+00 : f32
    %688 = vector.broadcast %cst_367 : f32 to vector<1x32xf32>
    %689 = arith.divf %687, %688 : vector<1x32xf32>
    %690 = tpu.concatenate %684, %689 in 0 : vector<1x32xf32>, vector<1x32xf32> -> vector<2x32xf32>
    %691 = tpu.concatenate %539, %690, %268 in 1 : vector<2x32xf32>, vector<2x32xf32>, vector<2x32xf32> -> vector<2x96xf32>
    %c0_368 = arith.constant 0 : index
    %c0_369 = arith.constant 0 : index
    %692 = vector.load %arg47[%c0_368, %c0_369] : memref<96x1xf32, #tpu.memory_space<vmem>>, vector<96x1xf32>
    %cst_370 = arith.constant dense<0.000000e+00> : vector<2x1xf32>
    %693 = tpu.matmul %691, %692, %cst_370 {dimension_numbers = #tpu.dot_dimension_numbers<[1], [0], [0], [1], [0, 0, 1, 1], [], []>} : vector<2x96xf32>, vector<96x1xf32>, vector<2x1xf32> -> vector<2x1xf32>
    %c0_371 = arith.constant 0 : index
    %c0_372 = arith.constant 0 : index
    %694 = vector.load %arg48[%c0_371, %c0_372] : memref<1x1xf32, #tpu.memory_space<vmem>>, vector<1x1xf32>
    %695 = vector.broadcast %694 : vector<1x1xf32> to vector<2x1xf32>
    %696 = arith.addf %693, %695 : vector<2x1xf32>
    %697 = arith.negf %696 : vector<2x1xf32>
    %698 = math.exp %697 : vector<2x1xf32>
    %cst_373 = arith.constant 1.000000e+00 : f32
    %699 = vector.broadcast %cst_373 : f32 to vector<2x1xf32>
    %700 = arith.addf %699, %698 : vector<2x1xf32>
    %701 = arith.divf %699, %700 : vector<2x1xf32>
    %c0_374 = arith.constant 0 : index
    %c0_375 = arith.constant 0 : index
    %702 = vector.load %arg49[%c0_374, %c0_375] : memref<2x1xf32, #tpu.memory_space<vmem>>, vector<2x1xf32>
    tpu.vector_store %arg49[%c0_374, %c0_375], %701 {strides = array<i32>} : memref<2x1xf32, #tpu.memory_space<vmem>>, vector<2x1xf32>,
    return
  }
  func.func @transform_0(%arg0: i32) -> (i32, i32) {
    %c0_i32 = arith.constant 0 : i32
    %c0_i32_0 = arith.constant 0 : i32
    %c0_i32_1 = arith.constant 0 : i32
    return %c0_i32, %c0_i32_0 : i32, i32
  }
  func.func @transform_1(%arg0: i32) -> (i32, i32) {
    %c0_i32 = arith.constant 0 : i32
    %c0_i32_0 = arith.constant 0 : i32
    %c0_i32_1 = arith.constant 0 : i32
    return %c0_i32, %c0_i32_0 : i32, i32
  }
  func.func @transform_2(%arg0: i32) -> (i32, i32) {
    %c0_i32 = arith.constant 0 : i32
    %c0_i32_0 = arith.constant 0 : i32
    %c0_i32_1 = arith.constant 0 : i32
    return %c0_i32, %c0_i32_0 : i32, i32
  }
  func.func @transform_3(%arg0: i32) -> (i32, i32) {
    %c0_i32 = arith.constant 0 : i32
    %c0_i32_0 = arith.constant 0 : i32
    %c0_i32_1 = arith.constant 0 : i32
    return %c0_i32, %c0_i32_0 : i32, i32
  }
  func.func @transform_4(%arg0: i32) -> (i32, i32, i32) {
    %c0_i32 = arith.constant 0 : i32
    %c0_i32_0 = arith.constant 0 : i32
    %c0_i32_1 = arith.constant 0 : i32
    %c0_i32_2 = arith.constant 0 : i32
    return %c0_i32, %c0_i32_0, %c0_i32_1 : i32, i32, i32
  }
  func.func @transform_5(%arg0: i32) -> (i32, i32, i32) {
    %c0_i32 = arith.constant 0 : i32
    %c0_i32_0 = arith.constant 0 : i32
    %c0_i32_1 = arith.constant 0 : i32
    %c0_i32_2 = arith.constant 0 : i32
    return %c0_i32, %c0_i32_0, %c0_i32_1 : i32, i32, i32
  }
  func.func @transform_6(%arg0: i32) -> (i32, i32, i32) {
    %c0_i32 = arith.constant 0 : i32
    %c0_i32_0 = arith.constant 0 : i32
    %c0_i32_1 = arith.constant 0 : i32
    %c0_i32_2 = arith.constant 0 : i32
    return %c0_i32, %c0_i32_0, %c0_i32_1 : i32, i32, i32
  }
  func.func @transform_7(%arg0: i32) -> (i32, i32, i32) {
    %c0_i32 = arith.constant 0 : i32
    %c0_i32_0 = arith.constant 0 : i32
    %c0_i32_1 = arith.constant 0 : i32
    %c0_i32_2 = arith.constant 0 : i32
    return %c0_i32, %c0_i32_0, %c0_i32_1 : i32, i32, i32
  }
  func.func @transform_8(%arg0: i32) -> (i32, i32, i32) {
    %c0_i32 = arith.constant 0 : i32
    %c0_i32_0 = arith.constant 0 : i32
    %c0_i32_1 = arith.constant 0 : i32
    %c0_i32_2 = arith.constant 0 : i32
    return %c0_i32, %c0_i32_0, %c0_i32_1 : i32, i32, i32
  }
  func.func @transform_9(%arg0: i32) -> (i32, i32, i32) {
    %c0_i32 = arith.constant 0 : i32
    %c0_i32_0 = arith.constant 0 : i32
    %c0_i32_1 = arith.constant 0 : i32
    %c0_i32_2 = arith.constant 0 : i32
    return %c0_i32, %c0_i32_0, %c0_i32_1 : i32, i32, i32
  }
  func.func @transform_10(%arg0: i32) -> (i32, i32, i32) {
    %c0_i32 = arith.constant 0 : i32
    %c0_i32_0 = arith.constant 0 : i32
    %c0_i32_1 = arith.constant 0 : i32
    %c0_i32_2 = arith.constant 0 : i32
    return %c0_i32, %c0_i32_0, %c0_i32_1 : i32, i32, i32
  }
  func.func @transform_11(%arg0: i32) -> (i32, i32, i32) {
    %c0_i32 = arith.constant 0 : i32
    %c0_i32_0 = arith.constant 0 : i32
    %c0_i32_1 = arith.constant 0 : i32
    %c0_i32_2 = arith.constant 0 : i32
    return %c0_i32, %c0_i32_0, %c0_i32_1 : i32, i32, i32
  }
  func.func @transform_12(%arg0: i32) -> (i32, i32, i32) {
    %c0_i32 = arith.constant 0 : i32
    %c0_i32_0 = arith.constant 0 : i32
    %c0_i32_1 = arith.constant 0 : i32
    %c0_i32_2 = arith.constant 0 : i32
    return %c0_i32, %c0_i32_0, %c0_i32_1 : i32, i32, i32
  }
  func.func @transform_13(%arg0: i32) -> (i32, i32, i32) {
    %c0_i32 = arith.constant 0 : i32
    %c0_i32_0 = arith.constant 0 : i32
    %c0_i32_1 = arith.constant 0 : i32
    %c0_i32_2 = arith.constant 0 : i32
    return %c0_i32, %c0_i32_0, %c0_i32_1 : i32, i32, i32
  }
  func.func @transform_14(%arg0: i32) -> (i32, i32, i32) {
    %c0_i32 = arith.constant 0 : i32
    %c0_i32_0 = arith.constant 0 : i32
    %c0_i32_1 = arith.constant 0 : i32
    %c0_i32_2 = arith.constant 0 : i32
    return %c0_i32, %c0_i32_0, %c0_i32_1 : i32, i32, i32
  }
  func.func @transform_15(%arg0: i32) -> (i32, i32, i32) {
    %c0_i32 = arith.constant 0 : i32
    %c0_i32_0 = arith.constant 0 : i32
    %c0_i32_1 = arith.constant 0 : i32
    %c0_i32_2 = arith.constant 0 : i32
    return %c0_i32, %c0_i32_0, %c0_i32_1 : i32, i32, i32
  }
  func.func @transform_16(%arg0: i32) -> (i32, i32) {
    %c0_i32 = arith.constant 0 : i32
    %c0_i32_0 = arith.constant 0 : i32
    %c0_i32_1 = arith.constant 0 : i32
    return %c0_i32, %c0_i32_0 : i32, i32
  }
  func.func @transform_17(%arg0: i32) -> (i32, i32) {
    %c0_i32 = arith.constant 0 : i32
    %c0_i32_0 = arith.constant 0 : i32
    %c0_i32_1 = arith.constant 0 : i32
    return %c0_i32, %c0_i32_0 : i32, i32
  }
  func.func @transform_18(%arg0: i32) -> (i32, i32) {
    %c0_i32 = arith.constant 0 : i32
    %c0_i32_0 = arith.constant 0 : i32
    %c0_i32_1 = arith.constant 0 : i32
    return %c0_i32, %c0_i32_0 : i32, i32
  }
  func.func @transform_19(%arg0: i32) -> (i32, i32) {
    %c0_i32 = arith.constant 0 : i32
    %c0_i32_0 = arith.constant 0 : i32
    %c0_i32_1 = arith.constant 0 : i32
    return %c0_i32, %c0_i32_0 : i32, i32
  }
  func.func @transform_20(%arg0: i32) -> (i32, i32, i32) {
    %c0_i32 = arith.constant 0 : i32
    %c0_i32_0 = arith.constant 0 : i32
    %c0_i32_1 = arith.constant 0 : i32
    %c0_i32_2 = arith.constant 0 : i32
    return %c0_i32, %c0_i32_0, %c0_i32_1 : i32, i32, i32
  }
  func.func @transform_21(%arg0: i32) -> (i32, i32, i32) {
    %c0_i32 = arith.constant 0 : i32
    %c0_i32_0 = arith.constant 0 : i32
    %c0_i32_1 = arith.constant 0 : i32
    %c0_i32_2 = arith.constant 0 : i32
    return %c0_i32, %c0_i32_0, %c0_i32_1 : i32, i32, i32
  }
  func.func @transform_22(%arg0: i32) -> (i32, i32, i32) {
    %c0_i32 = arith.constant 0 : i32
    %c0_i32_0 = arith.constant 0 : i32
    %c0_i32_1 = arith.constant 0 : i32
    %c0_i32_2 = arith.constant 0 : i32
    return %c0_i32, %c0_i32_0, %c0_i32_1 : i32, i32, i32
  }
  func.func @transform_23(%arg0: i32) -> (i32, i32, i32) {
    %c0_i32 = arith.constant 0 : i32
    %c0_i32_0 = arith.constant 0 : i32
    %c0_i32_1 = arith.constant 0 : i32
    %c0_i32_2 = arith.constant 0 : i32
    return %c0_i32, %c0_i32_0, %c0_i32_1 : i32, i32, i32
  }
  func.func @transform_24(%arg0: i32) -> (i32, i32, i32) {
    %c0_i32 = arith.constant 0 : i32
    %c0_i32_0 = arith.constant 0 : i32
    %c0_i32_1 = arith.constant 0 : i32
    %c0_i32_2 = arith.constant 0 : i32
    return %c0_i32, %c0_i32_0, %c0_i32_1 : i32, i32, i32
  }
  func.func @transform_25(%arg0: i32) -> (i32, i32, i32) {
    %c0_i32 = arith.constant 0 : i32
    %c0_i32_0 = arith.constant 0 : i32
    %c0_i32_1 = arith.constant 0 : i32
    %c0_i32_2 = arith.constant 0 : i32
    return %c0_i32, %c0_i32_0, %c0_i32_1 : i32, i32, i32
  }
  func.func @transform_26(%arg0: i32) -> (i32, i32, i32) {
    %c0_i32 = arith.constant 0 : i32
    %c0_i32_0 = arith.constant 0 : i32
    %c0_i32_1 = arith.constant 0 : i32
    %c0_i32_2 = arith.constant 0 : i32
    return %c0_i32, %c0_i32_0, %c0_i32_1 : i32, i32, i32
  }
  func.func @transform_27(%arg0: i32) -> (i32, i32, i32) {
    %c0_i32 = arith.constant 0 : i32
    %c0_i32_0 = arith.constant 0 : i32
    %c0_i32_1 = arith.constant 0 : i32
    %c0_i32_2 = arith.constant 0 : i32
    return %c0_i32, %c0_i32_0, %c0_i32_1 : i32, i32, i32
  }
  func.func @transform_28(%arg0: i32) -> (i32, i32, i32) {
    %c0_i32 = arith.constant 0 : i32
    %c0_i32_0 = arith.constant 0 : i32
    %c0_i32_1 = arith.constant 0 : i32
    %c0_i32_2 = arith.constant 0 : i32
    return %c0_i32, %c0_i32_0, %c0_i32_1 : i32, i32, i32
  }
  func.func @transform_29(%arg0: i32) -> (i32, i32, i32) {
    %c0_i32 = arith.constant 0 : i32
    %c0_i32_0 = arith.constant 0 : i32
    %c0_i32_1 = arith.constant 0 : i32
    %c0_i32_2 = arith.constant 0 : i32
    return %c0_i32, %c0_i32_0, %c0_i32_1 : i32, i32, i32
  }
  func.func @transform_30(%arg0: i32) -> (i32, i32, i32) {
    %c0_i32 = arith.constant 0 : i32
    %c0_i32_0 = arith.constant 0 : i32
    %c0_i32_1 = arith.constant 0 : i32
    %c0_i32_2 = arith.constant 0 : i32
    return %c0_i32, %c0_i32_0, %c0_i32_1 : i32, i32, i32
  }
  func.func @transform_31(%arg0: i32) -> (i32, i32, i32) {
    %c0_i32 = arith.constant 0 : i32
    %c0_i32_0 = arith.constant 0 : i32
    %c0_i32_1 = arith.constant 0 : i32
    %c0_i32_2 = arith.constant 0 : i32
    return %c0_i32, %c0_i32_0, %c0_i32_1 : i32, i32, i32
  }
  func.func @transform_32(%arg0: i32) -> (i32, i32, i32, i32) {
    %c0_i32 = arith.constant 0 : i32
    %c0_i32_0 = arith.constant 0 : i32
    %c0_i32_1 = arith.constant 0 : i32
    %c0_i32_2 = arith.constant 0 : i32
    %c0_i32_3 = arith.constant 0 : i32
    return %c0_i32, %c0_i32_0, %c0_i32_1, %c0_i32_2 : i32, i32, i32, i32
  }
  func.func @transform_33(%arg0: i32) -> (i32, i32, i32, i32) {
    %c0_i32 = arith.constant 0 : i32
    %c0_i32_0 = arith.constant 0 : i32
    %c0_i32_1 = arith.constant 0 : i32
    %c0_i32_2 = arith.constant 0 : i32
    %c0_i32_3 = arith.constant 0 : i32
    return %c0_i32, %c0_i32_0, %c0_i32_1, %c0_i32_2 : i32, i32, i32, i32
  }
  func.func @transform_34(%arg0: i32) -> (i32, i32, i32, i32) {
    %c0_i32 = arith.constant 0 : i32
    %c0_i32_0 = arith.constant 0 : i32
    %c0_i32_1 = arith.constant 0 : i32
    %c0_i32_2 = arith.constant 0 : i32
    %c0_i32_3 = arith.constant 0 : i32
    return %c0_i32, %c0_i32_0, %c0_i32_1, %c0_i32_2 : i32, i32, i32, i32
  }
  func.func @transform_35(%arg0: i32) -> (i32, i32, i32, i32) {
    %c0_i32 = arith.constant 0 : i32
    %c0_i32_0 = arith.constant 0 : i32
    %c0_i32_1 = arith.constant 0 : i32
    %c0_i32_2 = arith.constant 0 : i32
    %c0_i32_3 = arith.constant 0 : i32
    return %c0_i32, %c0_i32_0, %c0_i32_1, %c0_i32_2 : i32, i32, i32, i32
  }
  func.func @transform_36(%arg0: i32) -> (i32, i32, i32, i32) {
    %c0_i32 = arith.constant 0 : i32
    %c0_i32_0 = arith.constant 0 : i32
    %c0_i32_1 = arith.constant 0 : i32
    %c0_i32_2 = arith.constant 0 : i32
    %c0_i32_3 = arith.constant 0 : i32
    return %c0_i32, %c0_i32_0, %c0_i32_1, %c0_i32_2 : i32, i32, i32, i32
  }
  func.func @transform_37(%arg0: i32) -> (i32, i32, i32, i32) {
    %c0_i32 = arith.constant 0 : i32
    %c0_i32_0 = arith.constant 0 : i32
    %c0_i32_1 = arith.constant 0 : i32
    %c0_i32_2 = arith.constant 0 : i32
    %c0_i32_3 = arith.constant 0 : i32
    return %c0_i32, %c0_i32_0, %c0_i32_1, %c0_i32_2 : i32, i32, i32, i32
  }
  func.func @transform_38(%arg0: i32) -> (i32, i32, i32, i32) {
    %c0_i32 = arith.constant 0 : i32
    %c0_i32_0 = arith.constant 0 : i32
    %c0_i32_1 = arith.constant 0 : i32
    %c0_i32_2 = arith.constant 0 : i32
    %c0_i32_3 = arith.constant 0 : i32
    return %c0_i32, %c0_i32_0, %c0_i32_1, %c0_i32_2 : i32, i32, i32, i32
  }
  func.func @transform_39(%arg0: i32) -> (i32, i32, i32, i32) {
    %c0_i32 = arith.constant 0 : i32
    %c0_i32_0 = arith.constant 0 : i32
    %c0_i32_1 = arith.constant 0 : i32
    %c0_i32_2 = arith.constant 0 : i32
    %c0_i32_3 = arith.constant 0 : i32
    return %c0_i32, %c0_i32_0, %c0_i32_1, %c0_i32_2 : i32, i32, i32, i32
  }
  func.func @transform_40(%arg0: i32) -> (i32, i32, i32, i32) {
    %c0_i32 = arith.constant 0 : i32
    %c0_i32_0 = arith.constant 0 : i32
    %c0_i32_1 = arith.constant 0 : i32
    %c0_i32_2 = arith.constant 0 : i32
    %c0_i32_3 = arith.constant 0 : i32
    return %c0_i32, %c0_i32_0, %c0_i32_1, %c0_i32_2 : i32, i32, i32, i32
  }
  func.func @transform_41(%arg0: i32) -> (i32, i32, i32, i32) {
    %c0_i32 = arith.constant 0 : i32
    %c0_i32_0 = arith.constant 0 : i32
    %c0_i32_1 = arith.constant 0 : i32
    %c0_i32_2 = arith.constant 0 : i32
    %c0_i32_3 = arith.constant 0 : i32
    return %c0_i32, %c0_i32_0, %c0_i32_1, %c0_i32_2 : i32, i32, i32, i32
  }
  func.func @transform_42(%arg0: i32) -> (i32, i32, i32, i32) {
    %c0_i32 = arith.constant 0 : i32
    %c0_i32_0 = arith.constant 0 : i32
    %c0_i32_1 = arith.constant 0 : i32
    %c0_i32_2 = arith.constant 0 : i32
    %c0_i32_3 = arith.constant 0 : i32
    return %c0_i32, %c0_i32_0, %c0_i32_1, %c0_i32_2 : i32, i32, i32, i32
  }
  func.func @transform_43(%arg0: i32) -> (i32, i32, i32, i32) {
    %c0_i32 = arith.constant 0 : i32
    %c0_i32_0 = arith.constant 0 : i32
    %c0_i32_1 = arith.constant 0 : i32
    %c0_i32_2 = arith.constant 0 : i32
    %c0_i32_3 = arith.constant 0 : i32
    return %c0_i32, %c0_i32_0, %c0_i32_1, %c0_i32_2 : i32, i32, i32, i32
  }
  func.func @transform_44(%arg0: i32) -> (i32, i32, i32) {
    %c0_i32 = arith.constant 0 : i32
    %c0_i32_0 = arith.constant 0 : i32
    %c0_i32_1 = arith.constant 0 : i32
    %c0_i32_2 = arith.constant 0 : i32
    return %c0_i32, %c0_i32_0, %c0_i32_1 : i32, i32, i32
  }
  func.func @transform_45(%arg0: i32) -> (i32, i32, i32) {
    %c0_i32 = arith.constant 0 : i32
    %c0_i32_0 = arith.constant 0 : i32
    %c0_i32_1 = arith.constant 0 : i32
    %c0_i32_2 = arith.constant 0 : i32
    return %c0_i32, %c0_i32_0, %c0_i32_1 : i32, i32, i32
  }
  func.func @transform_46(%arg0: i32) -> (i32, i32) {
    %c0_i32 = arith.constant 0 : i32
    %c0_i32_0 = arith.constant 0 : i32
    %c0_i32_1 = arith.constant 0 : i32
    return %c0_i32, %c0_i32_0 : i32, i32
  }
  func.func @transform_47(%arg0: i32) -> (i32, i32) {
    %c0_i32 = arith.constant 0 : i32
    %c0_i32_0 = arith.constant 0 : i32
    %c0_i32_1 = arith.constant 0 : i32
    return %c0_i32, %c0_i32_0 : i32, i32
  }
  func.func @transform_48(%arg0: i32) -> (i32, i32) {
    %c0_i32 = arith.constant 0 : i32
    %c0_i32_0 = arith.constant 0 : i32
    %c0_i32_1 = arith.constant 0 : i32
    return %c0_i32, %c0_i32_0 : i32, i32
  }
}

</mosaic_0001>

<bundles_post_ra>
// kernel: tpu_custom_call.1
= control target key start
LH: loop header
LB: loop body
LE: loop exit
PB: predicated region body
PF: predicated region fallthrough
CT: control target
= control target key end

     0   :  { %s4703_s3 = smov 2   ;;  %vm213_vm0 = vcmask 261120   ;;  %s4704_s10 = smov 3   ;;  %vm403_vm1 = vcmask 64512   ;;  %v4708_v42 = vmov 0   ;;  %v4712_v57 = vmov 0.0|0.0   ;;  %s5521_s0 = inlined_call_operand.smem [shape: u32[49], index: -1, kind: input, shape index: {}] }
   0x1   :  { %s3501_s6 = sld [smem:[%s5521_s0 + %s4703_s3]]   ;;  %s4705_s14 = smov 6   ;;  %4589 = vset.pattern.permute.xlu1 %v4708_v42  ;;  %4590 = vset.pattern.permute.xlu0 %v4708_v42  ;;  %vm4713_vm2 = vmmov 0   ;;  %v4714_v58 = vmov 0.0   ;;  %vm1494_vm3 = vcmask 1040384   ;;  %vm3393_vm4 = vcmask 523264  }
   0x2   :  { %s1_s9 = sld [smem:[%s5521_s0]]   ;;  %s4706_s18 = smov 4   ;;  %vm3414_vm5 = vcmask 785408   ;;  %vm3494_vm6 = vcmask 1024  }
   0x3   :  { %s3502_s13 = sld [smem:[%s5521_s0 + %s4704_s10]]   ;;  %s4707_s22 = smov 5  }
   0x4   :  { %s4790_s17 = sld [smem:[%s5521_s0 + %s4705_s14]]   ;;  %s4709_s26 = smov 7  }
   0x5   :  { %s4795_s21 = sld [smem:[%s5521_s0 + %s4706_s18]]   ;;  %s4710_s30 = smov 32  }
   0x6   :  { %s4800_s25 = sld [smem:[%s5521_s0 + %s4707_s22]]   ;;  %s4711_s1 = smov 9  }
   0x7   :  { %v202_v0 = vld [vmem:[%s3501_s6] sm:$0xff]  ;;  %v203_v1 = vld [vmem:[%s3501_s6 + $0x8] sm:$0xff]  ;;  %v204_v2 = vld [vmem:[%s3501_s6 + $0x10] sm:$0xff]  ;;  %s4811_s29 = sld [smem:[%s5521_s0 + %s4709_s26]]   ;;  %s4715_s5 = smov 8  }
   0x8   :  { %v4271_v3 = vpack.c.bf16 %v203_v1, %v202_v0  ;;  %v205_v4 = vld [vmem:[%s3501_s6 + $0x18] sm:$0xff]  ;;  %v200_v5 = vld [vmem:[%s1_s9] sm:$0xff]  ;;  %v201_v7 = vld [vmem:[%s1_s9 + $0x8] sm:$0xff]  ;;  %s4820_s4 = sld [smem:[%s5521_s0 + %s4711_s1]]   ;;  %s4716_s9 = smov 96  }
   0x9   :  { %v4275_v6 = vpack.c.bf16 %v205_v4, %v204_v2  ;;  %3905 = vmatprep.mubr.msk.f32.mxu0 %vm213_vm0, %v200_v5  ;;  %v3548_v8 = vld [vmem:[%s3502_s13] ss:$0 sm:$0xff]  ;;  %s4837_s8 = sld [smem:[%s5521_s0 + %s4715_s5]]   ;;  %s4717_s10 = smov 12  }
   0xa   :  { %4272 = vmatprep.subr.bf16.mxu0 %v4271_v3  ;;  %v297_v33 = vld [vmem:[%s4790_s17] sm:$0xff]  ;;  %v298_v54 = vld [vmem:[%s4790_s17 + $0x8] sm:$0xff]  ;;  %v299_v55 = vld [vmem:[%s4790_s17 + $0x10] sm:$0xff]  ;;  %s4862_s13 = sld [smem:[%s5521_s0 + %s4717_s10]]   ;;  %s4718_s14 = smov 10  }
   0xb   :  { %4274 = vmatpush3.bf16.msra.mxu0 %v4271_v3  ;;  %3910 = vmatprep.mubr.msk.f32.mxu1 %vm403_vm1, %v297_v33  ;;  %v3551_v37 = vld [vmem:[%s4795_s21] ss:$0 sm:$0xff]  ;;  %v300_v56 = vld [vmem:[%s4790_s17 + $0x18] sm:$0xff]  ;;  %s4872_s18 = sld [smem:[%s5521_s0 + %s4718_s14]]   ;;  %s4719_s19 = smov 14  }
   0xc   :  { %4276 = vmatprep.subr.bf16.mxu0 %v4275_v6  ;;  %v3552_v40 = vld [vmem:[%s4800_s25] ss:$0 sm:$0xff]  ;;  %s4877_s23 = sld [smem:[%s5521_s0 + %s4719_s19]]   ;;  %s4720_s24 = smov 11  }
   0xd   :  { %v301_v47 = vld [vmem:[%s4811_s29] sm:$0xff]  ;;  %v304_v48 = vld [vmem:[%s4811_s29 + $0x18] sm:$0xff]  ;;  %v302_v49 = vld [vmem:[%s4811_s29 + $0x8] sm:$0xff]  ;;  %s4882_s28 = sld [smem:[%s5521_s0 + %s4720_s24]]   ;;  %s4721_s1 = smov 13  }
   0xe   :  { %v303_v50 = vld [vmem:[%s4811_s29 + $0x10] sm:$0xff]  ;;  %v306_v51 = vld [vmem:[%s4820_s4] sm:$0xff]  ;;  %s4911_s5 = sld [smem:[%s5521_s0 + %s4721_s1]]   ;;  %s4722_s6 = smov 15  }
   0xf   :  { %4278 = vmatpush3.bf16.msra.mxu0 %v4275_v6  ;;  %s4917_s11 = sld [smem:[%s5521_s0 + %s4722_s6]]   ;;  %s4723_s12 = smov 23  }
  0x10   :  { %s4948_s15 = sld [smem:[%s5521_s0 + %s4723_s12]]   ;;  %s4725_s22 = smov 1  }
  0x11   :  { %s3500_s27 = sld [smem:[%s5521_s0 + %s4725_s22]]   ;;  %s4728_s12 = smov 20  }
  0x12   :  { %3906 = vmatmul.mubr.msk.f32.vlgmr.msra.gmra.mrb[0].mxu0 %vm213_vm0, %v201_v7  ;;  %s4729_s16 = smov 21   ;;  %s4730_s24 = smov 25  }
  0x13   :  { %s3520_s22 = sld [smem:[%s5521_s0 + %s4729_s16]]   ;;  %s4737_s26 = smov 31  }
  0xe5   :  { %v3907_v9 = vpop.f32.mrb[0].mxu0 }
  0xe6   :  { %v4773_v10 = vadd.f32 %v3907_v9, %v3548_v8  ;;  %v286_v11 = vpop.f32.mrb[1].mxu0 }
  0xe7   :  { %v4775_v12 = vadd.f32 %v3548_v8, %v286_v11 }
  0xe8   :  { %v334_v13 = vsel %vm213_vm0, %v4773_v10, 0.0  ;;  %v341_v14 = vmul.f32 %v4773_v10, %v4773_v10 }
  0xe9   :  { %335 = vadd.xlane.f32.xlu0 %v334_v13  ;;  %v331_v15 = vsel %vm213_vm0, %v4775_v12, 0.0  ;;  %v340_v16 = vmul.f32 %v4775_v12, %v4775_v12 }
  0xea   :  { %332 = vadd.xlane.f32.xlu1 %v331_v15  ;;  %v345_v17 = vsel %vm213_vm0, %v341_v14, 0.0 }
  0xeb   :  { %v342_v18 = vsel %vm213_vm0, %v340_v16, 0.0 }
  0xed   :  { %346 = vadd.xlane.f32.xlu0 %v345_v17 }
  0xee   :  { %343 = vadd.xlane.f32.xlu1 %v342_v18 }
  0xff   :  { %385 = vperm.xlu1 %4589, %v301_v47   ;;  %v305_v47 = vld [vmem:[%s4837_s8] sm:$0xff] }
 0x103   :  { %390 = vperm.xlu1 %4589, %v302_v49  }
 0x107   :  { %395 = vperm.xlu1 %4589, %v303_v50  }
 0x10b   :  { %539 = vperm.xlu1 %4589, %v306_v51  }
 0x176   :  { %v336_v19 = vpop.xlane.xlu0 %335 }
 0x177   :  { %v339_v20 = vmul.f32 0.03125, %v336_v19  ;;  %v333_v21 = vpop.xlane.xlu1 %332 }
 0x178   :  { %v338_v22 = vmul.f32 0.03125, %v333_v21 }
 0x179   :  { %v351_v24 = vmul.f32 %v339_v20, %v339_v20  ;;  %v355_v34 = vsub.f32 %v4773_v10, %v339_v20 }
 0x17a   :  { %v347_v23 = vpop.xlane.xlu0 %346  ;;  %v350_v27 = vmul.f32 %v338_v22, %v338_v22  ;;  %v354_v36 = vsub.f32 %v4775_v12, %v338_v22 }
 0x17b   :  { %v349_v25 = vmul.f32 0.03125, %v347_v23  ;;  %v344_v26 = vpop.xlane.xlu1 %343 }
 0x17c   :  { %v348_v28 = vmul.f32 0.03125, %v344_v26 }
 0x17d   :  { %v353_v29 = vsub.f32 %v349_v25, %v351_v24 }
 0x17e   :  { %v352_v30 = vsub.f32 %v348_v28, %v350_v27 }
 0x17f   :  { %v357_v31 = vadd.f32 1e-05, %v353_v29  ;;  %v386_v59 = vpop.permute.xlu1 %385 }
 0x180   :  { %v356_v32 = vadd.f32 1e-05, %v352_v30 }
 0x181   :  { %4591 = vrsqrt.f32 %v357_v31 }
 0x182   :  { %4593 = vrsqrt.f32 %v356_v32 }
 0x183   :  { %v391_v60 = vpop.permute.xlu1 %390 }
 0x187   :  { %v396_v5 = vpop.permute.xlu1 %395 }
 0x18b   :  { %v4592_v35 = vpop.eup %4591 }
 0x18c   :  { %v4594_v38 = vpop.eup %4593  ;;  %v361_v39 = vmul.f32 %v4592_v35, %v355_v34 }
 0x18d   :  { %v360_v41 = vmul.f32 %v4594_v38, %v354_v36 }
 0x18e   :  { %v369_v43 = vmul.f32 %v3551_v37, %v361_v39 }
 0x18f   :  { %v368_v44 = vmul.f32 %v3551_v37, %v360_v41 }
 0x190   :  { %v377_v45 = vadd.f32 %v3552_v40, %v369_v43 }
 0x191   :  { %v376_v46 = vadd.f32 %v3552_v40, %v368_v44 }
 0x192   :  { %379 = vrot.lane.b32.xlu0 %v377_v45, %s4710_s30 }
 0x196   :  { %400 = vperm.xlu0 %4590, %v304_v48   ;;  %v540_v48 = vpop.permute.xlu1 %539 }
 0x204   :  { %v380_v52 = vpop.permute.xlu0 %379 }
 0x205   :  { %v382_v53 = vsel %vm213_vm0, %v376_v46, %v380_v52 }
 0x206   :  { %3908 = vmatprep.subr.mxu1 %v382_v53 }
 0x207   :  { %3909 = vmatpush3.msra.mxu1 %v382_v53 }
 0x208   :  { %3911 = vmatmul.mubr.msk.f32.vlgmr.msra.gmra.mrb[0].mxu1 %vm403_vm1, %v298_v54  ;;  %4279 = vmatprep.subr.bf16.mxu1 %v4712_v57 }
 0x209   :  { %3913 = vmatprep.mubr.msk.f32.mxu1 %vm403_vm1, %v299_v55 }
 0x20c   :  { %3914 = vmatmul.mubr.msk.f32.gmra.mrb[2].mxu1 %vm403_vm1, %v300_v56 }
 0x20d   :  { %3924 = vmatprep.mubr.msk.f32.mxu1 %vm4713_vm2, %v4714_v58 }
 0x215   :  { %v401_v1 = vpop.permute.xlu0 %400 }
 0x2db   :  { %v3912_v61 = vpop.f32.mrb[0].mxu1 }
 0x2dc   :  { %v488_v62 = vadd.f32 %v3912_v61, %v391_v60  ;;  %v482_v63 = vpop.f32.mrb[1].mxu1 }
 0x2dd   :  { %v483_v0 = vadd.f32 %v482_v63, %v386_v59  ;;  %v309_v63 = vld [vmem:[%s4862_s13] sm:$0xff] }
 0x2de   :  { %v506_v2 = vmul.f32 0.044715, %v488_v62  ;;  %v502_v31 = vmul.f32 0.5, %v488_v62 }
 0x2df   :  { %v505_v3 = vmul.f32 0.044715, %v483_v0  ;;  %v3915_v4 = vpop.f32.mrb[2].mxu1  ;;  %v501_v33 = vmul.f32 0.5, %v483_v0 }
 0x2e0   :  { %v510_v6 = vmul.f32 %v506_v2, %v488_v62  ;;  %v498_v7 = vadd.f32 %v3915_v4, %v401_v1  ;;  %v492_v8 = vpop.f32.mrb[3].mxu1 }
 0x2e1   :  { %v509_v9 = vmul.f32 %v505_v3, %v483_v0  ;;  %v493_v11 = vadd.f32 %v492_v8, %v396_v5  ;;  %v311_v5 = vld [vmem:[%s4862_s13 + $0x10] sm:$0xff] }
 0x2e2   :  { %v514_v13 = vmul.f32 %v510_v6, %v488_v62  ;;  %v508_v14 = vmul.f32 0.044715, %v498_v7  ;;  %v504_v39 = vmul.f32 0.5, %v498_v7  ;;  %v312_v6 = vld [vmem:[%s4862_s13 + $0x18] sm:$0xff] }
 0x2e3   :  { %v513_v15 = vmul.f32 %v509_v9, %v483_v0  ;;  %v507_v16 = vmul.f32 0.044715, %v493_v11  ;;  %v503_v42 = vmul.f32 0.5, %v493_v11  ;;  %v4289_v8 = vpack.c.bf16 %v312_v6, %v311_v5 }
 0x2e4   :  { %v518_v17 = vadd.f32 %v514_v13, %v488_v62  ;;  %v512_v18 = vmul.f32 %v508_v14, %v498_v7  ;;  %v314_v13 = vld [vmem:[%s4877_s23] sm:$0xff]  ;;  %v315_v14 = vld [vmem:[%s4877_s23 + $0x8] sm:$0xff] }
 0x2e5   :  { %v517_v19 = vadd.f32 %v513_v15, %v483_v0  ;;  %v511_v20 = vmul.f32 %v507_v16, %v493_v11  ;;  %v310_v0 = vld [vmem:[%s4862_s13 + $0x8] sm:$0xff]  ;;  %v3558_v16 = vld [vmem:[%s4872_s18] ss:$0 sm:$0xff] }
 0x2e6   :  { %v522_v21 = vmul.f32 0.7978846, %v518_v17  ;;  %v516_v22 = vmul.f32 %v512_v18, %v498_v7  ;;  %v4285_v1 = vpack.c.bf16 %v310_v0, %v309_v63  ;;  %v4293_v17 = vpack.c.bf16 %v315_v14, %v314_v13 }
 0x2e7   :  { %v521_v23 = vmul.f32 0.7978846, %v517_v19  ;;  %v515_v24 = vmul.f32 %v511_v20, %v493_v11  ;;  %v3559_v19 = vld [vmem:[%s4882_s28] ss:$0 sm:$0xff] }
 0x2e8   :  { %4595 = vtanh.f32 %v522_v21  ;;  %v520_v25 = vadd.f32 %v516_v22, %v498_v7  ;;  %4286 = vmatprep.subr.bf16.mxu0 %v4285_v1 }
 0x2e9   :  { %4597 = vtanh.f32 %v521_v23  ;;  %v519_v26 = vadd.f32 %v515_v24, %v493_v11  ;;  %4288 = vmatpush3.bf16.msra.mxu0 %v4285_v1 }
 0x2ea   :  { %v524_v27 = vmul.f32 0.7978846, %v520_v25  ;;  %4290 = vmatprep.subr.bf16.mxu0 %v4289_v8 }
 0x2eb   :  { %v523_v28 = vmul.f32 0.7978846, %v519_v26 }
 0x2ec   :  { %4599 = vtanh.f32 %v524_v27 }
 0x2ed   :  { %4601 = vtanh.f32 %v523_v28  ;;  %4292 = vmatpush3.bf16.msra.mxu0 %v4289_v8 }
 0x2ee   :  { %4325 = vmatprep.subr.bf16.mxu0 %v4712_v57 }
 0x2f2   :  { %v4596_v29 = vpop.eup %4595 }
 0x2f3   :  { %v4598_v30 = vpop.eup %4597  ;;  %v530_v32 = vadd.f32 1.0, %v4596_v29 }
 0x2f4   :  { %v529_v34 = vadd.f32 1.0, %v4598_v30 }
 0x2f5   :  { %v534_v35 = vmul.f32 %v530_v32, %v502_v31 }
 0x2f6   :  { %v4600_v36 = vpop.eup %4599  ;;  %v533_v37 = vmul.f32 %v529_v34, %v501_v33  ;;  %v316_v34 = vld [vmem:[%s4877_s23 + $0x10] sm:$0xff] }
 0x2f7   :  { %v4602_v38 = vpop.eup %4601  ;;  %v532_v40 = vadd.f32 1.0, %v4600_v36 }
 0x2f8   :  { %v4280_v41 = vpack.c.bf16 %v534_v35, %v533_v37  ;;  %v531_v43 = vadd.f32 1.0, %v4602_v38  ;;  %v317_v35 = vld [vmem:[%s4877_s23 + $0x18] sm:$0xff]  ;;  %v318_v37 = vld [vmem:[%s4877_s23 + $0x20] sm:$0xff]  ;;  %v319_v38 = vld [vmem:[%s4877_s23 + $0x28] sm:$0xff] }
 0x2f9   :  { %v536_v44 = vmul.f32 %v532_v40, %v504_v39  ;;  %v4297_v36 = vpack.c.bf16 %v317_v35, %v316_v34  ;;  %v4301_v39 = vpack.c.bf16 %v319_v38, %v318_v37  ;;  %v320_v40 = vld [vmem:[%s4877_s23 + $0x30] sm:$0xff] }
 0x2fa   :  { %4281 = vmatpush3.bf16.msra.mxu1 %v4280_v41  ;;  %v535_v45 = vmul.f32 %v531_v43, %v503_v42  ;;  %v321_v41 = vld [vmem:[%s4877_s23 + $0x38] sm:$0xff]  ;;  %v322_v43 = vld [vmem:[%s4877_s23 + $0x40] sm:$0xff] }
 0x2fb   :  { %4282 = vmatprep.subr.bf16.mxu1 %v4712_v57  ;;  %v4305_v42 = vpack.c.bf16 %v321_v41, %v320_v40 }
 0x2fc   :  { %v4283_v46 = vpack.c.bf16 %v536_v44, %v535_v45  ;;  %v323_v44 = vld [vmem:[%s4877_s23 + $0x48] sm:$0xff]  ;;  %v324_v45 = vld [vmem:[%s4877_s23 + $0x50] sm:$0xff] }
 0x2fe   :  { %4284 = vmatpush3.bf16.msra.mxu1 %v4283_v46  ;;  %v4309_v46 = vpack.c.bf16 %v323_v44, %v322_v43  ;;  %v3566_v43 = vld [vmem:[%s4790_s17 + $0x20] sm:$0xff] }
 0x2ff   :  { %4294 = vmatprep.subr.bf16.mxu1 %v4293_v17 }
 0x301   :  { %3925 = vmatmul.mubr.msk.f32.vlgmr.msra.gmra.mrb[4].mxu1 %vm213_vm0, %v305_v47  ;;  %v325_v47 = vld [vmem:[%s4877_s23 + $0x58] sm:$0xff] }
 0x302   :  { %4296 = vmatpush3.bf16.msra.mxu1 %v4293_v17 }
 0x303   :  { %4298 = vmatprep.subr.bf16.mxu1 %v4297_v36 }
 0x306   :  { %4300 = vmatpush3.bf16.msra.mxu1 %v4297_v36 }
 0x307   :  { %4302 = vmatprep.subr.bf16.mxu1 %v4301_v39 }
 0x30a   :  { %4304 = vmatpush3.bf16.msra.mxu1 %v4301_v39 }
 0x30b   :  { %4306 = vmatprep.subr.bf16.mxu1 %v4305_v42 }
 0x30e   :  { %4308 = vmatpush3.bf16.msra.mxu1 %v4305_v42 }
 0x30f   :  { %4310 = vmatprep.subr.bf16.mxu1 %v4309_v46 }
 0x312   :  { %4312 = vmatpush3.bf16.msra.mxu1 %v4309_v46  ;;  %v3600_v46 = vld [vmem:[%s4795_s21 + $0x1] ss:$0 sm:$0xff] }
 0x3d4   :  { %v611_v49 = vpop.f32.mrb[4].mxu1 }
 0x3d5   :  { %v612_v50 = vadd.f32 %v611_v49, %v540_v48  ;;  %v3926_v51 = vpop.f32.mrb[5].mxu1  ;;  %v4313_v48 = vpack.c.bf16 %v325_v47, %v324_v45  ;;  %v326_v49 = vld [vmem:[%s4877_s23 + $0x60] sm:$0xff] }
 0x3d7   :  { %v4843_v52 = vadd.f32 %v612_v50, %v4775_v12  ;;  %616 = vrot.lane.b32.xlu1 %v612_v50, %s4716_s9  ;;  %v327_v50 = vld [vmem:[%s4877_s23 + $0x68] sm:$0xff]  ;;  %4314 = vmatprep.subr.bf16.mxu1 %v4313_v48 }
 0x3d8   :  { %v4317_v51 = vpack.c.bf16 %v327_v50, %v326_v49  ;;  %4316 = vmatpush3.bf16.msra.mxu1 %v4313_v48  ;;  %v3601_v48 = vld [vmem:[%s4800_s25 + $0x1] ss:$0 sm:$0xff]  ;;  %s4724_s25 = smov 18  }
 0x3d9   :  { %v621_v53 = vsel %vm213_vm0, %v4843_v52, 0.0  ;;  %v629_v54 = vmul.f32 %v4843_v52, %v4843_v52  ;;  %s3517_s20 = sld [smem:[%s5521_s0 + %s4724_s25]]  }
 0x3da   :  { %622 = vadd.xlane.f32.xlu0 %v621_v53  ;;  %v328_v53 = vld [vmem:[%s4877_s23 + $0x70] sm:$0xff]  ;;  %4318 = vmatprep.subr.bf16.mxu1 %v4317_v51  ;;  %s3519_s25 = sld [smem:[%s5521_s0 + %s4728_s12]]  }
 0x3db   :  { %v631_v55 = vsel %vm213_vm0, %v629_v54, 0.0  ;;  %v329_v54 = vld [vmem:[%s4877_s23 + $0x78] sm:$0xff] }
 0x3dc   :  { %4320 = vmatpush3.bf16.msra.mxu1 %v4317_v51 }
 0x3de   :  { %632 = vadd.xlane.f32.xlu0 %v631_v55  ;;  %v4321_v55 = vpack.c.bf16 %v329_v54, %v328_v53 }
 0x3e0   :  { %4322 = vmatprep.subr.bf16.mxu1 %v4321_v55 }
 0x3e1   :  { %4324 = vmatpush3.bf16.msra.mxu1 %v4321_v55 }
 0x449   :  { %v617_v56 = vpop.permute.xlu1 %616 }
 0x44a   :  { %v4852_v59 = vadd.f32 %v617_v56, %v4773_v10  ;;  %v3560_v56 = vld [vmem:[%s4911_s5] ss:$0 sm:$0xff] }
 0x44c   :  { %v624_v12 = vsel %vm213_vm0, %v4852_v59, 0.0  ;;  %v630_v60 = vmul.f32 %v4852_v59, %v4852_v59 }
 0x44d   :  { %625 = vadd.xlane.f32.xlu1 %v624_v12 }
 0x44e   :  { %v634_v61 = vsel %vm213_vm0, %v630_v60, 0.0 }
 0x44f   :  { %635 = vadd.xlane.f32.xlu0 %v634_v61 }
 0x467   :  { %v623_v10 = vpop.xlane.xlu0 %622 }
 0x468   :  { %v627_v62 = vmul.f32 0.03125, %v623_v10 }
 0x46a   :  { %v639_v3 = vmul.f32 %v627_v62, %v627_v62  ;;  %v643_v11 = vsub.f32 %v4843_v52, %v627_v62 }
 0x46b   :  { %v633_v2 = vpop.xlane.xlu0 %632 }
 0x46c   :  { %v637_v4 = vmul.f32 0.03125, %v633_v2 }
 0x46e   :  { %v641_v7 = vsub.f32 %v637_v4, %v639_v3 }
 0x470   :  { %v645_v9 = vadd.f32 1e-05, %v641_v7 }
 0x472   :  { %4603 = vrsqrt.f32 %v645_v9 }
 0x47c   :  { %v4604_v15 = vpop.eup %4603 }
 0x47d   :  { %v649_v18 = vmul.f32 %v4604_v15, %v643_v11 }
 0x47f   :  { %v657_v20 = vmul.f32 %v3558_v16, %v649_v18  ;;  %v3563_v18 = vld [vmem:[%s4917_s11] ss:$0 sm:$0xff] }
 0x481   :  { %v665_v21 = vadd.f32 %v3559_v19, %v657_v20 }
 0x483   :  { %3935 = vmatprep.mubr.msk.f32.mxu0 %vm213_vm0, %v665_v21 }
 0x4da   :  { %v626_v22 = vpop.xlane.xlu1 %625 }
 0x4db   :  { %v628_v23 = vmul.f32 0.03125, %v626_v22 }
 0x4dc   :  { %v636_v24 = vpop.xlane.xlu0 %635 }
 0x4dd   :  { %v640_v25 = vmul.f32 %v628_v23, %v628_v23  ;;  %v638_v26 = vmul.f32 0.03125, %v636_v24  ;;  %v644_v29 = vsub.f32 %v4852_v59, %v628_v23 }
 0x4df   :  { %v642_v27 = vsub.f32 %v638_v26, %v640_v25 }
 0x4e1   :  { %v646_v28 = vadd.f32 1e-05, %v642_v27 }
 0x4e3   :  { %4605 = vrsqrt.f32 %v646_v28 }
 0x4ed   :  { %v4606_v30 = vpop.eup %4605 }
 0x4ee   :  { %v650_v31 = vmul.f32 %v4606_v30, %v644_v29 }
 0x4f0   :  { %v658_v32 = vmul.f32 %v3558_v16, %v650_v31 }
 0x4f2   :  { %v666_v33 = vadd.f32 %v3559_v19, %v658_v32 }
 0x4f4   :  { %3936 = vmatmul.mubr.msk.f32.vlgmr.msra.gmra.mrb[2].mxu0 %vm213_vm0, %v666_v33 }
 0x4f5   :  { %3989 = vmatprep.mubr.msk.f32.mxu0 %vm4713_vm2, %v4714_v58 }
 0x5c7   :  { %v3937_v12 = vpop.f32.mrb[2].mxu0 }
 0x5c8   :  { %v751_v60 = vadd.f32 %v3937_v12, %v3560_v56  ;;  %v745_v61 = vpop.f32.mrb[3].mxu0 }
 0x5c9   :  { %v746_v10 = vadd.f32 %v3560_v56, %v745_v61  ;;  %v3570_v56 = vld [vmem:[%s4811_s29 + $0x20] sm:$0xff]  ;;  %v3572_v61 = vld [vmem:[%s4811_s29 + $0x30] sm:$0xff] }
 0x5ca   :  { %v757_v62 = vmul.f32 0.044715, %v751_v60  ;;  %v755_v15 = vmul.f32 0.5, %v751_v60 }
 0x5cb   :  { %v756_v63 = vmul.f32 0.044715, %v746_v10  ;;  %v754_v13 = vmul.f32 0.5, %v746_v10 }
 0x5cc   :  { %v759_v0 = vmul.f32 %v757_v62, %v751_v60  ;;  %v1598_v62 = vld [vmem:[%s4948_s15 + $0x10] sm:$0xff] }
 0x5cd   :  { %v758_v1 = vmul.f32 %v756_v63, %v746_v10  ;;  %v3575_v63 = vld [vmem:[%s4820_s4 + $0x8] sm:$0xff]  ;;  %s4726_s4 = smov 19  }
 0x5ce   :  { %v761_v2 = vmul.f32 %v759_v0, %v751_v60  ;;  %v1498_v0 = vld [vmem:[%s3517_s20] sm:$0xff]  ;;  %s3518_s3 = sld [smem:[%s5521_s0 + %s4726_s4]]  }
 0x5cf   :  { %v760_v3 = vmul.f32 %v758_v1, %v746_v10  ;;  %v1499_v1 = vld [vmem:[%s3517_s20 + $0x8] sm:$0xff]  ;;  %s3524_s4 = sld [smem:[%s5521_s0 + %s4730_s24]]  }
 0x5d0   :  { %v763_v4 = vadd.f32 %v761_v2, %v751_v60  ;;  %v3571_v60 = vld [vmem:[%s4811_s29 + $0x28] sm:$0xff]  ;;  %v1500_v2 = vld [vmem:[%s3517_s20 + $0x10] sm:$0xff] }
 0x5d1   :  { %v762_v5 = vadd.f32 %v760_v3, %v746_v10  ;;  %v1596_v10 = vld [vmem:[%s4948_s15] sm:$0xff]  ;;  %v1501_v3 = vld [vmem:[%s3517_s20 + $0x18] sm:$0xff] }
 0x5d2   :  { %v765_v6 = vmul.f32 0.7978846, %v763_v4 }
 0x5d3   :  { %v764_v7 = vmul.f32 0.7978846, %v762_v5  ;;  %v4371_v5 = vpack.c.bf16 %v1499_v1, %v1498_v0 }
 0x5d4   :  { %4607 = vtanh.f32 %v765_v6 }
 0x5d5   :  { %4609 = vtanh.f32 %v764_v7  ;;  %v3567_v7 = vld [vmem:[%s4790_s17 + $0x28] sm:$0xff] }
 0x5de   :  { %v4608_v8 = vpop.eup %4607 }
 0x5df   :  { %v4610_v9 = vpop.eup %4609  ;;  %v769_v11 = vadd.f32 1.0, %v4608_v8  ;;  %v3568_v8 = vld [vmem:[%s4790_s17 + $0x30] sm:$0xff] }
 0x5e0   :  { %v768_v14 = vadd.f32 1.0, %v4610_v9  ;;  %v4375_v9 = vpack.c.bf16 %v1501_v3, %v1500_v2 }
 0x5e1   :  { %v771_v17 = vmul.f32 %v769_v11, %v755_v15  ;;  %v3569_v11 = vld [vmem:[%s4790_s17 + $0x38] sm:$0xff]  ;;  %s4727_s17 = smov 22  }
 0x5e2   :  { %v770_v16 = vmul.f32 %v768_v14, %v754_v13  ;;  %v1496_v13 = vld [vmem:[%s3500_s27] sm:$0xff]  ;;  %v1497_v14 = vld [vmem:[%s3500_s27 + $0x8] sm:$0xff]  ;;  %s4994_s10 = sld [smem:[%s5521_s0 + %s4727_s17]]  }
 0x5e4   :  { %3970 = vmatprep.mubr.f32.mxu1 %v770_v16 }
 0x5e5   :  { %3971 = vmatmul.mubr.f32.vlgmr.msra.gmra.mrb[6].mxu1 %v771_v17 }
 0x5e6   :  { %3975 = vmatprep.mubr.msk.f32.mxu1 %vm403_vm1, %v3566_v43 }
 0x6b8   :  { %v3972_v19 = vpop.f32.mrb[6].mxu1 }
 0x6b9   :  { %v848_v20 = vadd.f32 %v3972_v19, %v4852_v59  ;;  %v838_v21 = vpop.f32.mrb[7].mxu1 }
 0x6ba   :  { %v847_v22 = vadd.f32 %v838_v21, %v4843_v52 }
 0x6bb   :  { %v4922_v23 = vadd.f32 %v3563_v18, %v848_v20 }
 0x6bc   :  { %v4924_v24 = vadd.f32 %v3563_v18, %v847_v22 }
 0x6bd   :  { %v908_v25 = vsel %vm213_vm0, %v4922_v23, 0.0  ;;  %v914_v26 = vmul.f32 %v4922_v23, %v4922_v23 }
 0x6be   :  { %909 = vadd.xlane.f32.xlu0 %v908_v25  ;;  %v913_v28 = vmul.f32 %v4924_v24, %v4924_v24  ;;  %v905_v52 = vsel %vm213_vm0, %v4924_v24, 0.0 }
 0x6bf   :  { %v918_v27 = vsel %vm213_vm0, %v914_v26, 0.0 }
 0x6c0   :  { %919 = vadd.xlane.f32.xlu1 %v918_v27  ;;  %v915_v59 = vsel %vm213_vm0, %v913_v28, 0.0 }
 0x6c2   :  { %906 = vadd.xlane.f32.xlu0 %v905_v52  ;;  %v3615_v52 = vld [vmem:[%s3518_s3] ss:$0 sm:$0xff]  ;;  %s4733_s3 = smov 26  }
 0x6c3   :  { %s3525_s7 = sld [smem:[%s5521_s0 + %s4733_s3]]   ;;  %s4739_s3 = smov 33  }
 0x6c4   :  { %916 = vadd.xlane.f32.xlu1 %v915_v59 }
 0x74b   :  { %v910_v29 = vpop.xlane.xlu0 %909 }
 0x74c   :  { %v912_v30 = vmul.f32 0.03125, %v910_v29 }
 0x74d   :  { %v920_v31 = vpop.xlane.xlu1 %919 }
 0x74e   :  { %v924_v32 = vmul.f32 %v912_v30, %v912_v30  ;;  %v922_v33 = vmul.f32 0.03125, %v920_v31  ;;  %v928_v44 = vsub.f32 %v4922_v23, %v912_v30 }
 0x74f   :  { %v907_v34 = vpop.xlane.xlu0 %906 }
 0x750   :  { %v926_v35 = vsub.f32 %v922_v33, %v924_v32  ;;  %v911_v36 = vmul.f32 0.03125, %v907_v34 }
 0x751   :  { %v917_v37 = vpop.xlane.xlu1 %916 }
 0x752   :  { %v930_v38 = vadd.f32 1e-05, %v926_v35  ;;  %v923_v39 = vmul.f32 %v911_v36, %v911_v36  ;;  %v921_v40 = vmul.f32 0.03125, %v917_v37  ;;  %v927_v49 = vsub.f32 %v4924_v24, %v911_v36 }
 0x754   :  { %4611 = vrsqrt.f32 %v930_v38  ;;  %v925_v41 = vsub.f32 %v921_v40, %v923_v39 }
 0x756   :  { %v929_v42 = vadd.f32 1e-05, %v925_v41 }
 0x758   :  { %4613 = vrsqrt.f32 %v929_v42 }
 0x75e   :  { %v4612_v45 = vpop.eup %4611 }
 0x75f   :  { %v934_v47 = vmul.f32 %v4612_v45, %v928_v44 }
 0x761   :  { %v942_v50 = vmul.f32 %v3600_v46, %v934_v47 }
 0x762   :  { %v4614_v51 = vpop.eup %4613 }
 0x763   :  { %v950_v53 = vadd.f32 %v3601_v48, %v942_v50  ;;  %v933_v54 = vmul.f32 %v4614_v51, %v927_v49 }
 0x765   :  { %952 = vrot.lane.b32.xlu0 %v950_v53, %s4710_s30  ;;  %v941_v55 = vmul.f32 %v3600_v46, %v933_v54 }
 0x767   :  { %v949_v12 = vadd.f32 %v3601_v48, %v941_v55 }
 0x769   :  { %958 = vperm.xlu0 %4590, %v3570_v56  }
 0x76d   :  { %963 = vperm.xlu0 %4590, %v3571_v60  }
 0x771   :  { %968 = vperm.xlu0 %4590, %v3572_v61  }
 0x775   :  { %1679 = vperm.xlu0 %4590, %v1596_v10  }
 0x779   :  { %1689 = vperm.xlu0 %4590, %v1598_v62  }
 0x77d   :  { %1111 = vperm.xlu0 %4590, %v3575_v63  }
 0x7d7   :  { %v953_v4 = vpop.permute.xlu0 %952 }
 0x7d8   :  { %v955_v6 = vsel %vm213_vm0, %v949_v12, %v953_v4  ;;  %v1592_v4 = vld [vmem:[%s4994_s10] sm:$0xff] }
 0x7d9   :  { %3973 = vmatprep.subr.mxu1 %v955_v6 }
 0x7da   :  { %3974 = vmatpush3.msra.mxu1 %v955_v6 }
 0x7db   :  { %3976 = vmatmul.mubr.msk.f32.vlgmr.msra.gmra.mrb[8].mxu1 %vm403_vm1, %v3567_v7  ;;  %4372 = vmatprep.subr.bf16.mxu1 %v4371_v5 }
 0x7dc   :  { %4374 = vmatpush3.bf16.msra.mxu1 %v4371_v5  ;;  %3978 = vmatprep.mubr.msk.f32.mxu1 %vm403_vm1, %v3568_v8  ;;  %v3618_v8 = vld [vmem:[%s3519_s25] ss:$0 sm:$0xff]  ;;  %s4735_s25 = smov 30  }
 0x7dd   :  { %4376 = vmatprep.subr.bf16.mxu1 %v4375_v9  ;;  %s5116_s20 = sld [smem:[%s5521_s0 + %s4735_s25]]   ;;  %s4741_s25 = smov 37  }
 0x7df   :  { %3979 = vmatmul.mubr.msk.f32.gmra.mrb[10].mxu1 %vm403_vm1, %v3569_v11  ;;  %v3619_v11 = vld [vmem:[%s3520_s22] ss:$0 sm:$0xff] }
 0x7e0   :  { %4378 = vmatpush3.bf16.msra.mxu1 %v4375_v9  ;;  %4046 = vmatprep.mubr.msk.f32.mxu1 %vm213_vm0, %v1496_v13 }
 0x7e3   :  { %4047 = vmatmul.mubr.msk.f32.vlgmr.msra.gmra.mrb[12].mxu1 %vm213_vm0, %v1497_v14 }
 0x7e4   :  { %4051 = vmatprep.mubr.msk.f32.mxu1 %vm403_vm1, %v1592_v4 }
 0x7e8   :  { %v959_v15 = vpop.permute.xlu0 %958 }
 0x7ec   :  { %v964_v16 = vpop.permute.xlu0 %963 }
 0x8ae   :  { %v3977_v17 = vpop.f32.mrb[8].mxu1 }
 0x8af   :  { %v1060_v18 = vadd.f32 %v3977_v17, %v964_v16  ;;  %v1054_v19 = vpop.f32.mrb[9].mxu1  ;;  %v3573_v17 = vld [vmem:[%s4811_s29 + $0x38] sm:$0xff]  ;;  %s4731_s29 = smov 24  }
 0x8b0   :  { %v1055_v20 = vadd.f32 %v1054_v19, %v959_v15  ;;  %s3523_s1 = sld [smem:[%s5521_s0 + %s4731_s29]]  }
 0x8b1   :  { %v1078_v21 = vmul.f32 0.044715, %v1060_v18  ;;  %v1074_v46 = vmul.f32 0.5, %v1060_v18  ;;  %s3530_s29 = sld [smem:[%s5521_s0 + %s4737_s26]]  }
 0x8b2   :  { %v1077_v22 = vmul.f32 0.044715, %v1055_v20  ;;  %v4972_v25 = vpop.f32.mrb[10].mxu1  ;;  %v1073_v48 = vmul.f32 0.5, %v1055_v20 }
 0x8b3   :  { %v1082_v26 = vmul.f32 %v1078_v21, %v1060_v18  ;;  %v4974_v27 = vpop.f32.mrb[11].mxu1 }
 0x8b4   :  { %v1081_v28 = vmul.f32 %v1077_v22, %v1055_v20  ;;  %v1599_v22 = vld [vmem:[%s4948_s15 + $0x18] sm:$0xff] }
 0x8b5   :  { %v1086_v59 = vmul.f32 %v1082_v26, %v1060_v18  ;;  %v1601_v26 = vld [vmem:[%s3524_s4] sm:$0xff]  ;;  %s4744_s4 = smov 42  }
 0x8b6   :  { %v1085_v29 = vmul.f32 %v1081_v28, %v1055_v20  ;;  %v4048_v30 = vpop.f32.mrb[12].mxu1 }
 0x8b7   :  { %v1090_v31 = vadd.f32 %v1086_v59, %v1060_v18  ;;  %v4976_v32 = vadd.f32 %v4048_v30, %v3615_v52  ;;  %v1581_v33 = vpop.f32.mrb[13].mxu1 }
 0x8b8   :  { %v1089_v34 = vadd.f32 %v1085_v29, %v1055_v20  ;;  %v4982_v39 = vadd.f32 %v3615_v52, %v1581_v33  ;;  %v1597_v20 = vld [vmem:[%s4948_s15 + $0x8] sm:$0xff]  ;;  %v969_v52 = vpop.permute.xlu0 %968  ;;  %v1595_v33 = vld [vmem:[%s4994_s10 + $0x18] sm:$0xff]  ;;  %s5333_s15 = sld [smem:[%s5521_s0 + %s4744_s4]]  }
 0x8b9   :  { %v1094_v35 = vmul.f32 0.7978846, %v1090_v31  ;;  %v1629_v36 = vsel %vm213_vm0, %v4976_v32, 0.0  ;;  %v1635_v37 = vmul.f32 %v4976_v32, %v4976_v32  ;;  %v1593_v29 = vld [vmem:[%s4994_s10 + $0x8] sm:$0xff]  ;;  %v1065_v30 = vadd.f32 %v4974_v27, %v969_v52  ;;  %v1594_v31 = vld [vmem:[%s4994_s10 + $0x10] sm:$0xff]  ;;  %s4734_s10 = smov 27  }
 0x8ba   :  { %v1093_v38 = vmul.f32 0.7978846, %v1089_v34  ;;  %1630 = vadd.xlane.f32.xlu1 %v1629_v36  ;;  %v1626_v41 = vsel %vm213_vm0, %v4982_v39, 0.0  ;;  %v1634_v42 = vmul.f32 %v4982_v39, %v4982_v39  ;;  %s3526_s21 = sld [smem:[%s5521_s0 + %s4734_s10]]   ;;  %s4740_s10 = smov 35  }
 0x8bb   :  { %4615 = vtanh.f32 %v1094_v35  ;;  %v1639_v40 = vsel %vm213_vm0, %v1635_v37, 0.0  ;;  %v1079_v34 = vmul.f32 0.044715, %v1065_v30 }
 0x8bc   :  { %4617 = vtanh.f32 %v1093_v38  ;;  %v1636_v44 = vsel %vm213_vm0, %v1634_v42, 0.0 }
 0x8bd   :  { %v1083_v35 = vmul.f32 %v1079_v34, %v1065_v30 }
 0x8be   :  { %1640 = vadd.xlane.f32.xlu1 %v1639_v40 }
 0x8bf   :  { %v1087_v36 = vmul.f32 %v1083_v35, %v1065_v30 }
 0x8c1   :  { %v1091_v27 = vadd.f32 %v1087_v36, %v1065_v30 }
 0x8c2   :  { %1627 = vadd.xlane.f32.xlu1 %v1626_v41 }
 0x8c3   :  { %v1095_v41 = vmul.f32 0.7978846, %v1091_v27 }
 0x8c5   :  { %v4616_v43 = vpop.eup %4615 }
 0x8c6   :  { %v4618_v45 = vpop.eup %4617  ;;  %1637 = vadd.xlane.f32.xlu1 %v1636_v44  ;;  %v1102_v47 = vadd.f32 1.0, %v4616_v43 }
 0x8c7   :  { %v1101_v49 = vadd.f32 1.0, %v4618_v45 }
 0x8c8   :  { %v1106_v50 = vmul.f32 %v1102_v47, %v1074_v46 }
 0x8c9   :  { %v1105_v51 = vmul.f32 %v1101_v49, %v1073_v48  ;;  %v1075_v49 = vmul.f32 0.5, %v1065_v30 }
 0x8cb   :  { %v4326_v53 = vpack.c.bf16 %v1106_v50, %v1105_v51 }
 0x8cd   :  { %4327 = vmatpush3.bf16.msra.mxu0 %v4326_v53 }
 0x8ce   :  { %4328 = vmatprep.subr.bf16.mxu0 %v4712_v57 }
 0x947   :  { %v1631_v54 = vpop.xlane.xlu1 %1630 }
 0x948   :  { %v1633_v55 = vmul.f32 0.03125, %v1631_v54 }
 0x94a   :  { %v1645_v12 = vmul.f32 %v1633_v55, %v1633_v55  ;;  %v1649_v6 = vsub.f32 %v4976_v32, %v1633_v55 }
 0x94b   :  { %v1641_v56 = vpop.xlane.xlu1 %1640 }
 0x94c   :  { %v1643_v60 = vmul.f32 0.03125, %v1641_v56 }
 0x94e   :  { %v1647_v61 = vsub.f32 %v1643_v60, %v1645_v12  ;;  %v1680_v12 = vpop.permute.xlu0 %1679 }
 0x94f   :  { %v1628_v10 = vpop.xlane.xlu1 %1627 }
 0x950   :  { %v1651_v62 = vadd.f32 1e-05, %v1647_v61  ;;  %v1632_v63 = vmul.f32 0.03125, %v1628_v10 }
 0x952   :  { %4619 = vrsqrt.f32 %v1651_v62  ;;  %v1644_v1 = vmul.f32 %v1632_v63, %v1632_v63  ;;  %v1648_v15 = vsub.f32 %v4982_v39, %v1632_v63 }
 0x953   :  { %v1638_v0 = vpop.xlane.xlu1 %1637 }
 0x954   :  { %v1642_v2 = vmul.f32 0.03125, %v1638_v0 }
 0x956   :  { %v1646_v3 = vsub.f32 %v1642_v2, %v1644_v1 }
 0x958   :  { %v1650_v5 = vadd.f32 1e-05, %v1646_v3  ;;  %v1690_v3 = vpop.permute.xlu0 %1689 }
 0x95a   :  { %4621 = vrsqrt.f32 %v1650_v5 }
 0x95b   :  { %4623 = vtanh.f32 %v1095_v41 }
 0x95c   :  { %v4620_v7 = vpop.eup %4619 }
 0x95d   :  { %v1655_v9 = vmul.f32 %v4620_v7, %v1649_v6 }
 0x95f   :  { %v1663_v13 = vmul.f32 %v3618_v8, %v1655_v9 }
 0x961   :  { %v1671_v14 = vadd.f32 %v3619_v11, %v1663_v13 }
 0x963   :  { %1673 = vrot.lane.b32.xlu1 %v1671_v14, %s4710_s30 }
 0x964   :  { %v4622_v16 = vpop.eup %4621 }
 0x965   :  { %v1654_v18 = vmul.f32 %v4622_v16, %v1648_v15  ;;  %v4624_v46 = vpop.eup %4623 }
 0x966   :  { %v1103_v47 = vadd.f32 1.0, %v4624_v46 }
 0x967   :  { %v1662_v19 = vmul.f32 %v3618_v8, %v1654_v18  ;;  %973 = vperm.xlu1 %4589, %v3573_v17  }
 0x968   :  { %v1107_v53 = vmul.f32 %v1103_v47, %v1075_v49  ;;  %v1112_v49 = vpop.permute.xlu0 %1111 }
 0x969   :  { %v1670_v21 = vadd.f32 %v3619_v11, %v1662_v19 }
 0x96b   :  { %1684 = vperm.xlu1 %4589, %v1597_v20  }
 0x96f   :  { %1694 = vperm.xlu1 %4589, %v1599_v22  }
 0x973   :  { %1832 = vperm.xlu1 %4589, %v1601_v26  }
 0x9d5   :  { %v1674_v28 = vpop.permute.xlu1 %1673 }
 0x9d6   :  { %v1676_v59 = vsel %vm213_vm0, %v1670_v21, %v1674_v28 }
 0x9d7   :  { %4049 = vmatprep.subr.mxu1 %v1676_v59 }
 0x9d8   :  { %4050 = vmatpush3.msra.mxu1 %v1676_v59 }
 0x9d9   :  { %4052 = vmatmul.mubr.msk.f32.vlgmr.msra.gmra.mrb[14].mxu1 %vm403_vm1, %v1593_v29  ;;  %4379 = vmatprep.subr.bf16.mxu1 %v4712_v57 }
 0x9da   :  { %4054 = vmatprep.mubr.msk.f32.mxu1 %vm403_vm1, %v1594_v31 }
 0x9dd   :  { %4055 = vmatmul.mubr.msk.f32.gmra.mrb[16].mxu1 %vm403_vm1, %v1595_v33 }
 0x9de   :  { %4065 = vmatprep.mubr.msk.f32.mxu1 %vm4713_vm2, %v4714_v58 }
 0x9e6   :  { %v974_v37 = vpop.permute.xlu1 %973 }
 0x9e7   :  { %v1070_v38 = vadd.f32 %v4972_v25, %v974_v37  ;;  %v3574_v25 = vld [vmem:[%s4837_s8 + $0x8] sm:$0xff]  ;;  %s4738_s8 = smov 34  }
 0x9e9   :  { %v1080_v40 = vmul.f32 0.044715, %v1070_v38  ;;  %v1076_v50 = vmul.f32 0.5, %v1070_v38 }
 0x9ea   :  { %v1685_v56 = vpop.permute.xlu1 %1684 }
 0x9eb   :  { %v1084_v42 = vmul.f32 %v1080_v40, %v1070_v38 }
 0x9ed   :  { %v1088_v43 = vmul.f32 %v1084_v42, %v1070_v38 }
 0x9ee   :  { %v1695_v0 = vpop.permute.xlu1 %1694 }
 0x9ef   :  { %v1092_v44 = vadd.f32 %v1088_v43, %v1070_v38 }
 0x9f1   :  { %v1096_v45 = vmul.f32 0.7978846, %v1092_v44 }
 0x9f3   :  { %4625 = vtanh.f32 %v1096_v45 }
 0x9fd   :  { %v4626_v48 = vpop.eup %4625 }
 0x9fe   :  { %v1104_v51 = vadd.f32 1.0, %v4626_v48  ;;  %v1600_v48 = vld [vmem:[%s3523_s1] sm:$0xff]  ;;  %s4745_s1 = smov 38  }
 0xa00   :  { %v1108_v54 = vmul.f32 %v1104_v51, %v1076_v50 }
 0xa02   :  { %v4329_v55 = vpack.c.bf16 %v1108_v54, %v1107_v53 }
 0xa04   :  { %4330 = vmatpush3.bf16.msra.mxu0 %v4329_v55 }
 0xa07   :  { %3990 = vmatmul.mubr.msk.f32.vlgmr.msra.gmra.mrb[4].mxu0 %vm213_vm0, %v3574_v25 }
 0xaac   :  { %v4053_v60 = vpop.f32.mrb[14].mxu1 }
 0xaad   :  { %v1781_v61 = vadd.f32 %v4053_v60, %v1685_v56  ;;  %v1775_v10 = vpop.f32.mrb[15].mxu1 }
 0xaae   :  { %v1776_v62 = vadd.f32 %v1775_v10, %v1680_v12 }
 0xaaf   :  { %v1799_v63 = vmul.f32 0.044715, %v1781_v61  ;;  %v1795_v31 = vmul.f32 0.5, %v1781_v61 }
 0xab0   :  { %v1798_v1 = vmul.f32 0.044715, %v1776_v62  ;;  %v4056_v2 = vpop.f32.mrb[16].mxu1  ;;  %v1794_v34 = vmul.f32 0.5, %v1776_v62 }
 0xab1   :  { %v1803_v4 = vmul.f32 %v1799_v63, %v1781_v61  ;;  %v1791_v5 = vadd.f32 %v4056_v2, %v1695_v0  ;;  %v1785_v6 = vpop.f32.mrb[17].mxu1 }
 0xab2   :  { %v1802_v7 = vmul.f32 %v1798_v1, %v1776_v62  ;;  %v1786_v8 = vadd.f32 %v1785_v6, %v1690_v3 }
 0xab3   :  { %v1807_v9 = vmul.f32 %v1803_v4, %v1781_v61  ;;  %v1801_v11 = vmul.f32 0.044715, %v1791_v5  ;;  %v1797_v40 = vmul.f32 0.5, %v1791_v5 }
 0xab4   :  { %v1806_v13 = vmul.f32 %v1802_v7, %v1776_v62  ;;  %v1800_v14 = vmul.f32 0.044715, %v1786_v8  ;;  %v1796_v43 = vmul.f32 0.5, %v1786_v8  ;;  %v5052_v7 = vld [vmem:[%s4882_s28 + $0x1] ss:$0 sm:$0xff]  ;;  %s5340_s28 = sld [smem:[%s5521_s0 + %s4745_s1]]  }
 0xab5   :  { %v1811_v15 = vadd.f32 %v1807_v9, %v1781_v61  ;;  %v1805_v16 = vmul.f32 %v1801_v11, %v1791_v5  ;;  %v1833_v11 = vpop.permute.xlu1 %1832 }
 0xab6   :  { %v1810_v17 = vadd.f32 %v1806_v13, %v1776_v62  ;;  %v1804_v18 = vmul.f32 %v1800_v14, %v1786_v8 }
 0xab7   :  { %v1815_v19 = vmul.f32 0.7978846, %v1811_v15  ;;  %v1809_v20 = vmul.f32 %v1805_v16, %v1791_v5 }
 0xab8   :  { %v1814_v21 = vmul.f32 0.7978846, %v1810_v17  ;;  %v1808_v22 = vmul.f32 %v1804_v18, %v1786_v8 }
 0xab9   :  { %4627 = vtanh.f32 %v1815_v19  ;;  %v1813_v26 = vadd.f32 %v1809_v20, %v1791_v5 }
 0xaba   :  { %4629 = vtanh.f32 %v1814_v21  ;;  %v1812_v28 = vadd.f32 %v1808_v22, %v1786_v8  ;;  %v3578_v21 = vld [vmem:[%s4862_s13 + $0x20] sm:$0xff]  ;;  %v3579_v22 = vld [vmem:[%s4862_s13 + $0x28] sm:$0xff] }
 0xabb   :  { %v1817_v52 = vmul.f32 0.7978846, %v1813_v26  ;;  %v3580_v26 = vld [vmem:[%s4862_s13 + $0x30] sm:$0xff] }
 0xabc   :  { %v1816_v59 = vmul.f32 0.7978846, %v1812_v28  ;;  %v3581_v28 = vld [vmem:[%s4862_s13 + $0x38] sm:$0xff] }
 0xabd   :  { %4631 = vtanh.f32 %v1817_v52  ;;  %v4335_v52 = vpack.c.bf16 %v3581_v28, %v3580_v26  ;;  %v3588_v26 = vld [vmem:[%s4877_s23 + $0xa8] sm:$0xff] }
 0xabe   :  { %4633 = vtanh.f32 %v1816_v59 }
 0xac3   :  { %v4628_v29 = vpop.eup %4627 }
 0xac4   :  { %v4630_v30 = vpop.eup %4629  ;;  %v1823_v33 = vadd.f32 1.0, %v4628_v29 }
 0xac5   :  { %v1822_v35 = vadd.f32 1.0, %v4630_v30 }
 0xac6   :  { %v1827_v36 = vmul.f32 %v1823_v33, %v1795_v31 }
 0xac7   :  { %v4632_v37 = vpop.eup %4631  ;;  %v1826_v27 = vmul.f32 %v1822_v35, %v1794_v34 }
 0xac8   :  { %v4634_v38 = vpop.eup %4633  ;;  %v1825_v41 = vadd.f32 1.0, %v4632_v37 }
 0xac9   :  { %v4380_v42 = vpack.c.bf16 %v1827_v36, %v1826_v27  ;;  %v1824_v44 = vadd.f32 1.0, %v4634_v38 }
 0xaca   :  { %v1829_v45 = vmul.f32 %v1825_v41, %v1797_v40 }
 0xacb   :  { %4381 = vmatpush3.bf16.msra.mxu1 %v4380_v42  ;;  %v1828_v46 = vmul.f32 %v1824_v44, %v1796_v43 }
 0xacc   :  { %4382 = vmatprep.subr.bf16.mxu1 %v4712_v57 }
 0xacd   :  { %v4383_v47 = vpack.c.bf16 %v1829_v45, %v1828_v46 }
 0xacf   :  { %4384 = vmatpush3.bf16.msra.mxu1 %v4383_v47  ;;  %v3583_v47 = vld [vmem:[%s4877_s23 + $0x80] sm:$0xff] }
 0xad2   :  { %4066 = vmatmul.mubr.msk.f32.vlgmr.msra.gmra.mrb[18].mxu1 %vm213_vm0, %v1600_v48  ;;  %v3584_v48 = vld [vmem:[%s4877_s23 + $0x88] sm:$0xff] }
 0xada   :  { %v1183_v50 = vpop.f32.mrb[4].mxu0 }
 0xadb   :  { %v1184_v51 = vadd.f32 %v1183_v50, %v1112_v49  ;;  %v3991_v53 = vpop.f32.mrb[5].mxu0  ;;  %v4339_v49 = vpack.c.bf16 %v3584_v48, %v3583_v47 }
 0xadc   :  { %v3625_v53 = vld [vmem:[%s3525_s7] ss:$0 sm:$0xff]  ;;  %s3532_s7 = sld [smem:[%s5521_s0 + %s4739_s3]]  }
 0xadd   :  { %1188 = vrot.lane.b32.xlu0 %v1184_v51, %s4716_s9  ;;  %v5034_v54 = vadd.f32 %v1184_v51, %v4924_v24 }
 0xadf   :  { %v1193_v55 = vsel %vm213_vm0, %v5034_v54, 0.0  ;;  %v1201_v25 = vmul.f32 %v5034_v54, %v5034_v54 }
 0xae1   :  { %v1203_v56 = vsel %vm213_vm0, %v1201_v25, 0.0  ;;  %v3626_v25 = vld [vmem:[%s3526_s21] ss:$0 sm:$0xff]  ;;  %s5181_s21 = sld [smem:[%s5521_s0 + %s4740_s10]]  }
 0xafc   :  { %1194 = vadd.xlane.f32.xlu0 %v1193_v55 }
 0xb00   :  { %1204 = vadd.xlane.f32.xlu0 %v1203_v56 }
 0xb4f   :  { %v1189_v12 = vpop.permute.xlu0 %1188 }
 0xb50   :  { %v5042_v60 = vadd.f32 %v1189_v12, %v4922_v23  ;;  %v5049_v23 = vld [vmem:[%s4872_s18 + $0x1] ss:$0 sm:$0xff]  ;;  %s4732_s18 = smov 28  }
 0xb51   :  { %s3527_s2 = sld [smem:[%s5521_s0 + %s4732_s18]]  }
 0xb52   :  { %v1202_v24 = vmul.f32 %v5042_v60, %v5042_v60  ;;  %v1196_v20 = vsel %vm213_vm0, %v5042_v60, 0.0  ;;  %s5164_s18 = sld [smem:[%s5521_s0 + %s4738_s8]]  }
 0xb54   :  { %v1206_v61 = vsel %vm213_vm0, %v1202_v24, 0.0 }
 0xb55   :  { %1207 = vadd.xlane.f32.xlu0 %v1206_v61 }
 0xb57   :  { %v1604_v37 = vld [vmem:[%s3527_s2] sm:$0xff]  ;;  %v1605_v27 = vld [vmem:[%s3527_s2 + $0x8] sm:$0xff]  ;;  %v1606_v43 = vld [vmem:[%s3527_s2 + $0x10] sm:$0xff] }
 0xb58   :  { %v4385_v41 = vpack.c.bf16 %v1605_v27, %v1604_v37  ;;  %v1607_v44 = vld [vmem:[%s3527_s2 + $0x18] sm:$0xff]  ;;  %v3595_v37 = vld [vmem:[%s4877_s23 + $0xe0] sm:$0xff]  ;;  %v3596_v27 = vld [vmem:[%s4877_s23 + $0xe8] sm:$0xff]  ;;  %s3531_s2 = sld [smem:[%s5521_s0 + %s4710_s30]]  }
 0xb59   :  { %v4389_v46 = vpack.c.bf16 %v1607_v44, %v1606_v43  ;;  %v1609_v43 = vld [vmem:[%s5116_s20] sm:$0xff]  ;;  %v1610_v44 = vld [vmem:[%s5116_s20 + $0x8] sm:$0xff] }
 0xb5a   :  { %4386 = vmatprep.subr.bf16.mxu1 %v4385_v41 }
 0xb5b   :  { %4388 = vmatpush3.bf16.msra.mxu1 %v4385_v41  ;;  %v3598_v41 = vld [vmem:[%s4877_s23 + $0xf8] sm:$0xff] }
 0xb5c   :  { %4390 = vmatprep.subr.bf16.mxu1 %v4389_v46 }
 0xb5f   :  { %4392 = vmatpush3.bf16.msra.mxu1 %v4389_v46  ;;  %v3609_v46 = vld [vmem:[%s4911_s5 + $0x1] ss:$0 sm:$0xff] }
 0xb89   :  { %v1195_v10 = vpop.xlane.xlu0 %1194 }
 0xb8a   :  { %v1199_v62 = vmul.f32 0.03125, %v1195_v10 }
 0xb8c   :  { %v1211_v0 = vmul.f32 %v1199_v62, %v1199_v62  ;;  %v1215_v4 = vsub.f32 %v5034_v54, %v1199_v62 }
 0xb8d   :  { %v1205_v63 = vpop.xlane.xlu0 %1204 }
 0xb8e   :  { %v1209_v1 = vmul.f32 0.03125, %v1205_v63 }
 0xb90   :  { %v1213_v2 = vsub.f32 %v1209_v1, %v1211_v0 }
 0xb92   :  { %v1217_v3 = vadd.f32 1e-05, %v1213_v2 }
 0xb94   :  { %4635 = vrsqrt.f32 %v1217_v3 }
 0xb9e   :  { %v4636_v5 = vpop.eup %4635 }
 0xb9f   :  { %v1221_v6 = vmul.f32 %v4636_v5, %v1215_v4 }
 0xba1   :  { %v1229_v8 = vmul.f32 %v5049_v23, %v1221_v6 }
 0xba3   :  { %v1237_v9 = vadd.f32 %v5052_v7, %v1229_v8 }
 0xba5   :  { %4000 = vmatprep.mubr.msk.f32.mxu0 %vm213_vm0, %v1237_v9  ;;  %v1904_v13 = vpop.f32.mrb[18].mxu1 }
 0xba6   :  { %v1905_v14 = vadd.f32 %v1904_v13, %v1833_v11  ;;  %v4067_v15 = vpop.f32.mrb[19].mxu1 }
 0xba8   :  { %v5058_v16 = vadd.f32 %v1905_v14, %v4982_v39  ;;  %1909 = vrot.lane.b32.xlu1 %v1905_v14, %s4716_s9  ;;  %v4331_v39 = vpack.c.bf16 %v3579_v22, %v3578_v21  ;;  %v3586_v21 = vld [vmem:[%s4877_s23 + $0x98] sm:$0xff] }
 0xbaa   :  { %v1914_v17 = vsel %vm213_vm0, %v5058_v16, 0.0  ;;  %v1922_v18 = vmul.f32 %v5058_v16, %v5058_v16  ;;  %4332 = vmatprep.subr.bf16.mxu0 %v4331_v39 }
 0xbab   :  { %1915 = vadd.xlane.f32.xlu0 %v1914_v17  ;;  %4334 = vmatpush3.bf16.msra.mxu0 %v4331_v39  ;;  %v3587_v39 = vld [vmem:[%s4877_s23 + $0xa0] sm:$0xff] }
 0xbac   :  { %v1924_v19 = vsel %vm213_vm0, %v1922_v18, 0.0  ;;  %4336 = vmatprep.subr.bf16.mxu0 %v4335_v52  ;;  %v4347_v28 = vpack.c.bf16 %v3588_v26, %v3587_v39  ;;  %v1621_v26 = vld [vmem:[%s5116_s20 + $0x60] sm:$0xff] }
 0xbaf   :  { %1925 = vadd.xlane.f32.xlu0 %v1924_v19  ;;  %4338 = vmatpush3.bf16.msra.mxu0 %v4335_v52  ;;  %v3589_v52 = vld [vmem:[%s4877_s23 + $0xb0] sm:$0xff] }
 0xbb0   :  { %4340 = vmatprep.subr.bf16.mxu0 %v4339_v49 }
 0xbcc   :  { %1197 = vadd.xlane.f32.xlu1 %v1196_v20  ;;  %v3585_v20 = vld [vmem:[%s4877_s23 + $0x90] sm:$0xff] }
 0xbcd   :  { %v4343_v22 = vpack.c.bf16 %v3586_v21, %v3585_v20  ;;  %v1619_v21 = vld [vmem:[%s5116_s20 + $0x50] sm:$0xff] }
 0xbe2   :  { %v1208_v34 = vpop.xlane.xlu0 %1207 }
 0xbe3   :  { %v1210_v10 = vmul.f32 0.03125, %v1208_v34  ;;  %v3593_v34 = vld [vmem:[%s4877_s23 + $0xd0] sm:$0xff] }
 0xc1a   :  { %v1910_v59 = vpop.permute.xlu1 %1909 }
 0xc1b   :  { %v5073_v29 = vadd.f32 %v1910_v59, %v4976_v32  ;;  %v3590_v59 = vld [vmem:[%s4877_s23 + $0xb8] sm:$0xff] }
 0xc1d   :  { %v1917_v30 = vsel %vm213_vm0, %v5073_v29, 0.0  ;;  %v1923_v31 = vmul.f32 %v5073_v29, %v5073_v29 }
 0xc1e   :  { %1918 = vadd.xlane.f32.xlu1 %v1917_v30  ;;  %v4351_v30 = vpack.c.bf16 %v3590_v59, %v3589_v52  ;;  %v1623_v59 = vld [vmem:[%s5116_s20 + $0x70] sm:$0xff] }
 0xc1f   :  { %v1927_v33 = vsel %vm213_vm0, %v1923_v31, 0.0  ;;  %v3591_v31 = vld [vmem:[%s4877_s23 + $0xc0] sm:$0xff] }
 0xc22   :  { %1928 = vadd.xlane.f32.xlu1 %v1927_v33  ;;  %v3592_v33 = vld [vmem:[%s4877_s23 + $0xc8] sm:$0xff] }
 0xc38   :  { %v1916_v35 = vpop.xlane.xlu0 %1915 }
 0xc39   :  { %v1920_v36 = vmul.f32 0.03125, %v1916_v35  ;;  %v4355_v35 = vpack.c.bf16 %v3592_v33, %v3591_v31 }
 0xc3b   :  { %v1932_v38 = vmul.f32 %v1920_v36, %v1920_v36  ;;  %v1936_v50 = vsub.f32 %v5058_v16, %v1920_v36  ;;  %v3594_v36 = vld [vmem:[%s4877_s23 + $0xd8] sm:$0xff] }
 0xc3c   :  { %v1926_v32 = vpop.xlane.xlu0 %1925 }
 0xc3d   :  { %v1930_v40 = vmul.f32 0.03125, %v1926_v32  ;;  %v4359_v32 = vpack.c.bf16 %v3594_v36, %v3593_v34 }
 0xc3f   :  { %v1934_v42 = vsub.f32 %v1930_v40, %v1932_v38  ;;  %v4363_v38 = vpack.c.bf16 %v3596_v27, %v3595_v37  ;;  %v3597_v40 = vld [vmem:[%s4877_s23 + $0xf0] sm:$0xff]  ;;  %s4736_s23 = smov 29  }
 0xc40   :  { %s3528_s24 = sld [smem:[%s5521_s0 + %s4736_s23]]   ;;  %s4742_s23 = smov 36  }
 0xc41   :  { %v1938_v45 = vadd.f32 1e-05, %v1934_v42  ;;  %v4367_v42 = vpack.c.bf16 %v3598_v41, %v3597_v40 }
 0xc43   :  { %4637 = vrsqrt.f32 %v1938_v45  ;;  %v4393_v45 = vpack.c.bf16 %v1610_v44, %v1609_v43 }
 0xc46   :  { %v3627_v33 = vld [vmem:[%s3528_s24] ss:$0 sm:$0xff]  ;;  %s3535_s24 = sld [smem:[%s5521_s0 + %s4742_s23]]  }
 0xc4d   :  { %v4638_v51 = vpop.eup %4637 }
 0xc4e   :  { %v1942_v55 = vmul.f32 %v4638_v51, %v1936_v50 }
 0xc50   :  { %v1950_v56 = vmul.f32 %v3625_v53, %v1942_v55 }
 0xc52   :  { %v1958_v12 = vadd.f32 %v3626_v25, %v1950_v56 }
 0xc54   :  { %4076 = vmatprep.mubr.msk.f32.mxu1 %vm213_vm0, %v1958_v12 }
 0xc59   :  { %v1198_v24 = vpop.xlane.xlu1 %1197 }
 0xc5a   :  { %v1200_v61 = vmul.f32 0.03125, %v1198_v24 }
 0xc5c   :  { %v1212_v62 = vmul.f32 %v1200_v61, %v1200_v61  ;;  %v1216_v1 = vsub.f32 %v5042_v60, %v1200_v61 }
 0xc5e   :  { %v1214_v63 = vsub.f32 %v1210_v10, %v1212_v62 }
 0xc60   :  { %v1218_v0 = vadd.f32 1e-05, %v1214_v63 }
 0xc62   :  { %4639 = vrsqrt.f32 %v1218_v0 }
 0xc6c   :  { %v4640_v2 = vpop.eup %4639 }
 0xc6d   :  { %v1222_v3 = vmul.f32 %v4640_v2, %v1216_v1 }
 0xc6f   :  { %v1230_v4 = vmul.f32 %v5049_v23, %v1222_v3 }
 0xc71   :  { %v1238_v5 = vadd.f32 %v5052_v7, %v1230_v4  ;;  %v1611_v4 = vld [vmem:[%s5116_s20 + $0x10] sm:$0xff] }
 0xc73   :  { %4001 = vmatmul.mubr.msk.f32.vlgmr.msra.gmra.mrb[6].mxu0 %vm213_vm0, %v1238_v5  ;;  %v1612_v5 = vld [vmem:[%s5116_s20 + $0x18] sm:$0xff] }
 0xc74   :  { %4342 = vmatpush3.bf16.msra.mxu0 %v4339_v49 }
 0xc75   :  { %4344 = vmatprep.subr.bf16.mxu0 %v4343_v22 }
 0xc78   :  { %4346 = vmatpush3.bf16.msra.mxu0 %v4343_v22  ;;  %v1620_v22 = vld [vmem:[%s5116_s20 + $0x58] sm:$0xff] }
 0xc79   :  { %4348 = vmatprep.subr.bf16.mxu0 %v4347_v28  ;;  %v4413_v39 = vpack.c.bf16 %v1620_v22, %v1619_v21  ;;  %v2152_v22 = vld [vmem:[%s5164_s18] sm:$0xff] }
 0xc7c   :  { %4350 = vmatpush3.bf16.msra.mxu0 %v4347_v28  ;;  %v1622_v28 = vld [vmem:[%s5116_s20 + $0x68] sm:$0xff] }
 0xc7d   :  { %4352 = vmatprep.subr.bf16.mxu0 %v4351_v30  ;;  %v4417_v52 = vpack.c.bf16 %v1622_v28, %v1621_v26 }
 0xc80   :  { %4354 = vmatpush3.bf16.msra.mxu0 %v4351_v30  ;;  %v1624_v30 = vld [vmem:[%s5116_s20 + $0x78] sm:$0xff] }
 0xc81   :  { %4356 = vmatprep.subr.bf16.mxu0 %v4355_v35  ;;  %v4421_v31 = vpack.c.bf16 %v1624_v30, %v1623_v59  ;;  %v3682_v59 = vld [vmem:[%s3531_s2 + $0x1] ss:$0 sm:$0xff] }
 0xc84   :  { %4358 = vmatpush3.bf16.msra.mxu0 %v4355_v35 }
 0xc85   :  { %4360 = vmatprep.subr.bf16.mxu0 %v4359_v32 }
 0xc88   :  { %4362 = vmatpush3.bf16.msra.mxu0 %v4359_v32 }
 0xc89   :  { %4364 = vmatprep.subr.bf16.mxu0 %v4363_v38 }
 0xc8c   :  { %4366 = vmatpush3.bf16.msra.mxu0 %v4363_v38 }
 0xc8d   :  { %4368 = vmatprep.subr.bf16.mxu0 %v4367_v42 }
 0xc90   :  { %4370 = vmatpush3.bf16.msra.mxu0 %v4367_v42 }
 0xc91   :  { %4394 = vmatprep.subr.bf16.mxu0 %v4393_v45 }
 0xcab   :  { %v1919_v6 = vpop.xlane.xlu1 %1918 }
 0xcac   :  { %v1921_v8 = vmul.f32 0.03125, %v1919_v6 }
 0xcae   :  { %v1933_v11 = vmul.f32 %v1921_v8, %v1921_v8  ;;  %v1937_v17 = vsub.f32 %v5073_v29, %v1921_v8 }
 0xcaf   :  { %v1929_v9 = vpop.xlane.xlu1 %1928 }
 0xcb0   :  { %v1931_v13 = vmul.f32 0.03125, %v1929_v9 }
 0xcb2   :  { %v1935_v14 = vsub.f32 %v1931_v13, %v1933_v11  ;;  %v4397_v11 = vpack.c.bf16 %v1612_v5, %v1611_v4  ;;  %v1613_v13 = vld [vmem:[%s5116_s20 + $0x20] sm:$0xff] }
 0xcb4   :  { %v1939_v15 = vadd.f32 1e-05, %v1935_v14  ;;  %v1614_v14 = vld [vmem:[%s5116_s20 + $0x28] sm:$0xff] }
 0xcb6   :  { %4641 = vrsqrt.f32 %v1939_v15  ;;  %v4401_v15 = vpack.c.bf16 %v1614_v14, %v1613_v13 }
 0xcc0   :  { %v4642_v23 = vpop.eup %4641 }
 0xcc1   :  { %v1943_v7 = vmul.f32 %v4642_v23, %v1937_v17  ;;  %v1615_v17 = vld [vmem:[%s5116_s20 + $0x30] sm:$0xff]  ;;  %v1616_v23 = vld [vmem:[%s5116_s20 + $0x38] sm:$0xff] }
 0xcc3   :  { %v1951_v18 = vmul.f32 %v3625_v53, %v1943_v7  ;;  %v4405_v7 = vpack.c.bf16 %v1616_v23, %v1615_v17 }
 0xcc5   :  { %v1959_v19 = vadd.f32 %v3626_v25, %v1951_v18  ;;  %v1617_v18 = vld [vmem:[%s5116_s20 + $0x40] sm:$0xff] }
 0xcc7   :  { %4077 = vmatmul.mubr.msk.f32.vlgmr.msra.gmra.mrb[20].mxu1 %vm213_vm0, %v1959_v19  ;;  %v1618_v19 = vld [vmem:[%s5116_s20 + $0x48] sm:$0xff]  ;;  %s3536_s20 = sld [smem:[%s5521_s0 + %s4741_s25]]  }
 0xcc8   :  { %v4409_v20 = vpack.c.bf16 %v1618_v19, %v1617_v18  ;;  %4116 = vmatprep.mubr.msk.f32.mxu1 %vm403_vm1, %v2152_v22 }
 0xd46   :  { %v4002_v47 = vpop.f32.mrb[6].mxu0 }
 0xd47   :  { %v1323_v48 = vadd.f32 %v4002_v47, %v3609_v46  ;;  %v1317_v49 = vpop.f32.mrb[7].mxu0 }
 0xd48   :  { %v1318_v50 = vadd.f32 %v3609_v46, %v1317_v49 }
 0xd49   :  { %v1329_v51 = vmul.f32 0.044715, %v1323_v48  ;;  %v1327_v6 = vmul.f32 0.5, %v1323_v48 }
 0xd4a   :  { %v1328_v53 = vmul.f32 0.044715, %v1318_v50  ;;  %v1326_v2 = vmul.f32 0.5, %v1318_v50 }
 0xd4b   :  { %v1331_v55 = vmul.f32 %v1329_v51, %v1323_v48 }
 0xd4c   :  { %v1330_v25 = vmul.f32 %v1328_v53, %v1318_v50 }
 0xd4d   :  { %v1333_v56 = vmul.f32 %v1331_v55, %v1323_v48 }
 0xd4e   :  { %v1332_v12 = vmul.f32 %v1330_v25, %v1318_v50 }
 0xd4f   :  { %v1335_v24 = vadd.f32 %v1333_v56, %v1323_v48 }
 0xd50   :  { %v1334_v61 = vadd.f32 %v1332_v12, %v1318_v50 }
 0xd51   :  { %v1337_v10 = vmul.f32 0.7978846, %v1335_v24  ;;  %v3630_v24 = vld [vmem:[%s3530_s29] ss:$0 sm:$0xff] }
 0xd52   :  { %v1336_v62 = vmul.f32 0.7978846, %v1334_v61 }
 0xd53   :  { %4643 = vtanh.f32 %v1337_v10 }
 0xd54   :  { %4645 = vtanh.f32 %v1336_v62 }
 0xd5d   :  { %v4644_v63 = vpop.eup %4643 }
 0xd5e   :  { %v4646_v0 = vpop.eup %4645  ;;  %v1341_v1 = vadd.f32 1.0, %v4644_v63 }
 0xd5f   :  { %v1340_v3 = vadd.f32 1.0, %v4646_v0 }
 0xd60   :  { %v1343_v9 = vmul.f32 %v1341_v1, %v1327_v6 }
 0xd61   :  { %v1342_v8 = vmul.f32 %v1340_v3, %v1326_v2 }
 0xd63   :  { %4035 = vmatprep.mubr.f32.mxu0 %v1342_v8 }
 0xd64   :  { %4036 = vmatmul.mubr.f32.vlgmr.msra.gmra.mrb[8].mxu0 %v1343_v9 }
 0xd65   :  { %4396 = vmatpush3.bf16.msra.mxu0 %v4393_v45 }
 0xd66   :  { %4398 = vmatprep.subr.bf16.mxu0 %v4397_v11 }
 0xd69   :  { %4400 = vmatpush3.bf16.msra.mxu0 %v4397_v11 }
 0xd6a   :  { %4402 = vmatprep.subr.bf16.mxu0 %v4401_v15 }
 0xd6d   :  { %4404 = vmatpush3.bf16.msra.mxu0 %v4401_v15 }
 0xd6e   :  { %4406 = vmatprep.subr.bf16.mxu0 %v4405_v7 }
 0xd71   :  { %4408 = vmatpush3.bf16.msra.mxu0 %v4405_v7 }
 0xd72   :  { %4410 = vmatprep.subr.bf16.mxu0 %v4409_v20 }
 0xd75   :  { %4412 = vmatpush3.bf16.msra.mxu0 %v4409_v20 }
 0xd76   :  { %4414 = vmatprep.subr.bf16.mxu0 %v4413_v39 }
 0xd79   :  { %4416 = vmatpush3.bf16.msra.mxu0 %v4413_v39  ;;  %v3648_v39 = vld [vmem:[%s5164_s18 + $0x20] sm:$0xff] }
 0xd7a   :  { %4418 = vmatprep.subr.bf16.mxu0 %v4417_v52 }
 0xd7d   :  { %4420 = vmatpush3.bf16.msra.mxu0 %v4417_v52  ;;  %v3631_v52 = vld [vmem:[%s3531_s2] ss:$0 sm:$0xff]  ;;  %s4746_s2 = smov 39  }
 0xd7e   :  { %4422 = vmatprep.subr.bf16.mxu0 %v4421_v31  ;;  %s5345_s6 = sld [smem:[%s5521_s0 + %s4746_s2]]  }
 0xd81   :  { %4424 = vmatpush3.bf16.msra.mxu0 %v4421_v31  ;;  %v3632_v31 = vld [vmem:[%s3532_s7] ss:$0 sm:$0xff] }
 0xd9a   :  { %v4078_v34 = vpop.f32.mrb[20].mxu1 }
 0xd9b   :  { %v2044_v35 = vadd.f32 %v4078_v34, %v3627_v33  ;;  %v2038_v36 = vpop.f32.mrb[21].mxu1 }
 0xd9c   :  { %v2039_v32 = vadd.f32 %v3627_v33, %v2038_v36  ;;  %v3683_v33 = vld [vmem:[%s3532_s7 + $0x1] ss:$0 sm:$0xff]  ;;  %s4747_s7 = smov 41  }
 0xd9d   :  { %v2050_v37 = vmul.f32 0.044715, %v2044_v35  ;;  %v2048_v53 = vmul.f32 0.5, %v2044_v35  ;;  %s3540_s14 = sld [smem:[%s5521_s0 + %s4747_s7]]  }
 0xd9e   :  { %v2049_v27 = vmul.f32 0.044715, %v2039_v32  ;;  %v2047_v50 = vmul.f32 0.5, %v2039_v32 }
 0xd9f   :  { %v2052_v38 = vmul.f32 %v2050_v37, %v2044_v35 }
 0xda0   :  { %v2051_v40 = vmul.f32 %v2049_v27, %v2039_v32 }
 0xda1   :  { %v2054_v41 = vmul.f32 %v2052_v38, %v2044_v35 }
 0xda2   :  { %v2053_v42 = vmul.f32 %v2051_v40, %v2039_v32 }
 0xda3   :  { %v2056_v43 = vadd.f32 %v2054_v41, %v2044_v35 }
 0xda4   :  { %v2055_v44 = vadd.f32 %v2053_v42, %v2039_v32  ;;  %v3652_v42 = vld [vmem:[%s5181_s21 + $0x20] sm:$0xff] }
 0xda5   :  { %v2058_v45 = vmul.f32 0.7978846, %v2056_v43  ;;  %v3654_v43 = vld [vmem:[%s5181_s21 + $0x30] sm:$0xff] }
 0xda6   :  { %v2057_v46 = vmul.f32 0.7978846, %v2055_v44 }
 0xda7   :  { %4647 = vtanh.f32 %v2058_v45 }
 0xda8   :  { %4649 = vtanh.f32 %v2057_v46  ;;  %v3653_v46 = vld [vmem:[%s5181_s21 + $0x28] sm:$0xff] }
 0xdb1   :  { %v4648_v47 = vpop.eup %4647 }
 0xdb2   :  { %v4650_v48 = vpop.eup %4649  ;;  %v2062_v49 = vadd.f32 1.0, %v4648_v47  ;;  %v2156_v47 = vld [vmem:[%s5181_s21] sm:$0xff] }
 0xdb3   :  { %v2061_v51 = vadd.f32 1.0, %v4650_v48  ;;  %v3655_v48 = vld [vmem:[%s5181_s21 + $0x38] sm:$0xff] }
 0xdb4   :  { %v2064_v25 = vmul.f32 %v2062_v49, %v2048_v53  ;;  %v2158_v49 = vld [vmem:[%s5181_s21 + $0x10] sm:$0xff]  ;;  %v2159_v53 = vld [vmem:[%s5181_s21 + $0x18] sm:$0xff] }
 0xdb5   :  { %v2063_v55 = vmul.f32 %v2061_v51, %v2047_v50  ;;  %v2157_v50 = vld [vmem:[%s5181_s21 + $0x8] sm:$0xff]  ;;  %s4748_s21 = smov 43  }
 0xdb6   :  { %v3657_v51 = vld [vmem:[%s3536_s20 + $0x8] sm:$0xff]  ;;  %s3542_s19 = sld [smem:[%s5521_s0 + %s4748_s21]]  }
 0xdb7   :  { %4111 = vmatprep.mubr.f32.mxu0 %v2063_v55  ;;  %v2161_v55 = vld [vmem:[%s3536_s20] sm:$0xff]  ;;  %s4749_s20 = smov 46  }
 0xdb8   :  { %4112 = vmatmul.mubr.f32.vlgmr.msra.gmra.mrb[10].mxu0 %v2064_v25  ;;  %s5439_s22 = sld [smem:[%s5521_s0 + %s4749_s20]]  }
 0xdb9   :  { %4181 = vmatprep.mubr.msk.f32.mxu0 %vm403_vm1, %v3648_v39 }
 0xe37   :  { %v5138_v56 = vpop.f32.mrb[8].mxu0 }
 0xe38   :  { %v5140_v12 = vpop.f32.mrb[9].mxu0 }
 0xe8b   :  { %v4113_v61 = vpop.f32.mrb[10].mxu0 }
 0xe8c   :  { %v2141_v10 = vadd.f32 %v4113_v61, %v5073_v29  ;;  %v2131_v62 = vpop.f32.mrb[11].mxu0 }
 0xe8d   :  { %v2140_v63 = vadd.f32 %v2131_v62, %v5058_v16  ;;  %v2153_v62 = vld [vmem:[%s5164_s18 + $0x8] sm:$0xff] }
 0xe8e   :  { %v5147_v0 = vadd.f32 %v3630_v24, %v2141_v10 }
 0xe8f   :  { %v5149_v1 = vadd.f32 %v3630_v24, %v2140_v63  ;;  %v3649_v63 = vld [vmem:[%s5164_s18 + $0x28] sm:$0xff] }
 0xe90   :  { %v2189_v2 = vsel %vm213_vm0, %v5147_v0, 0.0  ;;  %v2195_v3 = vmul.f32 %v5147_v0, %v5147_v0 }
 0xe91   :  { %2190 = vadd.xlane.f32.xlu0 %v2189_v2  ;;  %v2194_v5 = vmul.f32 %v5149_v1, %v5149_v1  ;;  %v2186_v16 = vsel %vm213_vm0, %v5149_v1, 0.0  ;;  %v2154_v2 = vld [vmem:[%s5164_s18 + $0x10] sm:$0xff] }
 0xe92   :  { %v2199_v4 = vsel %vm213_vm0, %v2195_v3, 0.0  ;;  %v3650_v3 = vld [vmem:[%s5164_s18 + $0x30] sm:$0xff] }
 0xe93   :  { %2200 = vadd.xlane.f32.xlu1 %v2199_v4  ;;  %v2196_v29 = vsel %vm213_vm0, %v2194_v5, 0.0  ;;  %v2155_v4 = vld [vmem:[%s5164_s18 + $0x18] sm:$0xff] }
 0xe94   :  { %v3651_v5 = vld [vmem:[%s5164_s18 + $0x38] sm:$0xff] }
 0xe95   :  { %2187 = vadd.xlane.f32.xlu0 %v2186_v16 }
 0xe97   :  { %2197 = vadd.xlane.f32.xlu1 %v2196_v29 }
 0xf1e   :  { %v2191_v6 = vpop.xlane.xlu0 %2190 }
 0xf1f   :  { %v2193_v8 = vmul.f32 0.03125, %v2191_v6 }
 0xf20   :  { %v2201_v9 = vpop.xlane.xlu1 %2200 }
 0xf21   :  { %v2205_v11 = vmul.f32 %v2193_v8, %v2193_v8  ;;  %v2203_v13 = vmul.f32 0.03125, %v2201_v9  ;;  %v2209_v26 = vsub.f32 %v5147_v0, %v2193_v8 }
 0xf22   :  { %v2188_v14 = vpop.xlane.xlu0 %2187 }
 0xf23   :  { %v2207_v15 = vsub.f32 %v2203_v13, %v2205_v11  ;;  %v2192_v17 = vmul.f32 0.03125, %v2188_v14 }
 0xf24   :  { %v2198_v23 = vpop.xlane.xlu1 %2197 }
 0xf25   :  { %v2211_v7 = vadd.f32 1e-05, %v2207_v15  ;;  %v2204_v18 = vmul.f32 %v2192_v17, %v2192_v17  ;;  %v2202_v19 = vmul.f32 0.03125, %v2198_v23  ;;  %v2208_v34 = vsub.f32 %v5149_v1, %v2192_v17 }
 0xf27   :  { %4651 = vrsqrt.f32 %v2211_v7  ;;  %v2206_v20 = vsub.f32 %v2202_v19, %v2204_v18 }
 0xf29   :  { %v2210_v21 = vadd.f32 1e-05, %v2206_v20 }
 0xf2b   :  { %4653 = vrsqrt.f32 %v2210_v21 }
 0xf31   :  { %v4652_v28 = vpop.eup %4651 }
 0xf32   :  { %v2215_v30 = vmul.f32 %v4652_v28, %v2209_v26 }
 0xf34   :  { %v2223_v35 = vmul.f32 %v3631_v52, %v2215_v30  ;;  %v2830_v36 = vmul.f32 %v3682_v59, %v2215_v30 }
 0xf35   :  { %v4654_v32 = vpop.eup %4653 }
 0xf36   :  { %v2231_v37 = vadd.f32 %v3632_v31, %v2223_v35  ;;  %v2214_v27 = vmul.f32 %v4654_v32, %v2208_v34  ;;  %v2838_v38 = vadd.f32 %v3683_v33, %v2830_v36 }
 0xf38   :  { %2233 = vrot.lane.b32.xlu1 %v2231_v37, %s4710_s30  ;;  %v2222_v40 = vmul.f32 %v3631_v52, %v2214_v27  ;;  %2840 = vrot.lane.b32.xlu0 %v2838_v38, %s4710_s30  ;;  %v2829_v41 = vmul.f32 %v3682_v59, %v2214_v27 }
 0xf3a   :  { %v2230_v44 = vadd.f32 %v3632_v31, %v2222_v40  ;;  %v2837_v45 = vadd.f32 %v3683_v33, %v2829_v41 }
 0xf3c   :  { %2846 = vperm.xlu1 %4589, %v3652_v42   ;;  %2856 = vperm.xlu0 %4590, %v3654_v43  }
 0xf40   :  { %2851 = vperm.xlu1 %4589, %v3653_v46   ;;  %2239 = vperm.xlu0 %4590, %v2156_v47  }
 0xf44   :  { %2861 = vperm.xlu1 %4589, %v3655_v48   ;;  %2249 = vperm.xlu0 %4590, %v2158_v49  }
 0xf48   :  { %2244 = vperm.xlu1 %4589, %v2157_v50   ;;  %2999 = vperm.xlu0 %4590, %v3657_v51  }
 0xf4c   :  { %2254 = vperm.xlu1 %4589, %v2159_v53  }
 0xf50   :  { %2392 = vperm.xlu1 %4589, %v2161_v55  }
 0xfaa   :  { %v2234_v25 = vpop.permute.xlu1 %2233  ;;  %v2841_v24 = vpop.permute.xlu0 %2840 }
 0xfab   :  { %v2236_v61 = vsel %vm213_vm0, %v2230_v44, %v2234_v25  ;;  %v2843_v10 = vsel %vm213_vm0, %v2837_v45, %v2841_v24 }
 0xfac   :  { %4114 = vmatprep.subr.mxu1 %v2236_v61  ;;  %4179 = vmatprep.subr.mxu0 %v2843_v10 }
 0xfad   :  { %4115 = vmatpush3.msra.mxu1 %v2236_v61  ;;  %4180 = vmatpush3.msra.mxu0 %v2843_v10 }
 0xfae   :  { %4117 = vmatmul.mubr.msk.f32.vlgmr.msra.gmra.mrb[22].mxu1 %vm403_vm1, %v2153_v62  ;;  %4182 = vmatmul.mubr.msk.f32.vlgmr.msra.gmra.mrb[12].mxu0 %vm403_vm1, %v3649_v63 }
 0xfaf   :  { %4119 = vmatprep.mubr.msk.f32.mxu1 %vm403_vm1, %v2154_v2  ;;  %4184 = vmatprep.mubr.msk.f32.mxu0 %vm403_vm1, %v3650_v3 }
 0xfb0   :  { %4425 = vmatprep.subr.bf16.mxu1 %v4712_v57  ;;  %4471 = vmatprep.subr.bf16.mxu0 %v4712_v57 }
 0xfb2   :  { %4120 = vmatmul.mubr.msk.f32.gmra.mrb[24].mxu1 %vm403_vm1, %v2155_v4  ;;  %4185 = vmatmul.mubr.msk.f32.gmra.mrb[14].mxu0 %vm403_vm1, %v3651_v5 }
 0xfb3   :  { %4130 = vmatprep.mubr.msk.f32.mxu1 %vm4713_vm2, %v4714_v58  ;;  %4195 = vmatprep.mubr.msk.f32.mxu0 %vm4713_vm2, %v4714_v58 }
 0xfbb   :  { %v2847_v16 = vpop.permute.xlu1 %2846  ;;  %v2857_v6 = vpop.permute.xlu0 %2856 }
 0xfbf   :  { %v2852_v29 = vpop.permute.xlu1 %2851  ;;  %v2240_v9 = vpop.permute.xlu0 %2239 }
 0xfc3   :  { %v2862_v8 = vpop.permute.xlu1 %2861  ;;  %v2250_v20 = vpop.permute.xlu0 %2249 }
 0xfc7   :  { %v2245_v11 = vpop.permute.xlu1 %2244 }
 0xfcb   :  { %v2255_v21 = vpop.permute.xlu1 %2254 }
0x1081   :  { %v4118_v13 = vpop.f32.mrb[22].mxu1  ;;  %v4183_v14 = vpop.f32.mrb[12].mxu0 }
0x1082   :  { %v5217_v15 = vadd.f32 %v4118_v13, %v2245_v11  ;;  %v5219_v17 = vadd.f32 %v4183_v14, %v2852_v29  ;;  %v2335_v23 = vpop.f32.mrb[23].mxu1  ;;  %v2942_v7 = vpop.f32.mrb[13].mxu0 }
0x1083   :  { %v5221_v18 = vadd.f32 %v2335_v23, %v2240_v9  ;;  %v5223_v19 = vadd.f32 %v2942_v7, %v2847_v16 }
0x1084   :  { %v2359_v22 = vmul.f32 0.044715, %v5217_v15  ;;  %v2966_v39 = vmul.f32 0.044715, %v5219_v17 }
0x1085   :  { %v2358_v26 = vmul.f32 0.044715, %v5221_v18  ;;  %v2965_v28 = vmul.f32 0.044715, %v5223_v19  ;;  %v4121_v52 = vpop.f32.mrb[24].mxu1  ;;  %v4186_v59 = vpop.f32.mrb[14].mxu0 }
0x1086   :  { %v2363_v30 = vmul.f32 %v2359_v22, %v5217_v15  ;;  %v2970_v31 = vmul.f32 %v2966_v39, %v5219_v17  ;;  %v5231_v33 = vadd.f32 %v4121_v52, %v2255_v21  ;;  %v5233_v34 = vadd.f32 %v4186_v59, %v2862_v8  ;;  %v2345_v35 = vpop.f32.mrb[25].mxu1  ;;  %v2952_v36 = vpop.f32.mrb[15].mxu0 }
0x1087   :  { %v2362_v32 = vmul.f32 %v2358_v26, %v5221_v18  ;;  %v2969_v37 = vmul.f32 %v2965_v28, %v5223_v19  ;;  %v5237_v27 = vadd.f32 %v2345_v35, %v2250_v20  ;;  %v5239_v38 = vadd.f32 %v2952_v36, %v2857_v6 }
0x1088   :  { %v2367_v40 = vmul.f32 %v2363_v30, %v5217_v15  ;;  %v2974_v41 = vmul.f32 %v2970_v31, %v5219_v17  ;;  %v2361_v42 = vmul.f32 0.044715, %v5231_v33  ;;  %v2968_v43 = vmul.f32 0.044715, %v5233_v34 }
0x1089   :  { %v2366_v44 = vmul.f32 %v2362_v32, %v5221_v18  ;;  %v2973_v45 = vmul.f32 %v2969_v37, %v5223_v19  ;;  %v2360_v46 = vmul.f32 0.044715, %v5237_v27  ;;  %v2967_v47 = vmul.f32 0.044715, %v5239_v38 }
0x108a   :  { %v2371_v48 = vadd.f32 %v2367_v40, %v5217_v15  ;;  %v2978_v49 = vadd.f32 %v2974_v41, %v5219_v17  ;;  %v2365_v50 = vmul.f32 %v2361_v42, %v5231_v33  ;;  %v2972_v51 = vmul.f32 %v2968_v43, %v5233_v34 }
0x108b   :  { %v2370_v53 = vadd.f32 %v2366_v44, %v5221_v18  ;;  %v2977_v55 = vadd.f32 %v2973_v45, %v5223_v19  ;;  %v2364_v25 = vmul.f32 %v2360_v46, %v5237_v27  ;;  %v2971_v24 = vmul.f32 %v2967_v47, %v5239_v38 }
0x108c   :  { %v2375_v61 = vmul.f32 0.7978846, %v2371_v48  ;;  %v2982_v10 = vmul.f32 0.7978846, %v2978_v49  ;;  %v2369_v62 = vmul.f32 %v2365_v50, %v5231_v33  ;;  %v2976_v63 = vmul.f32 %v2972_v51, %v5233_v34 }
0x108d   :  { %v2374_v2 = vmul.f32 0.7978846, %v2370_v53  ;;  %v2981_v3 = vmul.f32 0.7978846, %v2977_v55  ;;  %v2368_v4 = vmul.f32 %v2364_v25, %v5237_v27  ;;  %v2975_v5 = vmul.f32 %v2971_v24, %v5239_v38  ;;  %v2160_v25 = vld [vmem:[%s3535_s24] sm:$0xff]  ;;  %v2393_v24 = vpop.permute.xlu1 %2392 }
0x108e   :  { %4655 = vtanh.f32 %v2375_v61  ;;  %v2373_v16 = vadd.f32 %v2369_v62, %v5231_v33  ;;  %v2980_v29 = vadd.f32 %v2976_v63, %v5233_v34  ;;  %v2355_v20 = vmul.f32 0.5, %v5217_v15 }
0x108f   :  { %4657 = vtanh.f32 %v2982_v10  ;;  %v2372_v6 = vadd.f32 %v2368_v4, %v5237_v27  ;;  %v2979_v8 = vadd.f32 %v2975_v5, %v5239_v38  ;;  %v2962_v39 = vmul.f32 0.5, %v5219_v17 }
0x1090   :  { %4659 = vtanh.f32 %v2374_v2  ;;  %v2377_v9 = vmul.f32 0.7978846, %v2373_v16  ;;  %v2984_v11 = vmul.f32 0.7978846, %v2980_v29  ;;  %v2354_v52 = vmul.f32 0.5, %v5221_v18 }
0x1091   :  { %4661 = vtanh.f32 %v2981_v3  ;;  %v2376_v13 = vmul.f32 0.7978846, %v2372_v6  ;;  %v2983_v14 = vmul.f32 0.7978846, %v2979_v8  ;;  %v2961_v35 = vmul.f32 0.5, %v5223_v19 }
0x1092   :  { %4663 = vtanh.f32 %v2377_v9  ;;  %v2357_v41 = vmul.f32 0.5, %v5231_v33  ;;  %v2964_v18 = vmul.f32 0.5, %v5233_v34  ;;  %v2356_v19 = vmul.f32 0.5, %v5237_v27  ;;  %v3656_v27 = vld [vmem:[%s3535_s24 + $0x8] sm:$0xff]  ;;  %s4750_s24 = smov 44  }
0x1093   :  { %4665 = vtanh.f32 %v2984_v11  ;;  %v2963_v33 = vmul.f32 0.5, %v5239_v38  ;;  %v3000_v38 = vpop.permute.xlu0 %2999  ;;  %s5469_s26 = sld [smem:[%s5521_s0 + %s4750_s24]]  }
0x1094   :  { %4667 = vtanh.f32 %v2376_v13 }
0x1095   :  { %4669 = vtanh.f32 %v2983_v14 }
0x1098   :  { %v4656_v23 = vpop.eup %4655 }
0x1099   :  { %v4658_v7 = vpop.eup %4657  ;;  %v2383_v21 = vadd.f32 1.0, %v4656_v23 }
0x109a   :  { %v4660_v22 = vpop.eup %4659  ;;  %v2990_v26 = vadd.f32 1.0, %v4658_v7 }
0x109b   :  { %v4662_v28 = vpop.eup %4661  ;;  %v2382_v59 = vadd.f32 1.0, %v4660_v22  ;;  %v2387_v30 = vmul.f32 %v2383_v21, %v2355_v20  ;;  %v1420_v20 = vadd.f32 %v5138_v56, %v5042_v60  ;;  %v3612_v22 = vld [vmem:[%s4917_s11 + $0x1] ss:$0 sm:$0xff] }
0x109c   :  { %v4664_v31 = vpop.eup %4663  ;;  %v2989_v36 = vadd.f32 1.0, %v4662_v28  ;;  %v2994_v32 = vmul.f32 %v2990_v26, %v2962_v39  ;;  %v1419_v39 = vadd.f32 %v5140_v12, %v5034_v54 }
0x109d   :  { %v4666_v37 = vpop.eup %4665  ;;  %v2386_v40 = vmul.f32 %v2382_v59, %v2354_v52  ;;  %v2385_v15 = vadd.f32 1.0, %v4664_v31  ;;  %v5317_v28 = vadd.f32 %v3612_v22, %v1420_v20 }
0x109e   :  { %v4668_v17 = vpop.eup %4667  ;;  %v2993_v42 = vmul.f32 %v2989_v36, %v2961_v35  ;;  %v2992_v43 = vadd.f32 1.0, %v4666_v37  ;;  %v5320_v56 = vadd.f32 %v3612_v22, %v1419_v39 }
0x109f   :  { %v4670_v44 = vpop.eup %4669  ;;  %v4426_v45 = vpack.c.bf16 %v2387_v30, %v2386_v40  ;;  %v2384_v46 = vadd.f32 1.0, %v4668_v17  ;;  %v2389_v47 = vmul.f32 %v2385_v15, %v2357_v41  ;;  %v1434_v54 = vsel %vm213_vm0, %v5317_v28, 0.0 }
0x10a0   :  { %v4472_v48 = vpack.c.bf16 %v2994_v32, %v2993_v42  ;;  %v2991_v49 = vadd.f32 1.0, %v4670_v44  ;;  %v2996_v50 = vmul.f32 %v2992_v43, %v2964_v18  ;;  %v1431_v12 = vsel %vm213_vm0, %v5320_v56, 0.0  ;;  %v3665_v44 = vld [vmem:[%s5333_s15 + $0x80] sm:$0xff] }
0x10a1   :  { %4427 = vmatpush3.bf16.msra.mxu1 %v4426_v45  ;;  %v2388_v51 = vmul.f32 %v2384_v46, %v2356_v19  ;;  %v3666_v45 = vld [vmem:[%s5333_s15 + $0x88] sm:$0xff] }
0x10a2   :  { %4473 = vmatpush3.bf16.msra.mxu0 %v4472_v48  ;;  %4428 = vmatprep.subr.bf16.mxu1 %v4712_v57  ;;  %v2995_v53 = vmul.f32 %v2991_v49, %v2963_v33  ;;  %v4485_v19 = vpack.c.bf16 %v3666_v45, %v3665_v44  ;;  %v3669_v44 = vld [vmem:[%s5333_s15 + $0xa0] sm:$0xff]  ;;  %v3670_v45 = vld [vmem:[%s5333_s15 + $0xa8] sm:$0xff] }
0x10a3   :  { %4474 = vmatprep.subr.bf16.mxu0 %v4712_v57  ;;  %v4429_v34 = vpack.c.bf16 %v2389_v47, %v2388_v51 }
0x10a4   :  { %v4475_v55 = vpack.c.bf16 %v2996_v50, %v2995_v53  ;;  %v3689_v53 = vld [vmem:[%s5340_s28 + $0x1] ss:$0 sm:$0xff] }
0x10a5   :  { %4430 = vmatpush3.bf16.msra.mxu1 %v4429_v34 }
0x10a6   :  { %4476 = vmatpush3.bf16.msra.mxu0 %v4475_v55  ;;  %v3690_v55 = vld [vmem:[%s5345_s6 + $0x1] ss:$0 sm:$0xff] }
0x10a8   :  { %4131 = vmatmul.mubr.msk.f32.vlgmr.msra.gmra.mrb[26].mxu1 %vm213_vm0, %v2160_v25 }
0x10a9   :  { %4196 = vmatmul.mubr.msk.f32.vlgmr.msra.gmra.mrb[16].mxu0 %vm213_vm0, %v3656_v27 }
0x117b   :  { %v2464_v61 = vpop.f32.mrb[26].mxu1 }
0x117c   :  { %v2465_v10 = vadd.f32 %v2464_v61, %v2393_v24  ;;  %v3071_v62 = vpop.f32.mrb[16].mxu0  ;;  %v4132_v63 = vpop.f32.mrb[27].mxu1 }
0x117d   :  { %v3072_v2 = vadd.f32 %v3071_v62, %v3000_v38  ;;  %v4197_v3 = vpop.f32.mrb[17].mxu0 }
0x117e   :  { %2469 = vrot.lane.b32.xlu1 %v2465_v10, %s4716_s9  ;;  %v5301_v23 = vadd.f32 %v2465_v10, %v5149_v1 }
0x117f   :  { %3076 = vrot.lane.b32.xlu0 %v3072_v2, %s4716_s9  ;;  %v5283_v4 = vadd.f32 %v3072_v2, %v5149_v1  ;;  %s4743_s9 = smov 40  }
0x1180   :  { %v2474_v1 = vsel %vm213_vm0, %v5301_v23, 0.0  ;;  %v2482_v26 = vmul.f32 %v5301_v23, %v5301_v23  ;;  %s3539_s27 = sld [smem:[%s5521_s0 + %s4743_s9]]  }
0x1181   :  { %v3081_v5 = vsel %vm213_vm0, %v5283_v4, 0.0  ;;  %v3089_v16 = vmul.f32 %v5283_v4, %v5283_v4 }
0x1182   :  { %v2484_v52 = vsel %vm213_vm0, %v2482_v26, 0.0 }
0x1183   :  { %v3091_v29 = vsel %vm213_vm0, %v3089_v16, 0.0 }
0x1186   :  { %v3660_v59 = vld [vmem:[%s3539_s27 + $0x20] sm:$0xff]  ;;  %v3661_v30 = vld [vmem:[%s3539_s27 + $0x28] sm:$0xff]  ;;  %v3662_v31 = vld [vmem:[%s3539_s27 + $0x30] sm:$0xff] }
0x1187   :  { %v4477_v35 = vpack.c.bf16 %v3661_v30, %v3660_v59  ;;  %v3663_v36 = vld [vmem:[%s3539_s27 + $0x38] sm:$0xff]  ;;  %v2164_v37 = vld [vmem:[%s3539_s27] sm:$0xff]  ;;  %v2165_v40 = vld [vmem:[%s3539_s27 + $0x8] sm:$0xff] }
0x1188   :  { %v4481_v32 = vpack.c.bf16 %v3663_v36, %v3662_v31  ;;  %v2166_v41 = vld [vmem:[%s3539_s27 + $0x10] sm:$0xff]  ;;  %v4431_v15 = vpack.c.bf16 %v2165_v40, %v2164_v37  ;;  %v2167_v17 = vld [vmem:[%s3539_s27 + $0x18] sm:$0xff]  ;;  %v3638_v31 = vld [vmem:[%s5340_s28] ss:$0 sm:$0xff]  ;;  %s4751_s27 = smov 45   ;;  %s4753_s28 = smov 17  }
0x1189   :  { %4478 = vmatprep.subr.bf16.mxu0 %v4477_v35  ;;  %v4435_v42 = vpack.c.bf16 %v2167_v17, %v2166_v41  ;;  %v3639_v40 = vld [vmem:[%s5345_s6] ss:$0 sm:$0xff]  ;;  %s5476_s8 = sld [smem:[%s5521_s0 + %s4751_s27]]   ;;  %s4754_s6 = smov 47  }
0x118a   :  { %4480 = vmatpush3.bf16.msra.mxu0 %v4477_v35  ;;  %4432 = vmatprep.subr.bf16.mxu1 %v4431_v15  ;;  %s3516_s17 = sld [smem:[%s5521_s0 + %s4753_s28]]  }
0x118b   :  { %4482 = vmatprep.subr.bf16.mxu0 %v4481_v32  ;;  %4434 = vmatpush3.bf16.msra.mxu1 %v4431_v15  ;;  %s3546_s12 = sld [smem:[%s5521_s0 + %s4754_s6]]  }
0x118c   :  { %4436 = vmatprep.subr.bf16.mxu1 %v4435_v42 }
0x118e   :  { %4484 = vmatpush3.bf16.msra.mxu0 %v4481_v32 }
0x118f   :  { %4438 = vmatpush3.bf16.msra.mxu1 %v4435_v42  ;;  %4486 = vmatprep.subr.bf16.mxu0 %v4485_v19  ;;  %v3667_v42 = vld [vmem:[%s5333_s15 + $0x90] sm:$0xff] }
0x119e   :  { %3082 = vadd.xlane.f32.xlu0 %v3081_v5 }
0x11a2   :  { %3092 = vadd.xlane.f32.xlu0 %v3091_v29 }
0x11f0   :  { %v2470_v6 = vpop.permute.xlu1 %2469 }
0x11f1   :  { %v3077_v8 = vpop.permute.xlu0 %3076  ;;  %v5294_v11 = vadd.f32 %v2470_v6, %v5147_v0 }
0x11f2   :  { %v5291_v9 = vadd.f32 %v3077_v8, %v5147_v0 }
0x11f3   :  { %v2477_v0 = vsel %vm213_vm0, %v5294_v11, 0.0  ;;  %v2483_v21 = vmul.f32 %v5294_v11, %v5294_v11 }
0x11f4   :  { %v3084_v13 = vsel %vm213_vm0, %v5291_v9, 0.0  ;;  %v3090_v14 = vmul.f32 %v5291_v9, %v5291_v9 }
0x11f5   :  { %3085 = vadd.xlane.f32.xlu1 %v3084_v13  ;;  %v2487_v60 = vsel %vm213_vm0, %v2483_v21, 0.0 }
0x11f6   :  { %v3094_v7 = vsel %vm213_vm0, %v3090_v14, 0.0 }
0x11f7   :  { %3095 = vadd.xlane.f32.xlu0 %v3094_v7 }
0x11f9   :  { %2478 = vadd.xlane.f32.xlu1 %v2477_v0 }
0x11fb   :  { %2475 = vadd.xlane.f32.xlu0 %v2474_v1 }
0x11fd   :  { %2488 = vadd.xlane.f32.xlu1 %v2487_v60 }
0x11ff   :  { %2485 = vadd.xlane.f32.xlu0 %v2484_v52 }
0x1201   :  { %1435 = vadd.xlane.f32.xlu1 %v1434_v54 }
0x1203   :  { %1432 = vadd.xlane.f32.xlu0 %v1431_v12 }
0x122b   :  { %v3083_v18 = vpop.xlane.xlu0 %3082 }
0x122c   :  { %v3087_v43 = vmul.f32 0.03125, %v3083_v18  ;;  %v3668_v18 = vld [vmem:[%s5333_s15 + $0x98] sm:$0xff] }
0x122e   :  { %v3099_v47 = vmul.f32 %v3087_v43, %v3087_v43  ;;  %v3103_v50 = vsub.f32 %v5283_v4, %v3087_v43  ;;  %v4489_v43 = vpack.c.bf16 %v3668_v18, %v3667_v42 }
0x122f   :  { %v3093_v46 = vpop.xlane.xlu0 %3092 }
0x1230   :  { %v3097_v48 = vmul.f32 0.03125, %v3093_v46  ;;  %v4493_v46 = vpack.c.bf16 %v3670_v45, %v3669_v44 }
0x1232   :  { %v3101_v33 = vsub.f32 %v3097_v48, %v3099_v47  ;;  %v2170_v47 = vld [vmem:[%s5333_s15 + $0x8] sm:$0xff] }
0x1234   :  { %v3105_v49 = vadd.f32 1e-05, %v3101_v33  ;;  %v3671_v33 = vld [vmem:[%s5333_s15 + $0xb0] sm:$0xff] }
0x1236   :  { %4671 = vrsqrt.f32 %v3105_v49  ;;  %v3672_v49 = vld [vmem:[%s5333_s15 + $0xb8] sm:$0xff] }
0x1240   :  { %v4672_v51 = vpop.eup %4671 }
0x1241   :  { %v3109_v34 = vmul.f32 %v4672_v51, %v3103_v50  ;;  %v4497_v50 = vpack.c.bf16 %v3672_v49, %v3671_v33  ;;  %v2171_v51 = vld [vmem:[%s5333_s15 + $0x10] sm:$0xff] }
0x1243   :  { %v3117_v25 = vmul.f32 %v3689_v53, %v3109_v34 }
0x1245   :  { %v3125_v27 = vadd.f32 %v3690_v55, %v3117_v25  ;;  %v3674_v25 = vld [vmem:[%s5333_s15 + $0xc8] sm:$0xff] }
0x1247   :  { %4206 = vmatprep.mubr.msk.f32.mxu0 %vm213_vm0, %v3125_v27  ;;  %v2173_v27 = vld [vmem:[%s5333_s15 + $0x20] sm:$0xff] }
0x1282   :  { %v3086_v38 = vpop.xlane.xlu1 %3085 }
0x1283   :  { %v3088_v24 = vmul.f32 0.03125, %v3086_v38 }
0x1284   :  { %v3096_v61 = vpop.xlane.xlu0 %3095 }
0x1285   :  { %v3100_v10 = vmul.f32 %v3088_v24, %v3088_v24  ;;  %v3098_v62 = vmul.f32 0.03125, %v3096_v61  ;;  %v3104_v1 = vsub.f32 %v5291_v9, %v3088_v24  ;;  %v2174_v24 = vld [vmem:[%s5333_s15 + $0x28] sm:$0xff]  ;;  %v3675_v61 = vld [vmem:[%s5333_s15 + $0xd0] sm:$0xff] }
0x1286   :  { %v2479_v63 = vpop.xlane.xlu1 %2478 }
0x1287   :  { %v3102_v2 = vsub.f32 %v3098_v62, %v3100_v10  ;;  %v2481_v3 = vmul.f32 0.03125, %v2479_v63  ;;  %v3676_v10 = vld [vmem:[%s5333_s15 + $0xd8] sm:$0xff]  ;;  %v4447_v62 = vpack.c.bf16 %v2174_v24, %v2173_v27 }
0x1288   :  { %v2476_v5 = vpop.xlane.xlu0 %2475  ;;  %v4505_v63 = vpack.c.bf16 %v3676_v10, %v3675_v61 }
0x1289   :  { %v3106_v16 = vadd.f32 1e-05, %v3102_v2  ;;  %v2480_v29 = vmul.f32 0.03125, %v2476_v5  ;;  %v2493_v8 = vmul.f32 %v2481_v3, %v2481_v3  ;;  %v2497_v54 = vsub.f32 %v5294_v11, %v2481_v3  ;;  %v2175_v2 = vld [vmem:[%s5333_s15 + $0x30] sm:$0xff]  ;;  %v2176_v3 = vld [vmem:[%s5333_s15 + $0x38] sm:$0xff] }
0x128a   :  { %v2489_v6 = vpop.xlane.xlu1 %2488  ;;  %v4451_v5 = vpack.c.bf16 %v2176_v3, %v2175_v2 }
0x128b   :  { %4673 = vrsqrt.f32 %v3106_v16  ;;  %v2491_v13 = vmul.f32 0.03125, %v2489_v6  ;;  %v2492_v7 = vmul.f32 %v2480_v29, %v2480_v29  ;;  %v2496_v30 = vsub.f32 %v5301_v23, %v2480_v29  ;;  %v3677_v16 = vld [vmem:[%s5333_s15 + $0xe0] sm:$0xff]  ;;  %v3678_v29 = vld [vmem:[%s5333_s15 + $0xe8] sm:$0xff] }
0x128c   :  { %v2486_v14 = vpop.xlane.xlu0 %2485  ;;  %v2177_v6 = vld [vmem:[%s5333_s15 + $0x40] sm:$0xff] }
0x128d   :  { %v2495_v20 = vsub.f32 %v2491_v13, %v2493_v8  ;;  %v2490_v0 = vmul.f32 0.03125, %v2486_v14  ;;  %v2178_v8 = vld [vmem:[%s5333_s15 + $0x48] sm:$0xff]  ;;  %v4509_v13 = vpack.c.bf16 %v3678_v29, %v3677_v16 }
0x128e   :  { %v4455_v14 = vpack.c.bf16 %v2178_v8, %v2177_v6 }
0x128f   :  { %v2499_v21 = vadd.f32 1e-05, %v2495_v20  ;;  %v2494_v22 = vsub.f32 %v2490_v0, %v2492_v7  ;;  %v3679_v7 = vld [vmem:[%s5333_s15 + $0xf0] sm:$0xff]  ;;  %v3680_v20 = vld [vmem:[%s5333_s15 + $0xf8] sm:$0xff] }
0x1290   :  { %v2179_v0 = vld [vmem:[%s5333_s15 + $0x50] sm:$0xff] }
0x1291   :  { %4675 = vrsqrt.f32 %v2499_v21  ;;  %v2498_v39 = vadd.f32 1e-05, %v2494_v22  ;;  %v2180_v21 = vld [vmem:[%s5333_s15 + $0x58] sm:$0xff]  ;;  %v4513_v22 = vpack.c.bf16 %v3680_v20, %v3679_v7 }
0x1293   :  { %4677 = vrsqrt.f32 %v2498_v39  ;;  %v4459_v39 = vpack.c.bf16 %v2180_v21, %v2179_v0  ;;  %v3694_v0 = vld [vmem:[%s3542_s19 + $0x1] ss:$0 sm:$0xff] }
0x1295   :  { %v4674_v26 = vpop.eup %4673 }
0x1296   :  { %v3110_v60 = vmul.f32 %v4674_v26, %v3104_v1  ;;  %v2181_v1 = vld [vmem:[%s5333_s15 + $0x60] sm:$0xff]  ;;  %v2182_v26 = vld [vmem:[%s5333_s15 + $0x68] sm:$0xff] }
0x1298   :  { %v3118_v52 = vmul.f32 %v3689_v53, %v3110_v60  ;;  %v2172_v53 = vld [vmem:[%s5333_s15 + $0x18] sm:$0xff]  ;;  %v4463_v60 = vpack.c.bf16 %v2182_v26, %v2181_v1 }
0x1299   :  { %v4443_v34 = vpack.c.bf16 %v2172_v53, %v2171_v51 }
0x129a   :  { %v3126_v12 = vadd.f32 %v3690_v55, %v3118_v52  ;;  %v3673_v55 = vld [vmem:[%s5333_s15 + $0xc0] sm:$0xff]  ;;  %v2183_v52 = vld [vmem:[%s5333_s15 + $0x70] sm:$0xff] }
0x129b   :  { %v4676_v59 = vpop.eup %4675  ;;  %v4501_v38 = vpack.c.bf16 %v3674_v25, %v3673_v55 }
0x129c   :  { %4207 = vmatmul.mubr.msk.f32.vlgmr.msra.gmra.mrb[18].mxu0 %vm213_vm0, %v3126_v12  ;;  %v2503_v35 = vmul.f32 %v4676_v59, %v2497_v54  ;;  %v2184_v54 = vld [vmem:[%s5333_s15 + $0x78] sm:$0xff]  ;;  %v3691_v59 = vld [vmem:[%s3540_s14 + $0x1] ss:$0 sm:$0xff] }
0x129d   :  { %v4678_v36 = vpop.eup %4677  ;;  %4488 = vmatpush3.bf16.msra.mxu0 %v4485_v19  ;;  %v2169_v19 = vld [vmem:[%s5333_s15] sm:$0xff]  ;;  %v4467_v12 = vpack.c.bf16 %v2184_v54, %v2183_v52  ;;  %s4752_s15 = smov 16  }
0x129e   :  { %v2502_v32 = vmul.f32 %v4678_v36, %v2496_v30  ;;  %v2511_v37 = vmul.f32 %v3638_v31, %v2503_v35  ;;  %4490 = vmatprep.subr.bf16.mxu0 %v4489_v43  ;;  %v4439_v48 = vpack.c.bf16 %v2170_v47, %v2169_v19  ;;  %s3515_s13 = sld [smem:[%s5521_s0 + %s4752_s15]]  }
0x12a0   :  { %v2510_v41 = vmul.f32 %v3638_v31, %v2502_v32  ;;  %v2519_v17 = vadd.f32 %v3639_v40, %v2511_v37  ;;  %4440 = vmatprep.subr.bf16.mxu1 %v4439_v48 }
0x12a1   :  { %4492 = vmatpush3.bf16.msra.mxu0 %v4489_v43 }
0x12a2   :  { %v2518_v15 = vadd.f32 %v3639_v40, %v2510_v41  ;;  %4494 = vmatprep.subr.bf16.mxu0 %v4493_v46 }
0x12a4   :  { %4141 = vmatprep.mubr.msk.f32.mxu1 %vm213_vm0, %v2518_v15 }
0x12a5   :  { %4142 = vmatmul.mubr.msk.f32.vlgmr.msra.gmra.mrb[28].mxu1 %vm213_vm0, %v2519_v17  ;;  %4496 = vmatpush3.bf16.msra.mxu0 %v4493_v46  ;;  %v3640_v17 = vld [vmem:[%s3540_s14] ss:$0 sm:$0xff]  ;;  %s4755_s14 = smov 64  }
0x12a6   :  { %4442 = vmatpush3.bf16.msra.mxu1 %v4439_v48  ;;  %4498 = vmatprep.subr.bf16.mxu0 %v4497_v50 }
0x12a7   :  { %4444 = vmatprep.subr.bf16.mxu1 %v4443_v34 }
0x12a9   :  { %4500 = vmatpush3.bf16.msra.mxu0 %v4497_v50 }
0x12aa   :  { %4446 = vmatpush3.bf16.msra.mxu1 %v4443_v34  ;;  %4502 = vmatprep.subr.bf16.mxu0 %v4501_v38 }
0x12ab   :  { %4448 = vmatprep.subr.bf16.mxu1 %v4447_v62 }
0x12ad   :  { %4504 = vmatpush3.bf16.msra.mxu0 %v4501_v38 }
0x12ae   :  { %4450 = vmatpush3.bf16.msra.mxu1 %v4447_v62  ;;  %4506 = vmatprep.subr.bf16.mxu0 %v4505_v63 }
0x12af   :  { %4452 = vmatprep.subr.bf16.mxu1 %v4451_v5 }
0x12b1   :  { %4508 = vmatpush3.bf16.msra.mxu0 %v4505_v63 }
0x12b2   :  { %4454 = vmatpush3.bf16.msra.mxu1 %v4451_v5  ;;  %4510 = vmatprep.subr.bf16.mxu0 %v4509_v13 }
0x12b3   :  { %4456 = vmatprep.subr.bf16.mxu1 %v4455_v14 }
0x12b5   :  { %4512 = vmatpush3.bf16.msra.mxu0 %v4509_v13 }
0x12b6   :  { %4458 = vmatpush3.bf16.msra.mxu1 %v4455_v14  ;;  %4514 = vmatprep.subr.bf16.mxu0 %v4513_v22 }
0x12b7   :  { %4460 = vmatprep.subr.bf16.mxu1 %v4459_v39 }
0x12b9   :  { %4516 = vmatpush3.bf16.msra.mxu0 %v4513_v22 }
0x12ba   :  { %4462 = vmatpush3.bf16.msra.mxu1 %v4459_v39 }
0x12bb   :  { %4464 = vmatprep.subr.bf16.mxu1 %v4463_v60 }
0x12be   :  { %4466 = vmatpush3.bf16.msra.mxu1 %v4463_v60 }
0x12bf   :  { %4468 = vmatprep.subr.bf16.mxu1 %v4467_v12 }
0x12c2   :  { %4470 = vmatpush3.bf16.msra.mxu1 %v4467_v12 }
0x12c3   :  { %4517 = vmatprep.subr.bf16.mxu1 %v4712_v57 }
0x136f   :  { %v4208_v30 = vpop.f32.mrb[18].mxu0 }
0x1370   :  { %v3211_v31 = vadd.f32 %v4208_v30, %v3691_v59  ;;  %v3205_v35 = vpop.f32.mrb[19].mxu0  ;;  %v3643_v30 = vld [vmem:[%s3542_s19] ss:$0 sm:$0xff] }
0x1371   :  { %v3206_v36 = vadd.f32 %v3691_v59, %v3205_v35  ;;  %v1440_v59 = vmul.f32 %v5317_v28, %v5317_v28 }
0x1372   :  { %v3217_v32 = vmul.f32 0.044715, %v3211_v31  ;;  %v3215_v2 = vmul.f32 0.5, %v3211_v31 }
0x1373   :  { %v3216_v37 = vmul.f32 0.044715, %v3206_v36  ;;  %v3214_v62 = vmul.f32 0.5, %v3206_v36 }
0x1374   :  { %v3219_v40 = vmul.f32 %v3217_v32, %v3211_v31  ;;  %v1439_v32 = vmul.f32 %v5320_v56, %v5320_v56 }
0x1375   :  { %v3218_v41 = vmul.f32 %v3216_v37, %v3206_v36 }
0x1376   :  { %v3221_v15 = vmul.f32 %v3219_v40, %v3211_v31 }
0x1377   :  { %v3220_v42 = vmul.f32 %v3218_v41, %v3206_v36  ;;  %v1444_v41 = vsel %vm213_vm0, %v1440_v59, 0.0 }
0x1378   :  { %v3223_v18 = vadd.f32 %v3221_v15, %v3211_v31  ;;  %v4143_v43 = vpop.f32.mrb[28].mxu1 }
0x1379   :  { %v2604_v44 = vadd.f32 %v4143_v43, %v3640_v17  ;;  %v2598_v45 = vpop.f32.mrb[29].mxu1  ;;  %v3222_v19 = vadd.f32 %v3220_v42, %v3206_v36 }
0x137a   :  { %v2599_v46 = vadd.f32 %v3640_v17, %v2598_v45  ;;  %v3225_v47 = vmul.f32 0.7978846, %v3223_v18  ;;  %v1441_v17 = vsel %vm213_vm0, %v1439_v32, 0.0  ;;  %v3395_v45 = vld [vmem:[%s5439_s22] sm:$0xff] }
0x137b   :  { %v2610_v48 = vmul.f32 0.044715, %v2604_v44  ;;  %v3224_v33 = vmul.f32 0.7978846, %v3222_v19  ;;  %v2608_v14 = vmul.f32 0.5, %v2604_v44  ;;  %v3396_v19 = vld [vmem:[%s5439_s22 + $0x8] sm:$0xff] }
0x137c   :  { %v2609_v49 = vmul.f32 0.044715, %v2599_v46  ;;  %4679 = vtanh.f32 %v3225_v47  ;;  %v2607_v8 = vmul.f32 0.5, %v2599_v46  ;;  %v4518_v47 = vpack.c.bf16 %v3396_v19, %v3395_v45  ;;  %v3697_v19 = vld [vmem:[%s5469_s26 + $0x1] ss:$0 sm:$0xff] }
0x137d   :  { %v2612_v50 = vmul.f32 %v2610_v48, %v2604_v44  ;;  %4681 = vtanh.f32 %v3224_v33  ;;  %v3398_v48 = vld [vmem:[%s5439_s22 + $0x18] sm:$0xff] }
0x137e   :  { %v2611_v51 = vmul.f32 %v2609_v49, %v2599_v46  ;;  %v3399_v49 = vld [vmem:[%s5439_s22 + $0x20] sm:$0xff] }
0x137f   :  { %v2614_v53 = vmul.f32 %v2612_v50, %v2604_v44  ;;  %v3400_v50 = vld [vmem:[%s5439_s22 + $0x28] sm:$0xff] }
0x1380   :  { %v2613_v34 = vmul.f32 %v2611_v51, %v2599_v46  ;;  %v4524_v51 = vpack.c.bf16 %v3400_v50, %v3399_v49  ;;  %v3698_v49 = vld [vmem:[%s5476_s8 + $0x1] ss:$0 sm:$0xff] }
0x1381   :  { %v2616_v55 = vadd.f32 %v2614_v53, %v2604_v44  ;;  %v3401_v53 = vld [vmem:[%s5439_s22 + $0x30] sm:$0xff] }
0x1382   :  { %v2615_v25 = vadd.f32 %v2613_v34, %v2599_v46  ;;  %v3397_v46 = vld [vmem:[%s5439_s22 + $0x10] sm:$0xff]  ;;  %v3402_v34 = vld [vmem:[%s5439_s22 + $0x38] sm:$0xff] }
0x1383   :  { %v2618_v27 = vmul.f32 0.7978846, %v2616_v55  ;;  %v4521_v33 = vpack.c.bf16 %v3398_v48, %v3397_v46  ;;  %v4527_v55 = vpack.c.bf16 %v3402_v34, %v3401_v53 }
0x1384   :  { %v2617_v38 = vmul.f32 0.7978846, %v2615_v25  ;;  %v3403_v25 = vld [vmem:[%s5439_s22 + $0x40] sm:$0xff] }
0x1385   :  { %4683 = vtanh.f32 %v2618_v27  ;;  %v3404_v27 = vld [vmem:[%s5439_s22 + $0x48] sm:$0xff] }
0x1386   :  { %v4680_v24 = vpop.eup %4679  ;;  %4685 = vtanh.f32 %v2617_v38  ;;  %v4530_v38 = vpack.c.bf16 %v3404_v27, %v3403_v25 }
0x1387   :  { %v4682_v61 = vpop.eup %4681  ;;  %v3229_v10 = vadd.f32 1.0, %v4680_v24  ;;  %v1436_v24 = vpop.xlane.xlu1 %1435 }
0x1388   :  { %v3228_v63 = vadd.f32 1.0, %v4682_v61  ;;  %v1433_v61 = vpop.xlane.xlu0 %1432 }
0x1389   :  { %v3231_v5 = vmul.f32 %v3229_v10, %v3215_v2 }
0x138a   :  { %v3230_v3 = vmul.f32 %v3228_v63, %v3214_v62 }
0x138c   :  { %4241 = vmatprep.mubr.f32.mxu0 %v3230_v3 }
0x138d   :  { %4242 = vmatmul.mubr.f32.vlgmr.msra.gmra.mrb[20].mxu0 %v3231_v5  ;;  %v5456_v5 = vmul.f32 0.03125, %v1436_v24 }
0x138f   :  { %v4684_v16 = vpop.eup %4683  ;;  %v1454_v50 = vsub.f32 %v5317_v28, %v5456_v5 }
0x1390   :  { %v4686_v29 = vpop.eup %4685  ;;  %v2622_v6 = vadd.f32 1.0, %v4684_v16 }
0x1391   :  { %v2621_v13 = vadd.f32 1.0, %v4686_v29 }
0x1392   :  { %v2624_v20 = vmul.f32 %v2622_v6, %v2608_v14 }
0x1393   :  { %v2623_v7 = vmul.f32 %v2621_v13, %v2607_v8  ;;  %v5458_v8 = vmul.f32 0.03125, %v1433_v61  ;;  %v3614_v61 = vld [vmem:[%s3516_s17] ss:$0 sm:$0xff] }
0x1395   :  { %4176 = vmatprep.mubr.f32.mxu1 %v2623_v7 }
0x1396   :  { %4177 = vmatmul.mubr.f32.vlgmr.msra.gmra.mrb[30].mxu1 %v2624_v20 }
0x1397   :  { %4268 = vmatprep.mubr.msk.f32.mxu1 %vm4713_vm2, %v4714_v58  ;;  %4519 = vmatpush3.bf16.msra.mxu1 %v4518_v47 }
0x1398   :  { %4520 = vmatprep.subr.bf16.mxu1 %v4712_v57 }
0x139b   :  { %4522 = vmatpush3.bf16.msra.mxu1 %v4521_v33 }
0x139c   :  { %4523 = vmatprep.subr.bf16.mxu1 %v4712_v57 }
0x139f   :  { %4525 = vmatpush3.bf16.msra.mxu1 %v4524_v51 }
0x13a0   :  { %4526 = vmatprep.subr.bf16.mxu1 %v4712_v57 }
0x13a3   :  { %4528 = vmatpush3.bf16.msra.mxu1 %v4527_v55  ;;  %v3613_v55 = vld [vmem:[%s3515_s13] ss:$0 sm:$0xff] }
0x13a4   :  { %4529 = vmatprep.subr.bf16.mxu1 %v4712_v57 }
0x13a7   :  { %4531 = vmatpush3.bf16.msra.mxu1 %v4530_v38 }
0x13a8   :  { %4532 = vmatprep.subr.bf16.mxu1 %v4712_v57  ;;  %v1450_v57 = vmul.f32 %v5456_v5, %v5456_v5 }
0x1460   :  { %v4243_v21 = vpop.f32.mrb[20].mxu0 }
0x1461   :  { %v3308_v22 = vadd.f32 %v4243_v21, %v5291_v9  ;;  %v3298_v39 = vpop.f32.mrb[21].mxu0 }
0x1462   :  { %v3307_v1 = vadd.f32 %v3298_v39, %v5283_v4 }
0x1463   :  { %v5400_v26 = vadd.f32 %v3694_v0, %v3308_v22 }
0x1464   :  { %v5402_v60 = vadd.f32 %v3694_v0, %v3307_v1  ;;  %v1449_v1 = vmul.f32 %v5458_v8, %v5458_v8 }
0x1465   :  { %v3324_v52 = vsel %vm213_vm0, %v5400_v26, 0.0  ;;  %v3330_v58 = vmul.f32 %v5400_v26, %v5400_v26 }
0x1466   :  { %3325 = vadd.xlane.f32.xlu1 %v3324_v52  ;;  %v3321_v54 = vsel %vm213_vm0, %v5402_v60, 0.0  ;;  %v3329_v9 = vmul.f32 %v5402_v60, %v5402_v60 }
0x1467   :  { %3322 = vadd.xlane.f32.xlu0 %v3321_v54  ;;  %v3334_v4 = vsel %vm213_vm0, %v3330_v58, 0.0 }
0x1468   :  { %v3331_v36 = vsel %vm213_vm0, %v3329_v9, 0.0 }
0x1469   :  { %v4178_v12 = vpop.f32.mrb[30].mxu1 }
0x146a   :  { %v2701_v31 = vadd.f32 %v4178_v12, %v5294_v11  ;;  %3335 = vadd.xlane.f32.xlu1 %v3334_v4  ;;  %v2691_v35 = vpop.f32.mrb[31].mxu1 }
0x146b   :  { %v2700_v37 = vadd.f32 %v2691_v35, %v5301_v23  ;;  %3332 = vadd.xlane.f32.xlu0 %v3331_v36 }
0x146c   :  { %v5420_v40 = vadd.f32 %v3643_v30, %v2701_v31 }
0x146d   :  { %v5423_v15 = vadd.f32 %v3643_v30, %v2700_v37 }
0x146e   :  { %1445 = vadd.xlane.f32.xlu1 %v1444_v41  ;;  %v2715_v11 = vsel %vm213_vm0, %v5420_v40, 0.0  ;;  %v2721_v42 = vmul.f32 %v5420_v40, %v5420_v40 }
0x146f   :  { %1442 = vadd.xlane.f32.xlu0 %v1441_v17  ;;  %v2712_v23 = vsel %vm213_vm0, %v5423_v15, 0.0  ;;  %v2720_v18 = vmul.f32 %v5423_v15, %v5423_v15 }
0x1470   :  { %v2725_v43 = vsel %vm213_vm0, %v2721_v42, 0.0 }
0x1471   :  { %v2722_v44 = vsel %vm213_vm0, %v2720_v18, 0.0 }
0x1472   :  { %2716 = vadd.xlane.f32.xlu1 %v2715_v11 }
0x1473   :  { %2713 = vadd.xlane.f32.xlu0 %v2712_v23 }
0x1476   :  { %2726 = vadd.xlane.f32.xlu1 %v2725_v43 }
0x1477   :  { %2723 = vadd.xlane.f32.xlu0 %v2722_v44 }
0x14f3   :  { %v3326_v10 = vpop.xlane.xlu1 %3325 }
0x14f4   :  { %v3328_v62 = vmul.f32 0.03125, %v3326_v10  ;;  %v3323_v63 = vpop.xlane.xlu0 %3322 }
0x14f5   :  { %v3327_v2 = vmul.f32 0.03125, %v3323_v63 }
0x14f6   :  { %v3340_v16 = vmul.f32 %v3328_v62, %v3328_v62  ;;  %v3344_v23 = vsub.f32 %v5400_v26, %v3328_v62  ;;  %v1453_v26 = vsub.f32 %v5320_v56, %v5458_v8 }
0x14f7   :  { %v3336_v3 = vpop.xlane.xlu1 %3335  ;;  %v3339_v13 = vmul.f32 %v3327_v2, %v3327_v2  ;;  %v3343_v44 = vsub.f32 %v5402_v60, %v3327_v2 }
0x14f8   :  { %v3338_v29 = vmul.f32 0.03125, %v3336_v3  ;;  %v3333_v6 = vpop.xlane.xlu0 %3332 }
0x14f9   :  { %v3337_v14 = vmul.f32 0.03125, %v3333_v6 }
0x14fa   :  { %v3342_v7 = vsub.f32 %v3338_v29, %v3340_v16 }
0x14fb   :  { %v3341_v20 = vsub.f32 %v3337_v14, %v3339_v13  ;;  %v1446_v0 = vpop.xlane.xlu1 %1445  ;;  %v3405_v14 = vld [vmem:[%s5439_s22 + $0x50] sm:$0xff] }
0x14fc   :  { %v3346_v21 = vadd.f32 1e-05, %v3342_v7  ;;  %v1448_v22 = vmul.f32 0.03125, %v1446_v0  ;;  %v1443_v39 = vpop.xlane.xlu0 %1442  ;;  %v3406_v7 = vld [vmem:[%s5439_s22 + $0x58] sm:$0xff]  ;;  %v3644_v0 = vld [vmem:[%s5469_s26] ss:$0 sm:$0xff] }
0x14fd   :  { %v3345_v52 = vadd.f32 1e-05, %v3341_v20  ;;  %v1447_v58 = vmul.f32 0.03125, %v1443_v39  ;;  %v4533_v39 = vpack.c.bf16 %v3406_v7, %v3405_v14 }
0x14fe   :  { %4687 = vrsqrt.f32 %v3346_v21  ;;  %v1452_v54 = vsub.f32 %v1448_v22, %v1450_v57 }
0x14ff   :  { %4689 = vrsqrt.f32 %v3345_v52  ;;  %v1451_v9 = vsub.f32 %v1447_v58, %v1449_v1  ;;  %v2717_v12 = vpop.xlane.xlu1 %2716  ;;  %4534 = vmatpush3.bf16.msra.mxu1 %v4533_v39 }
0x1500   :  { %v1456_v4 = vadd.f32 1e-05, %v1452_v54  ;;  %v5464_v59 = vmul.f32 0.03125, %v2717_v12  ;;  %v2714_v30 = vpop.xlane.xlu0 %2713  ;;  %v3645_v12 = vld [vmem:[%s5476_s8] ss:$0 sm:$0xff] }
0x1501   :  { %v1455_v31 = vadd.f32 1e-05, %v1451_v9  ;;  %v5471_v35 = vmul.f32 0.03125, %v2714_v30 }
0x1502   :  { %4691 = vrsqrt.f32 %v1456_v4  ;;  %v2731_v32 = vmul.f32 %v5464_v59, %v5464_v59  ;;  %v2735_v29 = vsub.f32 %v5420_v40, %v5464_v59 }
0x1503   :  { %4693 = vrsqrt.f32 %v1455_v31  ;;  %v2727_v36 = vpop.xlane.xlu1 %2726  ;;  %v2730_v17 = vmul.f32 %v5471_v35, %v5471_v35  ;;  %v2734_v6 = vsub.f32 %v5423_v15, %v5471_v35 }
0x1504   :  { %v2729_v37 = vmul.f32 0.03125, %v2727_v36  ;;  %v2724_v41 = vpop.xlane.xlu0 %2723 }
0x1505   :  { %v2728_v11 = vmul.f32 0.03125, %v2724_v41 }
0x1506   :  { %v2733_v42 = vsub.f32 %v2729_v37, %v2731_v32 }
0x1507   :  { %v2732_v18 = vsub.f32 %v2728_v11, %v2730_v17 }
0x1508   :  { %v4688_v43 = vpop.eup %4687  ;;  %v2737_v45 = vadd.f32 1e-05, %v2733_v42 }
0x1509   :  { %v4690_v46 = vpop.eup %4689  ;;  %v3350_v47 = vmul.f32 %v4688_v43, %v3344_v23  ;;  %v2736_v48 = vadd.f32 1e-05, %v2732_v18 }
0x150a   :  { %v3349_v33 = vmul.f32 %v4690_v46, %v3343_v44  ;;  %4695 = vrsqrt.f32 %v2737_v45 }
0x150b   :  { %4697 = vrsqrt.f32 %v2736_v48  ;;  %v3358_v51 = vmul.f32 %v3697_v19, %v3350_v47 }
0x150c   :  { %v4692_v53 = vpop.eup %4691  ;;  %v3357_v34 = vmul.f32 %v3697_v19, %v3349_v33 }
0x150d   :  { %v4694_v60 = vpop.eup %4693  ;;  %v1460_v25 = vmul.f32 %v4692_v53, %v1454_v50  ;;  %v3366_v27 = vadd.f32 %v3698_v49, %v3358_v51 }
0x150e   :  { %v1459_v38 = vmul.f32 %v4694_v60, %v1453_v26  ;;  %v3365_v24 = vadd.f32 %v3698_v49, %v3357_v34  ;;  %v102_v34 = vstv %s3546_s12 }
0x150f   :  { %v3375_v10 = vsel %vm213_vm0, %v3366_v27, 0.0  ;;  %v1468_v28 = vmul.f32 %v3613_v55, %v1460_v25  ;;  %103 = vst [vmem:[#allocation2] sm:$0x1] %v102_v34 }
0x1510   :  { %v3367_v62 = vsel %vm213_vm0, %v3365_v24, 0.0  ;;  %v3376_v63 = vrot.slane %v3375_v10, 4  ;;  %v1467_v2 = vmul.f32 %v3613_v55, %v1459_v38 }
0x1511   :  { %v3368_v3 = vrot.slane %v3367_v62, 4  ;;  %v1476_v56 = vadd.f32 %v3614_v61, %v1468_v28 }
0x1512   :  { %v3377_v5 = vadd.f32 %v3376_v63, %v3375_v10  ;;  %v1475_v16 = vadd.f32 %v3614_v61, %v1467_v2 }
0x1513   :  { %v3369_v8 = vadd.f32 %v3368_v3, %v3367_v62  ;;  %v1486_v13 = vsel %vm213_vm0, %v1476_v56, 0.0 }
0x1514   :  { %v4696_v20 = vpop.eup %4695  ;;  %v3378_v57 = vrot.slane %v3377_v5, 2  ;;  %v1477_v21 = vsel %vm213_vm0, %v1475_v16, 0.0  ;;  %v1487_v22 = vrot.slane %v1486_v13, 4 }
0x1515   :  { %v4698_v1 = vpop.eup %4697  ;;  %v2741_v52 = vmul.f32 %v4696_v20, %v2735_v29  ;;  %v3370_v58 = vrot.slane %v3369_v8, 2  ;;  %v1478_v40 = vrot.slane %v1477_v21, 4 }
0x1516   :  { %v2740_v54 = vmul.f32 %v4698_v1, %v2734_v6  ;;  %v3379_v9 = vadd.f32 %v3378_v57, %v3377_v5  ;;  %v1488_v15 = vadd.f32 %v1487_v22, %v1486_v13 }
0x1517   :  { %v2749_v4 = vmul.f32 %v3644_v0, %v2741_v52  ;;  %v3371_v59 = vadd.f32 %v3370_v58, %v3369_v8  ;;  %v1479_v30 = vadd.f32 %v1478_v40, %v1477_v21  ;;  %v3699_v8 = vld [vmem:[#allocation2] ss:$0 sm:$0xff] }
0x1518   :  { %v2748_v31 = vmul.f32 %v3644_v0, %v2740_v54  ;;  %v3380_v35 = vrot.slane %v3379_v9, 1  ;;  %v1489_v36 = vrot.slane %v1488_v15, 2 }
0x1519   :  { %v3372_v32 = vrot.slane %v3371_v59, 1  ;;  %v1480_v37 = vrot.slane %v1479_v30, 2  ;;  %v2757_v41 = vadd.f32 %v3645_v12, %v2749_v4 }
0x151a   :  { %v3381_v17 = vadd.f32 %v3380_v35, %v3379_v9  ;;  %v1490_v11 = vadd.f32 %v1489_v36, %v1488_v15  ;;  %v2756_v42 = vadd.f32 %v3645_v12, %v2748_v31 }
0x151b   :  { %v3373_v23 = vadd.f32 %v3372_v32, %v3371_v59  ;;  %v1481_v18 = vadd.f32 %v1480_v37, %v1479_v30  ;;  %v2766_v43 = vsel %vm213_vm0, %v2757_v41, 0.0 }
0x151c   :  { %v3382_v44 = vmul.f32 0.125, %v3381_v17  ;;  %v1491_v45 = vrot.slane %v1490_v11, 1  ;;  %v2758_v19 = vsel %vm213_vm0, %v2756_v42, 0.0  ;;  %v2767_v46 = vrot.slane %v2766_v43, 4 }
0x151d   :  { %v3374_v47 = vmul.f32 0.125, %v3373_v23  ;;  %v1482_v48 = vrot.slane %v1481_v18, 1  ;;  %v2759_v33 = vrot.slane %v2758_v19, 4 }
0x151e   :  { %v1492_v49 = vadd.f32 %v1491_v45, %v1490_v11  ;;  %v2768_v50 = vadd.f32 %v2767_v46, %v2766_v43 }
0x151f   :  { %v3383_v51 = vsel %vm1494_vm3, %v3374_v47, %v3382_v44  ;;  %v1483_v53 = vadd.f32 %v1482_v48, %v1481_v18  ;;  %v2760_v26 = vadd.f32 %v2759_v33, %v2758_v19 }
0x1520   :  { %3385 = vrot.lane.b32.xlu0 %v3383_v51, %s4710_s30  ;;  %v1493_v55 = vmul.f32 0.125, %v1492_v49  ;;  %v2769_v60 = vrot.slane %v2768_v50, 2  ;;  %s4756_s30 = smov 48  }
0x1521   :  { %v1485_v25 = vmul.f32 0.125, %v1483_v53  ;;  %v2761_v27 = vrot.slane %v2760_v26, 2  ;;  %s3547_s16 = sld [smem:[%s5521_s0 + %s4756_s30]]  }
0x1522   :  { %v2770_v38 = vadd.f32 %v2769_v60, %v2768_v50 }
0x1523   :  { %v1495_v24 = vsel %vm1494_vm3, %v1485_v25, %v1493_v55  ;;  %v2762_v61 = vadd.f32 %v2761_v27, %v2760_v26 }
0x1524   :  { %3389 = vrot.lane.b32.xlu1 %v1495_v24, %s4755_s14  ;;  %v2771_v10 = vrot.slane %v2770_v38, 1 }
0x1525   :  { %v2763_v28 = vrot.slane %v2762_v61, 1 }
0x1526   :  { %v2772_v62 = vadd.f32 %v2771_v10, %v2770_v38 }
0x1527   :  { %v2764_v63 = vadd.f32 %v2763_v28, %v2762_v61 }
0x1528   :  { %v2773_v2 = vmul.f32 0.125, %v2772_v62 }
0x1529   :  { %v2765_v3 = vmul.f32 0.125, %v2764_v63 }
0x152b   :  { %v2774_v56 = vsel %vm1494_vm3, %v2765_v3, %v2773_v2 }
0x1592   :  { %v3386_v5 = vpop.permute.xlu0 %3385 }
0x1593   :  { %v3392_v16 = vsel %vm213_vm0, %v2774_v56, %v3386_v5 }
0x1596   :  { %v3390_v29 = vpop.permute.xlu1 %3389 }
0x1597   :  { %v3394_v6 = vsel %vm3393_vm4, %v3392_v16, %v3390_v29 }
0x1598   :  { %4269 = vmatmul.mubr.msk.f32.vlgmr.msra.gmra.mrb[32].mxu1 %vm3414_vm5, %v3394_v6 }
0x166b   :  { %v3484_v13 = vpop.f32.mrb[32].mxu1 }
0x166c   :  { %v3485_v14 = vadd.f32 %v3699_v8, %v3484_v13  ;;  %v4270_v7 = vpop.f32.mrb[33].mxu1 }
0x166e   :  { %v3701_v20 = vmul.f32 -1.442695, %v3485_v14 }
0x1670   :  { %4699 = vpow2.f32 %v3701_v20 }
0x167a   :  { %v4700_v0 = vpop.eup %4699 }
0x167b   :  { %v3491_v57 = vadd.f32 1.0, %v4700_v0 }
0x167d   :  { %4701 = vrcp.f32 %v3491_v57 }
0x1687   :  { %v4702_v21 = vpop.eup %4701 }
0x1688   :  { %3495 = vst.msk [vmem:[%s3547_s16] sm:$0x3] %vm3494_vm6, %v4702_v21 }

</bundles_post_ra>
